<compile_context>
chip_gen: v7x
topology: tpu7x:2x2x1
jax: 0.10.0
libtpu: 0.0.40
codegen_flags: <defaults>
</compile_context>

<pallas_src>
import functools

import jax
import jax.numpy as jnp
from jax.experimental import pallas as pl
from jax.experimental.pallas import tpu as pltpu

_LANE = 128
_SUBLANE = 8


def _round_up(x, m):
    return ((x + m - 1) // m) * m


def _pick_tile(dim, target, base):
    """Largest multiple-of-`base` divisor of `dim` that is <= target (dim % base == 0)."""
    best = base
    t = base
    while t <= min(dim, target):
        if dim % t == 0:
            best = t
        t += base
    return min(best, dim)


def _pick_time_block(T, Bp, Hp, budget_bytes=8 * 1024 * 1024, max_tt=32):
    """Timesteps per grid step so the pipelined gx/h blocks stay within a small VMEM budget."""
    per_step = (4 * Hp + Hp) * Bp * 4 * 2  # gx + h blocks, double-buffered, f32
    tt = max(1, min(T, max_tt, budget_bytes // max(per_step, 1)))
    while T % tt:
        tt -= 1
    return tt


# ----------------------------------------------------------------------------
# Pallas kernels
# ----------------------------------------------------------------------------
def _proj_kernel(x_ref, w_ref, b_ref, o_ref):
    """One (tm, K) x (K, tn) tile of the hoisted input projection, plus bias."""
    o_ref[...] = (
        jnp.dot(x_ref[...], w_ref[...], preferred_element_type=jnp.float32) + b_ref[...]
    ).astype(o_ref.dtype)


def _lstm_chunk_body(gx_ref, h_sc, c_sc, whh_sc, emit):
    """Run the TT timesteps of the current chunk. `emit(tt, h)` optionally stores h."""
    Hp = h_sc.shape[-1]
    TT = gx_ref.shape[0]

    def step(tt, carry):
        # Precomputed x-projection (+bias) for this step, plus the serial h @ W_hh dot.
        gates = gx_ref[tt] + jnp.dot(
            h_sc[...], whh_sc[...], preferred_element_type=jnp.float32
        )  # (Bp, 4Hp); gate order i, f, g, o, each lane-aligned (Hp % 128 == 0)
        i = jax.nn.sigmoid(gates[:, 0 * Hp:1 * Hp])
        f = jax.nn.sigmoid(gates[:, 1 * Hp:2 * Hp])
        g = jnp.tanh(gates[:, 2 * Hp:3 * Hp])
        o = jax.nn.sigmoid(gates[:, 3 * Hp:4 * Hp])
        c = f * c_sc[...] + i * g
        h = o * jnp.tanh(c)
        c_sc[...] = c
        h_sc[...] = h
        emit(tt, h)
        return carry

    jax.lax.fori_loop(0, TT, step, 0, unroll=True)


def _lstm_seq_kernel(gx_ref, whh_hbm, out_ref, h_sc, c_sc, whh_sc, sem):
    """LSTM recurrence over time chunks; writes all hidden states (intermediate layers)."""
    @pl.when(pl.program_id(0) == 0)
    def _():
        # Copy the resident recurrent weight into VMEM exactly once (no double buffering).
        pltpu.make_async_copy(whh_hbm, whh_sc, sem).start()
        h_sc[...] = jnp.zeros_like(h_sc)
        c_sc[...] = jnp.zeros_like(c_sc)
        pltpu.make_async_copy(whh_hbm, whh_sc, sem).wait()

    def emit(tt, h):
        out_ref[tt] = h.astype(out_ref.dtype)

    _lstm_chunk_body(gx_ref, h_sc, c_sc, whh_sc, emit)


def _lstm_last_kernel(gx_ref, whh_hbm, wlab_ref, blab_ref, out_ref, h_sc, c_sc, whh_sc, sem):
    """Last LSTM layer: keeps h/c in VMEM only and fuses the Linear head on the final step."""
    @pl.when(pl.program_id(0) == 0)
    def _():
        pltpu.make_async_copy(whh_hbm, whh_sc, sem).start()
        h_sc[...] = jnp.zeros_like(h_sc)
        c_sc[...] = jnp.zeros_like(c_sc)
        pltpu.make_async_copy(whh_hbm, whh_sc, sem).wait()

    _lstm_chunk_body(gx_ref, h_sc, c_sc, whh_sc, emit=lambda tt, h: None)

    @pl.when(pl.program_id(0) == pl.num_programs(0) - 1)
    def _():
        out_ref[...] = (
            jnp.dot(h_sc[...], wlab_ref[...], preferred_element_type=jnp.float32)
            + blab_ref[...]
        ).astype(out_ref.dtype)


# ----------------------------------------------------------------------------
# Wrappers
# ----------------------------------------------------------------------------
def matmul_bias(x, w, b, *, tm_target=256, tn_target=512):
    """x: (M, K), w: (K, N), b: (1, N) -> (M, N).  Tiled, both grid dims parallel."""
    M, K = x.shape
    _, N = w.shape
    tm = _pick_tile(M, tm_target, _SUBLANE)
    tn = _pick_tile(N, tn_target, _LANE)
    return pl.pallas_call(
        _proj_kernel,
        out_shape=jax.ShapeDtypeStruct((M, N), jnp.float32),
        grid_spec=pltpu.PrefetchScalarGridSpec(
            num_scalar_prefetch=0,
            grid=(M // tm, N // tn),
            in_specs=[
                pl.BlockSpec((tm, K), lambda i, j: (i, 0)),
                pl.BlockSpec((K, tn), lambda i, j: (0, j)),
                pl.BlockSpec((1, tn), lambda i, j: (0, j)),
            ],
            out_specs=pl.BlockSpec((tm, tn), lambda i, j: (i, j)),
        ),
        compiler_params=pltpu.CompilerParams(
            dimension_semantics=("parallel", "parallel")
        ),
    )(x, w, b)


def lstm_recurrence(gx, w_hh_t):
    """gx: (T, Bp, 4Hp) precomputed input projections (+bias). Returns (T, Bp, Hp)."""
    T, Bp, G = gx.shape
    Hp = G // 4
    TT = _pick_time_block(T, Bp, Hp)
    return pl.pallas_call(
        _lstm_seq_kernel,
        out_shape=jax.ShapeDtypeStruct((T, Bp, Hp), jnp.float32),
        grid_spec=pltpu.PrefetchScalarGridSpec(
            num_scalar_prefetch=0,
            grid=(T // TT,),
            in_specs=[
                pl.BlockSpec((TT, Bp, G), lambda c: (c, 0, 0)),
                pl.BlockSpec(memory_space=pl.ANY),  # W_hh stays in HBM; copied once
            ],
            out_specs=pl.BlockSpec((TT, Bp, Hp), lambda c: (c, 0, 0)),
            scratch_shapes=[
                pltpu.VMEM((Bp, Hp), jnp.float32),  # h_{t-1}
                pltpu.VMEM((Bp, Hp), jnp.float32),  # c_{t-1}
                pltpu.VMEM((Hp, G), jnp.float32),   # resident W_hh^T (single copy)
                pltpu.SemaphoreType.DMA(()),
            ],
        ),
        # Must stay "arbitrary": h/c scratch is carried across grid steps.
        compiler_params=pltpu.CompilerParams(dimension_semantics=("arbitrary",)),
    )(gx, w_hh_t)


def lstm_recurrence_with_head(gx, w_hh_t, w_label_t, b_label):
    """Last layer: returns only the fused head output (Bp, Cp); no (T,B,H) HBM writeback."""
    T, Bp, G = gx.shape
    Hp = G // 4
    Cp = w_label_t.shape[1]
    TT = _pick_time_block(T, Bp, Hp)
    return pl.pallas_call(
        _lstm_last_kernel,
        out_shape=jax.ShapeDtypeStruct((Bp, Cp), jnp.float32),
        grid_spec=pltpu.PrefetchScalarGridSpec(
            num_scalar_prefetch=0,
            grid=(T // TT,),
            in_specs=[
                pl.BlockSpec((TT, Bp, G), lambda c: (c, 0, 0)),
                pl.BlockSpec(memory_space=pl.ANY),        # W_hh in HBM; copied once
                pl.BlockSpec((Hp, Cp), lambda c: (0, 0)),  # label weight (small)
                pl.BlockSpec((1, Cp), lambda c: (0, 0)),   # label bias
            ],
            out_specs=pl.BlockSpec((Bp, Cp), lambda c: (0, 0)),
            scratch_shapes=[
                pltpu.VMEM((Bp, Hp), jnp.float32),
                pltpu.VMEM((Bp, Hp), jnp.float32),
                pltpu.VMEM((Hp, G), jnp.float32),
                pltpu.SemaphoreType.DMA(()),
            ],
        ),
        compiler_params=pltpu.CompilerParams(dimension_semantics=("arbitrary",)),
    )(gx, w_hh_t, w_label_t, b_label)


@functools.partial(jax.jit, static_argnames=("num_classes",))
def lstm_model_forward(x_btd, kparams, *, num_classes):
    """Matches the PyTorch module: x (B, T, D) -> logits (B, num_classes)."""
    B, T, D = x_btd.shape
    Bp = _round_up(B, _SUBLANE)
    layers = kparams["lstm"]
    Dp0 = layers[0]["w_ih_t"].shape[0]

    x = jnp.transpose(x_btd, (1, 0, 2))                      # time-major (T, B, D)
    x = jnp.pad(x, ((0, 0), (0, Bp - B), (0, Dp0 - D)))      # (T, Bp, Dp0)

    h_all = x
    logits_p = None
    for li, layer in enumerate(layers):
        T_, Bp_, Din = h_all.shape
        G = layer["w_ih_t"].shape[1]
        # Hoisted input projection for all timesteps: one big GEMM.
        gx = matmul_bias(h_all.reshape(T_ * Bp_, Din), layer["w_ih_t"], layer["bias"])
        gx = gx.reshape(T_, Bp_, G)
        if li + 1 < len(layers):
            h_all = lstm_recurrence(gx, layer["w_hh_t"])
        else:
            logits_p = lstm_recurrence_with_head(
                gx, layer["w_hh_t"], kparams["label"]["w_t"], kparams["label"]["b"]
            )
    return logits_p[:B, :num_classes]


# ----------------------------------------------------------------------------
# Parameter init (PyTorch layout) + one-time kernel-side preprocessing
# ----------------------------------------------------------------------------
def init_params(key, input_size, hidden_size, num_layers, num_classes):
    k = 1.0 / jnp.sqrt(hidden_size)
    params = {"lstm": [], "label": {}}
    for layer in range(num_layers):
        d_in = input_size if layer == 0 else hidden_size
        key, k1, k2, k3, k4 = jax.random.split(key, 5)
        params["lstm"].append({
            "w_ih": jax.random.uniform(k1, (4 * hidden_size, d_in), jnp.float32, -k, k),
            "w_hh": jax.random.uniform(k2, (4 * hidden_size, hidden_size), jnp.float32, -k, k),
            "b_ih": jax.random.uniform(k3, (4 * hidden_size,), jnp.float32, -k, k),
            "b_hh": jax.random.uniform(k4, (4 * hidden_size,), jnp.float32, -k, k),
        })
    key, k1, k2 = jax.random.split(key, 3)
    params["label"]["w"] = jax.random.uniform(k1, (num_classes, hidden_size), jnp.float32, -k, k)
    params["label"]["b"] = jax.random.uniform(k2, (num_classes,), jnp.float32, -k, k)
    return params


def prepare_params(params):
    """One-time: transpose weights, fold biases, re-pack gates, pad to (8, 128) alignment."""
    prepared = {"lstm": [], "label": {}}
    for layer in params["lstm"]:
        w_ih, w_hh = layer["w_ih"], layer["w_hh"]
        H = w_hh.shape[1]
        d_in = w_ih.shape[1]
        Hp = _round_up(H, _LANE)
        Dp = _round_up(d_in, _LANE)
        b = layer["b_ih"] + layer["b_hh"]
        # Re-pack per gate so each gate occupies a contiguous, lane-aligned Hp slot.
        w_ih_p = jnp.zeros((4, Hp, Dp), jnp.float32).at[:, :H, :d_in].set(
            w_ih.reshape(4, H, d_in))
        w_hh_p = jnp.zeros((4, Hp, Hp), jnp.float32).at[:, :H, :H].set(
            w_hh.reshape(4, H, H))
        b_p = jnp.zeros((4, Hp), jnp.float32).at[:, :H].set(b.reshape(4, H))
        prepared["lstm"].append({
            "w_ih_t": w_ih_p.reshape(4 * Hp, Dp).T,   # (Dp, 4Hp)
            "w_hh_t": w_hh_p.reshape(4 * Hp, Hp).T,   # (Hp, 4Hp)
            "bias": b_p.reshape(1, 4 * Hp),           # (1, 4Hp)
        })
    w_l, b_l = params["label"]["w"], params["label"]["b"]
    C, H = w_l.shape
    Hp = _round_up(H, _LANE)
    Cp = _round_up(C, _LANE)
    prepared["label"] = {
        "w_t": jnp.zeros((Hp, Cp), jnp.float32).at[:H, :C].set(w_l.T),  # (Hp, Cp)
        "b": jnp.zeros((1, Cp), jnp.float32).at[:, :C].set(b_l),        # (1, Cp)
    }
    return prepared


# ----------------------------------------------------------------------------
# Pure-JAX reference (uses the raw PyTorch-layout parameters)
# ----------------------------------------------------------------------------
def reference_forward(x_btd, params):
    B = x_btd.shape[0]
    h_seq = x_btd
    for layer in params["lstm"]:
        H = layer["w_hh"].shape[1]
        w_ih, w_hh = layer["w_ih"], layer["w_hh"]
        b = layer["b_ih"] + layer["b_hh"]

        def step(carry, x_t):
            h, c = carry
            gates = x_t @ w_ih.T + h @ w_hh.T + b
            i = jax.nn.sigmoid(gates[:, 0 * H:1 * H])
            f = jax.nn.sigmoid(gates[:, 1 * H:2 * H])
            g = jnp.tanh(gates[:, 2 * H:3 * H])
            o = jax.nn.sigmoid(gates[:, 3 * H:4 * H])
            c = f * c + i * g
            h = o * jnp.tanh(c)
            return (h, c), h

        h0 = jnp.zeros((B, H), jnp.float32)
        c0 = jnp.zeros((B, H), jnp.float32)
        _, hs = jax.lax.scan(step, (h0, c0), jnp.transpose(h_seq, (1, 0, 2)))
        h_seq = jnp.transpose(hs, (1, 0, 2))
    last = h_seq[:, -1, :]
    return last @ params["label"]["w"].T + params["label"]["b"]


# ----------------------------------------------------------------------------
if __name__ == "__main__":
    B, T = 2, 8
    input_size, hidden_size, num_layers, num_classes = 16, 32, 2, 4
    dropout = 0.0  # eval semantics -> unused

    key = jax.random.PRNGKey(0)
    key, xk = jax.random.split(key)
    x = jax.random.normal(xk, (B, T, input_size), jnp.float32)

    params = init_params(key, input_size, hidden_size, num_layers, num_classes)
    kparams = prepare_params(params)

    out = lstm_model_forward(x, kparams, num_classes=num_classes)
    out = jax.block_until_ready(out)

    ref = reference_forward(x, params)
    assert out.shape == (B, num_classes), out.shape
    assert jnp.allclose(out, ref, atol=1e-4, rtol=1e-4), (out, ref)

    print("KERNEL_OK")
</pallas_src>

<mosaic_0001>
module attributes {stable_mosaic.version = 11 : i64} {
  func.func @_proj_kernel(%arg0: i32, %arg1: i32, %arg2: memref<64x128xf32, #tpu.memory_space<vmem>>, %arg3: memref<128x512xf32, #tpu.memory_space<vmem>>, %arg4: memref<1x512xf32, #tpu.memory_space<vmem>>, %arg5: memref<64x512xf32, #tpu.memory_space<vmem>>) attributes {dimension_semantics = [#tpu.dimension_semantics<parallel>, #tpu.dimension_semantics<parallel>], iteration_bounds = array<i64: 1, 1>, scalar_prefetch = 0 : i64, scratch_operands = 0 : i64, tpu.core_type = #tpu.core_type<tc>, window_params = [{transform_indices = @transform_0, window_bounds = array<i64: 64, 128>}, {transform_indices = @transform_1, window_bounds = array<i64: 128, 512>}, {transform_indices = @transform_2, window_bounds = array<i64: 1, 512>}, {transform_indices = @transform_3, window_bounds = array<i64: 64, 512>}]} {
    %c0 = arith.constant 0 : index
    %c0_0 = arith.constant 0 : index
    %0 = vector.load %arg2[%c0, %c0_0] : memref<64x128xf32, #tpu.memory_space<vmem>>, vector<64x128xf32>
    %c0_1 = arith.constant 0 : index
    %c0_2 = arith.constant 0 : index
    %1 = vector.load %arg3[%c0_1, %c0_2] : memref<128x512xf32, #tpu.memory_space<vmem>>, vector<128x512xf32>
    %cst = arith.constant dense<0.000000e+00> : vector<64x512xf32>
    %2 = tpu.matmul %0, %1, %cst {dimension_numbers = #tpu.dot_dimension_numbers<[1], [0], [0], [1], [0, 0, 1, 1], [], []>} : vector<64x128xf32>, vector<128x512xf32>, vector<64x512xf32> -> vector<64x512xf32>
    %c0_3 = arith.constant 0 : index
    %c0_4 = arith.constant 0 : index
    %3 = vector.load %arg4[%c0_3, %c0_4] : memref<1x512xf32, #tpu.memory_space<vmem>>, vector<1x512xf32>
    %4 = vector.broadcast %3 : vector<1x512xf32> to vector<64x512xf32>
    %5 = arith.addf %2, %4 : vector<64x512xf32>
    %c0_5 = arith.constant 0 : index
    %c0_6 = arith.constant 0 : index
    %6 = vector.load %arg5[%c0_5, %c0_6] : memref<64x512xf32, #tpu.memory_space<vmem>>, vector<64x512xf32>
    tpu.vector_store %arg5[%c0_5, %c0_6], %5 {strides = array<i32>} : memref<64x512xf32, #tpu.memory_space<vmem>>, vector<64x512xf32>,
    return
  }
  func.func @transform_0(%arg0: i32, %arg1: i32) -> (i32, i32) {
    %c0_i32 = arith.constant 0 : i32
    %c0_i32_0 = arith.constant 0 : i32
    return %arg0, %c0_i32 : i32, i32
  }
  func.func @transform_1(%arg0: i32, %arg1: i32) -> (i32, i32) {
    %c0_i32 = arith.constant 0 : i32
    %c0_i32_0 = arith.constant 0 : i32
    return %c0_i32, %arg1 : i32, i32
  }
  func.func @transform_2(%arg0: i32, %arg1: i32) -> (i32, i32) {
    %c0_i32 = arith.constant 0 : i32
    %c0_i32_0 = arith.constant 0 : i32
    return %c0_i32, %arg1 : i32, i32
  }
  func.func @transform_3(%arg0: i32, %arg1: i32) -> (i32, i32) {
    %c0_i32 = arith.constant 0 : i32
    return %arg0, %arg1 : i32, i32
  }
}

module attributes {stable_mosaic.version = 11 : i64} {
  func.func @_lstm_seq_kernel(%arg0: i32, %arg1: memref<8x8x512xf32, #tpu.memory_space<vmem>>, %arg2: memref<128x512xf32, #tpu.memory_space<any>>, %arg3: memref<8x8x128xf32, #tpu.memory_space<vmem>>, %arg4: memref<8x128xf32, #tpu.memory_space<vmem>>, %arg5: memref<8x128xf32, #tpu.memory_space<vmem>>, %arg6: memref<128x512xf32, #tpu.memory_space<vmem>>, %arg7: memref<!tpu.dma_semaphore, #tpu.memory_space<semaphore_mem>>) attributes {dimension_semantics = [#tpu.dimension_semantics<arbitrary>], iteration_bounds = array<i64: 1>, scalar_prefetch = 0 : i64, scratch_operands = 4 : i64, tpu.core_type = #tpu.core_type<tc>, window_params = [{transform_indices = @transform_0, window_bounds = array<i64: 8, 8, 512>}, {}, {transform_indices = @transform_2, window_bounds = array<i64: 8, 8, 128>}]} {
    %c0_i32 = arith.constant 0 : i32
    %0 = arith.cmpi eq, %arg0, %c0_i32 : i32
    %1 = arith.extui %0 : i1 to i32
    %c0_i32_0 = arith.constant 0 : i32
    %2 = arith.cmpi ne, %1, %c0_i32_0 : i32
    scf.if %2 {
      tpu.enqueue_dma source(%arg2 : memref<128x512xf32, #tpu.memory_space<any>>) target(%arg6 : memref<128x512xf32, #tpu.memory_space<vmem>>) target_semaphore(%arg7 : memref<!tpu.dma_semaphore, #tpu.memory_space<semaphore_mem>>)
      %cst_144 = arith.constant 0.000000e+00 : f32
      %315 = vector.broadcast %cst_144 : f32 to vector<8x128xf32>
      %c0_145 = arith.constant 0 : index
      %c0_146 = arith.constant 0 : index
      %316 = vector.load %arg4[%c0_145, %c0_146] : memref<8x128xf32, #tpu.memory_space<vmem>>, vector<8x128xf32>
      tpu.vector_store %arg4[%c0_145, %c0_146], %315 {strides = array<i32>} : memref<8x128xf32, #tpu.memory_space<vmem>>, vector<8x128xf32>,
      %cst_147 = arith.constant 0.000000e+00 : f32
      %317 = vector.broadcast %cst_147 : f32 to vector<8x128xf32>
      %c0_148 = arith.constant 0 : index
      %c0_149 = arith.constant 0 : index
      %318 = vector.load %arg5[%c0_148, %c0_149] : memref<8x128xf32, #tpu.memory_space<vmem>>, vector<8x128xf32>
      tpu.vector_store %arg5[%c0_148, %c0_149], %317 {strides = array<i32>} : memref<8x128xf32, #tpu.memory_space<vmem>>, vector<8x128xf32>,
      tpu.wait_dma2 semaphore(%arg7 : memref<!tpu.dma_semaphore, #tpu.memory_space<semaphore_mem>>) src(%arg2 : memref<128x512xf32, #tpu.memory_space<any>>) dst(%arg6 : memref<128x512xf32, #tpu.memory_space<vmem>>)
    } else {
    }
    %c0_i32_1 = arith.constant 0 : i32
    %3 = arith.index_cast %c0_i32_1 : i32 to index
    %c0 = arith.constant 0 : index
    %c0_2 = arith.constant 0 : index
    %4 = vector.load %arg1[%3, %c0, %c0_2] : memref<8x8x512xf32, #tpu.memory_space<vmem>>, vector<1x8x512xf32>
    %5 = vector.shape_cast %4 : vector<1x8x512xf32> to vector<8x512xf32>
    %c0_3 = arith.constant 0 : index
    %c0_4 = arith.constant 0 : index
    %6 = vector.load %arg4[%c0_3, %c0_4] : memref<8x128xf32, #tpu.memory_space<vmem>>, vector<8x128xf32>
    %c0_5 = arith.constant 0 : index
    %c0_6 = arith.constant 0 : index
    %7 = vector.load %arg6[%c0_5, %c0_6] : memref<128x512xf32, #tpu.memory_space<vmem>>, vector<128x512xf32>
    %cst = arith.constant dense<0.000000e+00> : vector<8x512xf32>
    %8 = tpu.matmul %6, %7, %cst {dimension_numbers = #tpu.dot_dimension_numbers<[1], [0], [0], [1], [0, 0, 1, 1], [], []>} : vector<8x128xf32>, vector<128x512xf32>, vector<8x512xf32> -> vector<8x512xf32>
    %9 = arith.addf %5, %8 : vector<8x512xf32>
    %10 = vector.extract_strided_slice %9 {offsets = [0, 0], sizes = [8, 128], strides = [1, 1]} : vector<8x512xf32> to vector<8x128xf32>
    %11 = arith.negf %10 : vector<8x128xf32>
    %12 = math.exp %11 : vector<8x128xf32>
    %cst_7 = arith.constant 1.000000e+00 : f32
    %13 = vector.broadcast %cst_7 : f32 to vector<8x128xf32>
    %14 = arith.addf %13, %12 : vector<8x128xf32>
    %15 = arith.divf %13, %14 : vector<8x128xf32>
    %16 = vector.extract_strided_slice %9 {offsets = [0, 128], sizes = [8, 128], strides = [1, 1]} : vector<8x512xf32> to vector<8x128xf32>
    %17 = arith.negf %16 : vector<8x128xf32>
    %18 = math.exp %17 : vector<8x128xf32>
    %cst_8 = arith.constant 1.000000e+00 : f32
    %19 = vector.broadcast %cst_8 : f32 to vector<8x128xf32>
    %20 = arith.addf %19, %18 : vector<8x128xf32>
    %21 = arith.divf %19, %20 : vector<8x128xf32>
    %22 = vector.extract_strided_slice %9 {offsets = [0, 256], sizes = [8, 128], strides = [1, 1]} : vector<8x512xf32> to vector<8x128xf32>
    %23 = math.tanh %22 : vector<8x128xf32>
    %24 = vector.extract_strided_slice %9 {offsets = [0, 384], sizes = [8, 128], strides = [1, 1]} : vector<8x512xf32> to vector<8x128xf32>
    %25 = arith.negf %24 : vector<8x128xf32>
    %26 = math.exp %25 : vector<8x128xf32>
    %cst_9 = arith.constant 1.000000e+00 : f32
    %27 = vector.broadcast %cst_9 : f32 to vector<8x128xf32>
    %28 = arith.addf %27, %26 : vector<8x128xf32>
    %29 = arith.divf %27, %28 : vector<8x128xf32>
    %c0_10 = arith.constant 0 : index
    %c0_11 = arith.constant 0 : index
    %30 = vector.load %arg5[%c0_10, %c0_11] : memref<8x128xf32, #tpu.memory_space<vmem>>, vector<8x128xf32>
    %31 = arith.mulf %21, %30 : vector<8x128xf32>
    %32 = arith.mulf %15, %23 : vector<8x128xf32>
    %33 = arith.addf %31, %32 : vector<8x128xf32>
    %34 = math.tanh %33 : vector<8x128xf32>
    %35 = arith.mulf %29, %34 : vector<8x128xf32>
    %c0_12 = arith.constant 0 : index
    %c0_13 = arith.constant 0 : index
    %36 = vector.load %arg5[%c0_12, %c0_13] : memref<8x128xf32, #tpu.memory_space<vmem>>, vector<8x128xf32>
    tpu.vector_store %arg5[%c0_12, %c0_13], %33 {strides = array<i32>} : memref<8x128xf32, #tpu.memory_space<vmem>>, vector<8x128xf32>,
    %c0_14 = arith.constant 0 : index
    %c0_15 = arith.constant 0 : index
    %37 = vector.load %arg4[%c0_14, %c0_15] : memref<8x128xf32, #tpu.memory_space<vmem>>, vector<8x128xf32>
    tpu.vector_store %arg4[%c0_14, %c0_15], %35 {strides = array<i32>} : memref<8x128xf32, #tpu.memory_space<vmem>>, vector<8x128xf32>,
    %38 = arith.index_cast %c0_i32_1 : i32 to index
    %c0_16 = arith.constant 0 : index
    %c0_17 = arith.constant 0 : index
    %39 = vector.load %arg3[%38, %c0_16, %c0_17] : memref<8x8x128xf32, #tpu.memory_space<vmem>>, vector<1x8x128xf32>
    %40 = vector.shape_cast %39 : vector<1x8x128xf32> to vector<8x128xf32>
    %41 = vector.shape_cast %35 : vector<8x128xf32> to vector<1x8x128xf32>
    tpu.vector_store %arg3[%38, %c0_16, %c0_17], %41 {strides = array<i32>} : memref<8x8x128xf32, #tpu.memory_space<vmem>>, vector<1x8x128xf32>,
    %c1_i32 = arith.constant 1 : i32
    %42 = arith.index_cast %c1_i32 : i32 to index
    %c0_18 = arith.constant 0 : index
    %c0_19 = arith.constant 0 : index
    %43 = vector.load %arg1[%42, %c0_18, %c0_19] : memref<8x8x512xf32, #tpu.memory_space<vmem>>, vector<1x8x512xf32>
    %44 = vector.shape_cast %43 : vector<1x8x512xf32> to vector<8x512xf32>
    %c0_20 = arith.constant 0 : index
    %c0_21 = arith.constant 0 : index
    %45 = vector.load %arg4[%c0_20, %c0_21] : memref<8x128xf32, #tpu.memory_space<vmem>>, vector<8x128xf32>
    %c0_22 = arith.constant 0 : index
    %c0_23 = arith.constant 0 : index
    %46 = vector.load %arg6[%c0_22, %c0_23] : memref<128x512xf32, #tpu.memory_space<vmem>>, vector<128x512xf32>
    %cst_24 = arith.constant dense<0.000000e+00> : vector<8x512xf32>
    %47 = tpu.matmul %45, %46, %cst_24 {dimension_numbers = #tpu.dot_dimension_numbers<[1], [0], [0], [1], [0, 0, 1, 1], [], []>} : vector<8x128xf32>, vector<128x512xf32>, vector<8x512xf32> -> vector<8x512xf32>
    %48 = arith.addf %44, %47 : vector<8x512xf32>
    %49 = vector.extract_strided_slice %48 {offsets = [0, 0], sizes = [8, 128], strides = [1, 1]} : vector<8x512xf32> to vector<8x128xf32>
    %50 = arith.negf %49 : vector<8x128xf32>
    %51 = math.exp %50 : vector<8x128xf32>
    %cst_25 = arith.constant 1.000000e+00 : f32
    %52 = vector.broadcast %cst_25 : f32 to vector<8x128xf32>
    %53 = arith.addf %52, %51 : vector<8x128xf32>
    %54 = arith.divf %52, %53 : vector<8x128xf32>
    %55 = vector.extract_strided_slice %48 {offsets = [0, 128], sizes = [8, 128], strides = [1, 1]} : vector<8x512xf32> to vector<8x128xf32>
    %56 = arith.negf %55 : vector<8x128xf32>
    %57 = math.exp %56 : vector<8x128xf32>
    %cst_26 = arith.constant 1.000000e+00 : f32
    %58 = vector.broadcast %cst_26 : f32 to vector<8x128xf32>
    %59 = arith.addf %58, %57 : vector<8x128xf32>
    %60 = arith.divf %58, %59 : vector<8x128xf32>
    %61 = vector.extract_strided_slice %48 {offsets = [0, 256], sizes = [8, 128], strides = [1, 1]} : vector<8x512xf32> to vector<8x128xf32>
    %62 = math.tanh %61 : vector<8x128xf32>
    %63 = vector.extract_strided_slice %48 {offsets = [0, 384], sizes = [8, 128], strides = [1, 1]} : vector<8x512xf32> to vector<8x128xf32>
    %64 = arith.negf %63 : vector<8x128xf32>
    %65 = math.exp %64 : vector<8x128xf32>
    %cst_27 = arith.constant 1.000000e+00 : f32
    %66 = vector.broadcast %cst_27 : f32 to vector<8x128xf32>
    %67 = arith.addf %66, %65 : vector<8x128xf32>
    %68 = arith.divf %66, %67 : vector<8x128xf32>
    %c0_28 = arith.constant 0 : index
    %c0_29 = arith.constant 0 : index
    %69 = vector.load %arg5[%c0_28, %c0_29] : memref<8x128xf32, #tpu.memory_space<vmem>>, vector<8x128xf32>
    %70 = arith.mulf %60, %69 : vector<8x128xf32>
    %71 = arith.mulf %54, %62 : vector<8x128xf32>
    %72 = arith.addf %70, %71 : vector<8x128xf32>
    %73 = math.tanh %72 : vector<8x128xf32>
    %74 = arith.mulf %68, %73 : vector<8x128xf32>
    %c0_30 = arith.constant 0 : index
    %c0_31 = arith.constant 0 : index
    %75 = vector.load %arg5[%c0_30, %c0_31] : memref<8x128xf32, #tpu.memory_space<vmem>>, vector<8x128xf32>
    tpu.vector_store %arg5[%c0_30, %c0_31], %72 {strides = array<i32>} : memref<8x128xf32, #tpu.memory_space<vmem>>, vector<8x128xf32>,
    %c0_32 = arith.constant 0 : index
    %c0_33 = arith.constant 0 : index
    %76 = vector.load %arg4[%c0_32, %c0_33] : memref<8x128xf32, #tpu.memory_space<vmem>>, vector<8x128xf32>
    tpu.vector_store %arg4[%c0_32, %c0_33], %74 {strides = array<i32>} : memref<8x128xf32, #tpu.memory_space<vmem>>, vector<8x128xf32>,
    %77 = arith.index_cast %c1_i32 : i32 to index
    %c0_34 = arith.constant 0 : index
    %c0_35 = arith.constant 0 : index
    %78 = vector.load %arg3[%77, %c0_34, %c0_35] : memref<8x8x128xf32, #tpu.memory_space<vmem>>, vector<1x8x128xf32>
    %79 = vector.shape_cast %78 : vector<1x8x128xf32> to vector<8x128xf32>
    %80 = vector.shape_cast %74 : vector<8x128xf32> to vector<1x8x128xf32>
    tpu.vector_store %arg3[%77, %c0_34, %c0_35], %80 {strides = array<i32>} : memref<8x8x128xf32, #tpu.memory_space<vmem>>, vector<1x8x128xf32>,
    %c2_i32 = arith.constant 2 : i32
    %81 = arith.index_cast %c2_i32 : i32 to index
    %c0_36 = arith.constant 0 : index
    %c0_37 = arith.constant 0 : index
    %82 = vector.load %arg1[%81, %c0_36, %c0_37] : memref<8x8x512xf32, #tpu.memory_space<vmem>>, vector<1x8x512xf32>
    %83 = vector.shape_cast %82 : vector<1x8x512xf32> to vector<8x512xf32>
    %c0_38 = arith.constant 0 : index
    %c0_39 = arith.constant 0 : index
    %84 = vector.load %arg4[%c0_38, %c0_39] : memref<8x128xf32, #tpu.memory_space<vmem>>, vector<8x128xf32>
    %c0_40 = arith.constant 0 : index
    %c0_41 = arith.constant 0 : index
    %85 = vector.load %arg6[%c0_40, %c0_41] : memref<128x512xf32, #tpu.memory_space<vmem>>, vector<128x512xf32>
    %cst_42 = arith.constant dense<0.000000e+00> : vector<8x512xf32>
    %86 = tpu.matmul %84, %85, %cst_42 {dimension_numbers = #tpu.dot_dimension_numbers<[1], [0], [0], [1], [0, 0, 1, 1], [], []>} : vector<8x128xf32>, vector<128x512xf32>, vector<8x512xf32> -> vector<8x512xf32>
    %87 = arith.addf %83, %86 : vector<8x512xf32>
    %88 = vector.extract_strided_slice %87 {offsets = [0, 0], sizes = [8, 128], strides = [1, 1]} : vector<8x512xf32> to vector<8x128xf32>
    %89 = arith.negf %88 : vector<8x128xf32>
    %90 = math.exp %89 : vector<8x128xf32>
    %cst_43 = arith.constant 1.000000e+00 : f32
    %91 = vector.broadcast %cst_43 : f32 to vector<8x128xf32>
    %92 = arith.addf %91, %90 : vector<8x128xf32>
    %93 = arith.divf %91, %92 : vector<8x128xf32>
    %94 = vector.extract_strided_slice %87 {offsets = [0, 128], sizes = [8, 128], strides = [1, 1]} : vector<8x512xf32> to vector<8x128xf32>
    %95 = arith.negf %94 : vector<8x128xf32>
    %96 = math.exp %95 : vector<8x128xf32>
    %cst_44 = arith.constant 1.000000e+00 : f32
    %97 = vector.broadcast %cst_44 : f32 to vector<8x128xf32>
    %98 = arith.addf %97, %96 : vector<8x128xf32>
    %99 = arith.divf %97, %98 : vector<8x128xf32>
    %100 = vector.extract_strided_slice %87 {offsets = [0, 256], sizes = [8, 128], strides = [1, 1]} : vector<8x512xf32> to vector<8x128xf32>
    %101 = math.tanh %100 : vector<8x128xf32>
    %102 = vector.extract_strided_slice %87 {offsets = [0, 384], sizes = [8, 128], strides = [1, 1]} : vector<8x512xf32> to vector<8x128xf32>
    %103 = arith.negf %102 : vector<8x128xf32>
    %104 = math.exp %103 : vector<8x128xf32>
    %cst_45 = arith.constant 1.000000e+00 : f32
    %105 = vector.broadcast %cst_45 : f32 to vector<8x128xf32>
    %106 = arith.addf %105, %104 : vector<8x128xf32>
    %107 = arith.divf %105, %106 : vector<8x128xf32>
    %c0_46 = arith.constant 0 : index
    %c0_47 = arith.constant 0 : index
    %108 = vector.load %arg5[%c0_46, %c0_47] : memref<8x128xf32, #tpu.memory_space<vmem>>, vector<8x128xf32>
    %109 = arith.mulf %99, %108 : vector<8x128xf32>
    %110 = arith.mulf %93, %101 : vector<8x128xf32>
    %111 = arith.addf %109, %110 : vector<8x128xf32>
    %112 = math.tanh %111 : vector<8x128xf32>
    %113 = arith.mulf %107, %112 : vector<8x128xf32>
    %c0_48 = arith.constant 0 : index
    %c0_49 = arith.constant 0 : index
    %114 = vector.load %arg5[%c0_48, %c0_49] : memref<8x128xf32, #tpu.memory_space<vmem>>, vector<8x128xf32>
    tpu.vector_store %arg5[%c0_48, %c0_49], %111 {strides = array<i32>} : memref<8x128xf32, #tpu.memory_space<vmem>>, vector<8x128xf32>,
    %c0_50 = arith.constant 0 : index
    %c0_51 = arith.constant 0 : index
    %115 = vector.load %arg4[%c0_50, %c0_51] : memref<8x128xf32, #tpu.memory_space<vmem>>, vector<8x128xf32>
    tpu.vector_store %arg4[%c0_50, %c0_51], %113 {strides = array<i32>} : memref<8x128xf32, #tpu.memory_space<vmem>>, vector<8x128xf32>,
    %116 = arith.index_cast %c2_i32 : i32 to index
    %c0_52 = arith.constant 0 : index
    %c0_53 = arith.constant 0 : index
    %117 = vector.load %arg3[%116, %c0_52, %c0_53] : memref<8x8x128xf32, #tpu.memory_space<vmem>>, vector<1x8x128xf32>
    %118 = vector.shape_cast %117 : vector<1x8x128xf32> to vector<8x128xf32>
    %119 = vector.shape_cast %113 : vector<8x128xf32> to vector<1x8x128xf32>
    tpu.vector_store %arg3[%116, %c0_52, %c0_53], %119 {strides = array<i32>} : memref<8x8x128xf32, #tpu.memory_space<vmem>>, vector<1x8x128xf32>,
    %c3_i32 = arith.constant 3 : i32
    %120 = arith.index_cast %c3_i32 : i32 to index
    %c0_54 = arith.constant 0 : index
    %c0_55 = arith.constant 0 : index
    %121 = vector.load %arg1[%120, %c0_54, %c0_55] : memref<8x8x512xf32, #tpu.memory_space<vmem>>, vector<1x8x512xf32>
    %122 = vector.shape_cast %121 : vector<1x8x512xf32> to vector<8x512xf32>
    %c0_56 = arith.constant 0 : index
    %c0_57 = arith.constant 0 : index
    %123 = vector.load %arg4[%c0_56, %c0_57] : memref<8x128xf32, #tpu.memory_space<vmem>>, vector<8x128xf32>
    %c0_58 = arith.constant 0 : index
    %c0_59 = arith.constant 0 : index
    %124 = vector.load %arg6[%c0_58, %c0_59] : memref<128x512xf32, #tpu.memory_space<vmem>>, vector<128x512xf32>
    %cst_60 = arith.constant dense<0.000000e+00> : vector<8x512xf32>
    %125 = tpu.matmul %123, %124, %cst_60 {dimension_numbers = #tpu.dot_dimension_numbers<[1], [0], [0], [1], [0, 0, 1, 1], [], []>} : vector<8x128xf32>, vector<128x512xf32>, vector<8x512xf32> -> vector<8x512xf32>
    %126 = arith.addf %122, %125 : vector<8x512xf32>
    %127 = vector.extract_strided_slice %126 {offsets = [0, 0], sizes = [8, 128], strides = [1, 1]} : vector<8x512xf32> to vector<8x128xf32>
    %128 = arith.negf %127 : vector<8x128xf32>
    %129 = math.exp %128 : vector<8x128xf32>
    %cst_61 = arith.constant 1.000000e+00 : f32
    %130 = vector.broadcast %cst_61 : f32 to vector<8x128xf32>
    %131 = arith.addf %130, %129 : vector<8x128xf32>
    %132 = arith.divf %130, %131 : vector<8x128xf32>
    %133 = vector.extract_strided_slice %126 {offsets = [0, 128], sizes = [8, 128], strides = [1, 1]} : vector<8x512xf32> to vector<8x128xf32>
    %134 = arith.negf %133 : vector<8x128xf32>
    %135 = math.exp %134 : vector<8x128xf32>
    %cst_62 = arith.constant 1.000000e+00 : f32
    %136 = vector.broadcast %cst_62 : f32 to vector<8x128xf32>
    %137 = arith.addf %136, %135 : vector<8x128xf32>
    %138 = arith.divf %136, %137 : vector<8x128xf32>
    %139 = vector.extract_strided_slice %126 {offsets = [0, 256], sizes = [8, 128], strides = [1, 1]} : vector<8x512xf32> to vector<8x128xf32>
    %140 = math.tanh %139 : vector<8x128xf32>
    %141 = vector.extract_strided_slice %126 {offsets = [0, 384], sizes = [8, 128], strides = [1, 1]} : vector<8x512xf32> to vector<8x128xf32>
    %142 = arith.negf %141 : vector<8x128xf32>
    %143 = math.exp %142 : vector<8x128xf32>
    %cst_63 = arith.constant 1.000000e+00 : f32
    %144 = vector.broadcast %cst_63 : f32 to vector<8x128xf32>
    %145 = arith.addf %144, %143 : vector<8x128xf32>
    %146 = arith.divf %144, %145 : vector<8x128xf32>
    %c0_64 = arith.constant 0 : index
    %c0_65 = arith.constant 0 : index
    %147 = vector.load %arg5[%c0_64, %c0_65] : memref<8x128xf32, #tpu.memory_space<vmem>>, vector<8x128xf32>
    %148 = arith.mulf %138, %147 : vector<8x128xf32>
    %149 = arith.mulf %132, %140 : vector<8x128xf32>
    %150 = arith.addf %148, %149 : vector<8x128xf32>
    %151 = math.tanh %150 : vector<8x128xf32>
    %152 = arith.mulf %146, %151 : vector<8x128xf32>
    %c0_66 = arith.constant 0 : index
    %c0_67 = arith.constant 0 : index
    %153 = vector.load %arg5[%c0_66, %c0_67] : memref<8x128xf32, #tpu.memory_space<vmem>>, vector<8x128xf32>
    tpu.vector_store %arg5[%c0_66, %c0_67], %150 {strides = array<i32>} : memref<8x128xf32, #tpu.memory_space<vmem>>, vector<8x128xf32>,
    %c0_68 = arith.constant 0 : index
    %c0_69 = arith.constant 0 : index
    %154 = vector.load %arg4[%c0_68, %c0_69] : memref<8x128xf32, #tpu.memory_space<vmem>>, vector<8x128xf32>
    tpu.vector_store %arg4[%c0_68, %c0_69], %152 {strides = array<i32>} : memref<8x128xf32, #tpu.memory_space<vmem>>, vector<8x128xf32>,
    %155 = arith.index_cast %c3_i32 : i32 to index
    %c0_70 = arith.constant 0 : index
    %c0_71 = arith.constant 0 : index
    %156 = vector.load %arg3[%155, %c0_70, %c0_71] : memref<8x8x128xf32, #tpu.memory_space<vmem>>, vector<1x8x128xf32>
    %157 = vector.shape_cast %156 : vector<1x8x128xf32> to vector<8x128xf32>
    %158 = vector.shape_cast %152 : vector<8x128xf32> to vector<1x8x128xf32>
    tpu.vector_store %arg3[%155, %c0_70, %c0_71], %158 {strides = array<i32>} : memref<8x8x128xf32, #tpu.memory_space<vmem>>, vector<1x8x128xf32>,
    %c4_i32 = arith.constant 4 : i32
    %159 = arith.index_cast %c4_i32 : i32 to index
    %c0_72 = arith.constant 0 : index
    %c0_73 = arith.constant 0 : index
    %160 = vector.load %arg1[%159, %c0_72, %c0_73] : memref<8x8x512xf32, #tpu.memory_space<vmem>>, vector<1x8x512xf32>
    %161 = vector.shape_cast %160 : vector<1x8x512xf32> to vector<8x512xf32>
    %c0_74 = arith.constant 0 : index
    %c0_75 = arith.constant 0 : index
    %162 = vector.load %arg4[%c0_74, %c0_75] : memref<8x128xf32, #tpu.memory_space<vmem>>, vector<8x128xf32>
    %c0_76 = arith.constant 0 : index
    %c0_77 = arith.constant 0 : index
    %163 = vector.load %arg6[%c0_76, %c0_77] : memref<128x512xf32, #tpu.memory_space<vmem>>, vector<128x512xf32>
    %cst_78 = arith.constant dense<0.000000e+00> : vector<8x512xf32>
    %164 = tpu.matmul %162, %163, %cst_78 {dimension_numbers = #tpu.dot_dimension_numbers<[1], [0], [0], [1], [0, 0, 1, 1], [], []>} : vector<8x128xf32>, vector<128x512xf32>, vector<8x512xf32> -> vector<8x512xf32>
    %165 = arith.addf %161, %164 : vector<8x512xf32>
    %166 = vector.extract_strided_slice %165 {offsets = [0, 0], sizes = [8, 128], strides = [1, 1]} : vector<8x512xf32> to vector<8x128xf32>
    %167 = arith.negf %166 : vector<8x128xf32>
    %168 = math.exp %167 : vector<8x128xf32>
    %cst_79 = arith.constant 1.000000e+00 : f32
    %169 = vector.broadcast %cst_79 : f32 to vector<8x128xf32>
    %170 = arith.addf %169, %168 : vector<8x128xf32>
    %171 = arith.divf %169, %170 : vector<8x128xf32>
    %172 = vector.extract_strided_slice %165 {offsets = [0, 128], sizes = [8, 128], strides = [1, 1]} : vector<8x512xf32> to vector<8x128xf32>
    %173 = arith.negf %172 : vector<8x128xf32>
    %174 = math.exp %173 : vector<8x128xf32>
    %cst_80 = arith.constant 1.000000e+00 : f32
    %175 = vector.broadcast %cst_80 : f32 to vector<8x128xf32>
    %176 = arith.addf %175, %174 : vector<8x128xf32>
    %177 = arith.divf %175, %176 : vector<8x128xf32>
    %178 = vector.extract_strided_slice %165 {offsets = [0, 256], sizes = [8, 128], strides = [1, 1]} : vector<8x512xf32> to vector<8x128xf32>
    %179 = math.tanh %178 : vector<8x128xf32>
    %180 = vector.extract_strided_slice %165 {offsets = [0, 384], sizes = [8, 128], strides = [1, 1]} : vector<8x512xf32> to vector<8x128xf32>
    %181 = arith.negf %180 : vector<8x128xf32>
    %182 = math.exp %181 : vector<8x128xf32>
    %cst_81 = arith.constant 1.000000e+00 : f32
    %183 = vector.broadcast %cst_81 : f32 to vector<8x128xf32>
    %184 = arith.addf %183, %182 : vector<8x128xf32>
    %185 = arith.divf %183, %184 : vector<8x128xf32>
    %c0_82 = arith.constant 0 : index
    %c0_83 = arith.constant 0 : index
    %186 = vector.load %arg5[%c0_82, %c0_83] : memref<8x128xf32, #tpu.memory_space<vmem>>, vector<8x128xf32>
    %187 = arith.mulf %177, %186 : vector<8x128xf32>
    %188 = arith.mulf %171, %179 : vector<8x128xf32>
    %189 = arith.addf %187, %188 : vector<8x128xf32>
    %190 = math.tanh %189 : vector<8x128xf32>
    %191 = arith.mulf %185, %190 : vector<8x128xf32>
    %c0_84 = arith.constant 0 : index
    %c0_85 = arith.constant 0 : index
    %192 = vector.load %arg5[%c0_84, %c0_85] : memref<8x128xf32, #tpu.memory_space<vmem>>, vector<8x128xf32>
    tpu.vector_store %arg5[%c0_84, %c0_85], %189 {strides = array<i32>} : memref<8x128xf32, #tpu.memory_space<vmem>>, vector<8x128xf32>,
    %c0_86 = arith.constant 0 : index
    %c0_87 = arith.constant 0 : index
    %193 = vector.load %arg4[%c0_86, %c0_87] : memref<8x128xf32, #tpu.memory_space<vmem>>, vector<8x128xf32>
    tpu.vector_store %arg4[%c0_86, %c0_87], %191 {strides = array<i32>} : memref<8x128xf32, #tpu.memory_space<vmem>>, vector<8x128xf32>,
    %194 = arith.index_cast %c4_i32 : i32 to index
    %c0_88 = arith.constant 0 : index
    %c0_89 = arith.constant 0 : index
    %195 = vector.load %arg3[%194, %c0_88, %c0_89] : memref<8x8x128xf32, #tpu.memory_space<vmem>>, vector<1x8x128xf32>
    %196 = vector.shape_cast %195 : vector<1x8x128xf32> to vector<8x128xf32>
    %197 = vector.shape_cast %191 : vector<8x128xf32> to vector<1x8x128xf32>
    tpu.vector_store %arg3[%194, %c0_88, %c0_89], %197 {strides = array<i32>} : memref<8x8x128xf32, #tpu.memory_space<vmem>>, vector<1x8x128xf32>,
    %c5_i32 = arith.constant 5 : i32
    %198 = arith.index_cast %c5_i32 : i32 to index
    %c0_90 = arith.constant 0 : index
    %c0_91 = arith.constant 0 : index
    %199 = vector.load %arg1[%198, %c0_90, %c0_91] : memref<8x8x512xf32, #tpu.memory_space<vmem>>, vector<1x8x512xf32>
    %200 = vector.shape_cast %199 : vector<1x8x512xf32> to vector<8x512xf32>
    %c0_92 = arith.constant 0 : index
    %c0_93 = arith.constant 0 : index
    %201 = vector.load %arg4[%c0_92, %c0_93] : memref<8x128xf32, #tpu.memory_space<vmem>>, vector<8x128xf32>
    %c0_94 = arith.constant 0 : index
    %c0_95 = arith.constant 0 : index
    %202 = vector.load %arg6[%c0_94, %c0_95] : memref<128x512xf32, #tpu.memory_space<vmem>>, vector<128x512xf32>
    %cst_96 = arith.constant dense<0.000000e+00> : vector<8x512xf32>
    %203 = tpu.matmul %201, %202, %cst_96 {dimension_numbers = #tpu.dot_dimension_numbers<[1], [0], [0], [1], [0, 0, 1, 1], [], []>} : vector<8x128xf32>, vector<128x512xf32>, vector<8x512xf32> -> vector<8x512xf32>
    %204 = arith.addf %200, %203 : vector<8x512xf32>
    %205 = vector.extract_strided_slice %204 {offsets = [0, 0], sizes = [8, 128], strides = [1, 1]} : vector<8x512xf32> to vector<8x128xf32>
    %206 = arith.negf %205 : vector<8x128xf32>
    %207 = math.exp %206 : vector<8x128xf32>
    %cst_97 = arith.constant 1.000000e+00 : f32
    %208 = vector.broadcast %cst_97 : f32 to vector<8x128xf32>
    %209 = arith.addf %208, %207 : vector<8x128xf32>
    %210 = arith.divf %208, %209 : vector<8x128xf32>
    %211 = vector.extract_strided_slice %204 {offsets = [0, 128], sizes = [8, 128], strides = [1, 1]} : vector<8x512xf32> to vector<8x128xf32>
    %212 = arith.negf %211 : vector<8x128xf32>
    %213 = math.exp %212 : vector<8x128xf32>
    %cst_98 = arith.constant 1.000000e+00 : f32
    %214 = vector.broadcast %cst_98 : f32 to vector<8x128xf32>
    %215 = arith.addf %214, %213 : vector<8x128xf32>
    %216 = arith.divf %214, %215 : vector<8x128xf32>
    %217 = vector.extract_strided_slice %204 {offsets = [0, 256], sizes = [8, 128], strides = [1, 1]} : vector<8x512xf32> to vector<8x128xf32>
    %218 = math.tanh %217 : vector<8x128xf32>
    %219 = vector.extract_strided_slice %204 {offsets = [0, 384], sizes = [8, 128], strides = [1, 1]} : vector<8x512xf32> to vector<8x128xf32>
    %220 = arith.negf %219 : vector<8x128xf32>
    %221 = math.exp %220 : vector<8x128xf32>
    %cst_99 = arith.constant 1.000000e+00 : f32
    %222 = vector.broadcast %cst_99 : f32 to vector<8x128xf32>
    %223 = arith.addf %222, %221 : vector<8x128xf32>
    %224 = arith.divf %222, %223 : vector<8x128xf32>
    %c0_100 = arith.constant 0 : index
    %c0_101 = arith.constant 0 : index
    %225 = vector.load %arg5[%c0_100, %c0_101] : memref<8x128xf32, #tpu.memory_space<vmem>>, vector<8x128xf32>
    %226 = arith.mulf %216, %225 : vector<8x128xf32>
    %227 = arith.mulf %210, %218 : vector<8x128xf32>
    %228 = arith.addf %226, %227 : vector<8x128xf32>
    %229 = math.tanh %228 : vector<8x128xf32>
    %230 = arith.mulf %224, %229 : vector<8x128xf32>
    %c0_102 = arith.constant 0 : index
    %c0_103 = arith.constant 0 : index
    %231 = vector.load %arg5[%c0_102, %c0_103] : memref<8x128xf32, #tpu.memory_space<vmem>>, vector<8x128xf32>
    tpu.vector_store %arg5[%c0_102, %c0_103], %228 {strides = array<i32>} : memref<8x128xf32, #tpu.memory_space<vmem>>, vector<8x128xf32>,
    %c0_104 = arith.constant 0 : index
    %c0_105 = arith.constant 0 : index
    %232 = vector.load %arg4[%c0_104, %c0_105] : memref<8x128xf32, #tpu.memory_space<vmem>>, vector<8x128xf32>
    tpu.vector_store %arg4[%c0_104, %c0_105], %230 {strides = array<i32>} : memref<8x128xf32, #tpu.memory_space<vmem>>, vector<8x128xf32>,
    %233 = arith.index_cast %c5_i32 : i32 to index
    %c0_106 = arith.constant 0 : index
    %c0_107 = arith.constant 0 : index
    %234 = vector.load %arg3[%233, %c0_106, %c0_107] : memref<8x8x128xf32, #tpu.memory_space<vmem>>, vector<1x8x128xf32>
    %235 = vector.shape_cast %234 : vector<1x8x128xf32> to vector<8x128xf32>
    %236 = vector.shape_cast %230 : vector<8x128xf32> to vector<1x8x128xf32>
    tpu.vector_store %arg3[%233, %c0_106, %c0_107], %236 {strides = array<i32>} : memref<8x8x128xf32, #tpu.memory_space<vmem>>, vector<1x8x128xf32>,
    %c6_i32 = arith.constant 6 : i32
    %237 = arith.index_cast %c6_i32 : i32 to index
    %c0_108 = arith.constant 0 : index
    %c0_109 = arith.constant 0 : index
    %238 = vector.load %arg1[%237, %c0_108, %c0_109] : memref<8x8x512xf32, #tpu.memory_space<vmem>>, vector<1x8x512xf32>
    %239 = vector.shape_cast %238 : vector<1x8x512xf32> to vector<8x512xf32>
    %c0_110 = arith.constant 0 : index
    %c0_111 = arith.constant 0 : index
    %240 = vector.load %arg4[%c0_110, %c0_111] : memref<8x128xf32, #tpu.memory_space<vmem>>, vector<8x128xf32>
    %c0_112 = arith.constant 0 : index
    %c0_113 = arith.constant 0 : index
    %241 = vector.load %arg6[%c0_112, %c0_113] : memref<128x512xf32, #tpu.memory_space<vmem>>, vector<128x512xf32>
    %cst_114 = arith.constant dense<0.000000e+00> : vector<8x512xf32>
    %242 = tpu.matmul %240, %241, %cst_114 {dimension_numbers = #tpu.dot_dimension_numbers<[1], [0], [0], [1], [0, 0, 1, 1], [], []>} : vector<8x128xf32>, vector<128x512xf32>, vector<8x512xf32> -> vector<8x512xf32>
    %243 = arith.addf %239, %242 : vector<8x512xf32>
    %244 = vector.extract_strided_slice %243 {offsets = [0, 0], sizes = [8, 128], strides = [1, 1]} : vector<8x512xf32> to vector<8x128xf32>
    %245 = arith.negf %244 : vector<8x128xf32>
    %246 = math.exp %245 : vector<8x128xf32>
    %cst_115 = arith.constant 1.000000e+00 : f32
    %247 = vector.broadcast %cst_115 : f32 to vector<8x128xf32>
    %248 = arith.addf %247, %246 : vector<8x128xf32>
    %249 = arith.divf %247, %248 : vector<8x128xf32>
    %250 = vector.extract_strided_slice %243 {offsets = [0, 128], sizes = [8, 128], strides = [1, 1]} : vector<8x512xf32> to vector<8x128xf32>
    %251 = arith.negf %250 : vector<8x128xf32>
    %252 = math.exp %251 : vector<8x128xf32>
    %cst_116 = arith.constant 1.000000e+00 : f32
    %253 = vector.broadcast %cst_116 : f32 to vector<8x128xf32>
    %254 = arith.addf %253, %252 : vector<8x128xf32>
    %255 = arith.divf %253, %254 : vector<8x128xf32>
    %256 = vector.extract_strided_slice %243 {offsets = [0, 256], sizes = [8, 128], strides = [1, 1]} : vector<8x512xf32> to vector<8x128xf32>
    %257 = math.tanh %256 : vector<8x128xf32>
    %258 = vector.extract_strided_slice %243 {offsets = [0, 384], sizes = [8, 128], strides = [1, 1]} : vector<8x512xf32> to vector<8x128xf32>
    %259 = arith.negf %258 : vector<8x128xf32>
    %260 = math.exp %259 : vector<8x128xf32>
    %cst_117 = arith.constant 1.000000e+00 : f32
    %261 = vector.broadcast %cst_117 : f32 to vector<8x128xf32>
    %262 = arith.addf %261, %260 : vector<8x128xf32>
    %263 = arith.divf %261, %262 : vector<8x128xf32>
    %c0_118 = arith.constant 0 : index
    %c0_119 = arith.constant 0 : index
    %264 = vector.load %arg5[%c0_118, %c0_119] : memref<8x128xf32, #tpu.memory_space<vmem>>, vector<8x128xf32>
    %265 = arith.mulf %255, %264 : vector<8x128xf32>
    %266 = arith.mulf %249, %257 : vector<8x128xf32>
    %267 = arith.addf %265, %266 : vector<8x128xf32>
    %268 = math.tanh %267 : vector<8x128xf32>
    %269 = arith.mulf %263, %268 : vector<8x128xf32>
    %c0_120 = arith.constant 0 : index
    %c0_121 = arith.constant 0 : index
    %270 = vector.load %arg5[%c0_120, %c0_121] : memref<8x128xf32, #tpu.memory_space<vmem>>, vector<8x128xf32>
    tpu.vector_store %arg5[%c0_120, %c0_121], %267 {strides = array<i32>} : memref<8x128xf32, #tpu.memory_space<vmem>>, vector<8x128xf32>,
    %c0_122 = arith.constant 0 : index
    %c0_123 = arith.constant 0 : index
    %271 = vector.load %arg4[%c0_122, %c0_123] : memref<8x128xf32, #tpu.memory_space<vmem>>, vector<8x128xf32>
    tpu.vector_store %arg4[%c0_122, %c0_123], %269 {strides = array<i32>} : memref<8x128xf32, #tpu.memory_space<vmem>>, vector<8x128xf32>,
    %272 = arith.index_cast %c6_i32 : i32 to index
    %c0_124 = arith.constant 0 : index
    %c0_125 = arith.constant 0 : index
    %273 = vector.load %arg3[%272, %c0_124, %c0_125] : memref<8x8x128xf32, #tpu.memory_space<vmem>>, vector<1x8x128xf32>
    %274 = vector.shape_cast %273 : vector<1x8x128xf32> to vector<8x128xf32>
    %275 = vector.shape_cast %269 : vector<8x128xf32> to vector<1x8x128xf32>
    tpu.vector_store %arg3[%272, %c0_124, %c0_125], %275 {strides = array<i32>} : memref<8x8x128xf32, #tpu.memory_space<vmem>>, vector<1x8x128xf32>,
    %c7_i32 = arith.constant 7 : i32
    %276 = arith.index_cast %c7_i32 : i32 to index
    %c0_126 = arith.constant 0 : index
    %c0_127 = arith.constant 0 : index
    %277 = vector.load %arg1[%276, %c0_126, %c0_127] : memref<8x8x512xf32, #tpu.memory_space<vmem>>, vector<1x8x512xf32>
    %278 = vector.shape_cast %277 : vector<1x8x512xf32> to vector<8x512xf32>
    %c0_128 = arith.constant 0 : index
    %c0_129 = arith.constant 0 : index
    %279 = vector.load %arg4[%c0_128, %c0_129] : memref<8x128xf32, #tpu.memory_space<vmem>>, vector<8x128xf32>
    %c0_130 = arith.constant 0 : index
    %c0_131 = arith.constant 0 : index
    %280 = vector.load %arg6[%c0_130, %c0_131] : memref<128x512xf32, #tpu.memory_space<vmem>>, vector<128x512xf32>
    %cst_132 = arith.constant dense<0.000000e+00> : vector<8x512xf32>
    %281 = tpu.matmul %279, %280, %cst_132 {dimension_numbers = #tpu.dot_dimension_numbers<[1], [0], [0], [1], [0, 0, 1, 1], [], []>} : vector<8x128xf32>, vector<128x512xf32>, vector<8x512xf32> -> vector<8x512xf32>
    %282 = arith.addf %278, %281 : vector<8x512xf32>
    %283 = vector.extract_strided_slice %282 {offsets = [0, 0], sizes = [8, 128], strides = [1, 1]} : vector<8x512xf32> to vector<8x128xf32>
    %284 = arith.negf %283 : vector<8x128xf32>
    %285 = math.exp %284 : vector<8x128xf32>
    %cst_133 = arith.constant 1.000000e+00 : f32
    %286 = vector.broadcast %cst_133 : f32 to vector<8x128xf32>
    %287 = arith.addf %286, %285 : vector<8x128xf32>
    %288 = arith.divf %286, %287 : vector<8x128xf32>
    %289 = vector.extract_strided_slice %282 {offsets = [0, 128], sizes = [8, 128], strides = [1, 1]} : vector<8x512xf32> to vector<8x128xf32>
    %290 = arith.negf %289 : vector<8x128xf32>
    %291 = math.exp %290 : vector<8x128xf32>
    %cst_134 = arith.constant 1.000000e+00 : f32
    %292 = vector.broadcast %cst_134 : f32 to vector<8x128xf32>
    %293 = arith.addf %292, %291 : vector<8x128xf32>
    %294 = arith.divf %292, %293 : vector<8x128xf32>
    %295 = vector.extract_strided_slice %282 {offsets = [0, 256], sizes = [8, 128], strides = [1, 1]} : vector<8x512xf32> to vector<8x128xf32>
    %296 = math.tanh %295 : vector<8x128xf32>
    %297 = vector.extract_strided_slice %282 {offsets = [0, 384], sizes = [8, 128], strides = [1, 1]} : vector<8x512xf32> to vector<8x128xf32>
    %298 = arith.negf %297 : vector<8x128xf32>
    %299 = math.exp %298 : vector<8x128xf32>
    %cst_135 = arith.constant 1.000000e+00 : f32
    %300 = vector.broadcast %cst_135 : f32 to vector<8x128xf32>
    %301 = arith.addf %300, %299 : vector<8x128xf32>
    %302 = arith.divf %300, %301 : vector<8x128xf32>
    %c0_136 = arith.constant 0 : index
    %c0_137 = arith.constant 0 : index
    %303 = vector.load %arg5[%c0_136, %c0_137] : memref<8x128xf32, #tpu.memory_space<vmem>>, vector<8x128xf32>
    %304 = arith.mulf %294, %303 : vector<8x128xf32>
    %305 = arith.mulf %288, %296 : vector<8x128xf32>
    %306 = arith.addf %304, %305 : vector<8x128xf32>
    %307 = math.tanh %306 : vector<8x128xf32>
    %308 = arith.mulf %302, %307 : vector<8x128xf32>
    %c0_138 = arith.constant 0 : index
    %c0_139 = arith.constant 0 : index
    %309 = vector.load %arg5[%c0_138, %c0_139] : memref<8x128xf32, #tpu.memory_space<vmem>>, vector<8x128xf32>
    tpu.vector_store %arg5[%c0_138, %c0_139], %306 {strides = array<i32>} : memref<8x128xf32, #tpu.memory_space<vmem>>, vector<8x128xf32>,
    %c0_140 = arith.constant 0 : index
    %c0_141 = arith.constant 0 : index
    %310 = vector.load %arg4[%c0_140, %c0_141] : memref<8x128xf32, #tpu.memory_space<vmem>>, vector<8x128xf32>
    tpu.vector_store %arg4[%c0_140, %c0_141], %308 {strides = array<i32>} : memref<8x128xf32, #tpu.memory_space<vmem>>, vector<8x128xf32>,
    %311 = arith.index_cast %c7_i32 : i32 to index
    %c0_142 = arith.constant 0 : index
    %c0_143 = arith.constant 0 : index
    %312 = vector.load %arg3[%311, %c0_142, %c0_143] : memref<8x8x128xf32, #tpu.memory_space<vmem>>, vector<1x8x128xf32>
    %313 = vector.shape_cast %312 : vector<1x8x128xf32> to vector<8x128xf32>
    %314 = vector.shape_cast %308 : vector<8x128xf32> to vector<1x8x128xf32>
    tpu.vector_store %arg3[%311, %c0_142, %c0_143], %314 {strides = array<i32>} : memref<8x8x128xf32, #tpu.memory_space<vmem>>, vector<1x8x128xf32>,
    %c8_i32 = arith.constant 8 : i32
    return
  }
  func.func @transform_0(%arg0: i32) -> (i32, i32, i32) {
    %c0_i32 = arith.constant 0 : i32
    %c0_i32_0 = arith.constant 0 : i32
    %c0_i32_1 = arith.constant 0 : i32
    return %arg0, %c0_i32, %c0_i32_0 : i32, i32, i32
  }
  func.func @transform_2(%arg0: i32) -> (i32, i32, i32) {
    %c0_i32 = arith.constant 0 : i32
    %c0_i32_0 = arith.constant 0 : i32
    %c0_i32_1 = arith.constant 0 : i32
    return %arg0, %c0_i32, %c0_i32_0 : i32, i32, i32
  }
}

module attributes {stable_mosaic.version = 11 : i64} {
  func.func @_proj_kernel(%arg0: i32, %arg1: i32, %arg2: memref<64x128xf32, #tpu.memory_space<vmem>>, %arg3: memref<128x512xf32, #tpu.memory_space<vmem>>, %arg4: memref<1x512xf32, #tpu.memory_space<vmem>>, %arg5: memref<64x512xf32, #tpu.memory_space<vmem>>) attributes {dimension_semantics = [#tpu.dimension_semantics<parallel>, #tpu.dimension_semantics<parallel>], iteration_bounds = array<i64: 1, 1>, scalar_prefetch = 0 : i64, scratch_operands = 0 : i64, tpu.core_type = #tpu.core_type<tc>, window_params = [{transform_indices = @transform_0, window_bounds = array<i64: 64, 128>}, {transform_indices = @transform_1, window_bounds = array<i64: 128, 512>}, {transform_indices = @transform_2, window_bounds = array<i64: 1, 512>}, {transform_indices = @transform_3, window_bounds = array<i64: 64, 512>}]} {
    %c0 = arith.constant 0 : index
    %c0_0 = arith.constant 0 : index
    %0 = vector.load %arg2[%c0, %c0_0] : memref<64x128xf32, #tpu.memory_space<vmem>>, vector<64x128xf32>
    %c0_1 = arith.constant 0 : index
    %c0_2 = arith.constant 0 : index
    %1 = vector.load %arg3[%c0_1, %c0_2] : memref<128x512xf32, #tpu.memory_space<vmem>>, vector<128x512xf32>
    %cst = arith.constant dense<0.000000e+00> : vector<64x512xf32>
    %2 = tpu.matmul %0, %1, %cst {dimension_numbers = #tpu.dot_dimension_numbers<[1], [0], [0], [1], [0, 0, 1, 1], [], []>} : vector<64x128xf32>, vector<128x512xf32>, vector<64x512xf32> -> vector<64x512xf32>
    %c0_3 = arith.constant 0 : index
    %c0_4 = arith.constant 0 : index
    %3 = vector.load %arg4[%c0_3, %c0_4] : memref<1x512xf32, #tpu.memory_space<vmem>>, vector<1x512xf32>
    %4 = vector.broadcast %3 : vector<1x512xf32> to vector<64x512xf32>
    %5 = arith.addf %2, %4 : vector<64x512xf32>
    %c0_5 = arith.constant 0 : index
    %c0_6 = arith.constant 0 : index
    %6 = vector.load %arg5[%c0_5, %c0_6] : memref<64x512xf32, #tpu.memory_space<vmem>>, vector<64x512xf32>
    tpu.vector_store %arg5[%c0_5, %c0_6], %5 {strides = array<i32>} : memref<64x512xf32, #tpu.memory_space<vmem>>, vector<64x512xf32>,
    return
  }
  func.func @transform_0(%arg0: i32, %arg1: i32) -> (i32, i32) {
    %c0_i32 = arith.constant 0 : i32
    %c0_i32_0 = arith.constant 0 : i32
    return %arg0, %c0_i32 : i32, i32
  }
  func.func @transform_1(%arg0: i32, %arg1: i32) -> (i32, i32) {
    %c0_i32 = arith.constant 0 : i32
    %c0_i32_0 = arith.constant 0 : i32
    return %c0_i32, %arg1 : i32, i32
  }
  func.func @transform_2(%arg0: i32, %arg1: i32) -> (i32, i32) {
    %c0_i32 = arith.constant 0 : i32
    %c0_i32_0 = arith.constant 0 : i32
    return %c0_i32, %arg1 : i32, i32
  }
  func.func @transform_3(%arg0: i32, %arg1: i32) -> (i32, i32) {
    %c0_i32 = arith.constant 0 : i32
    return %arg0, %arg1 : i32, i32
  }
}

module attributes {stable_mosaic.version = 11 : i64} {
  func.func @_lstm_last_kernel(%arg0: i32, %arg1: memref<8x8x512xf32, #tpu.memory_space<vmem>>, %arg2: memref<128x512xf32, #tpu.memory_space<any>>, %arg3: memref<128x128xf32, #tpu.memory_space<vmem>>, %arg4: memref<1x128xf32, #tpu.memory_space<vmem>>, %arg5: memref<8x128xf32, #tpu.memory_space<vmem>>, %arg6: memref<8x128xf32, #tpu.memory_space<vmem>>, %arg7: memref<8x128xf32, #tpu.memory_space<vmem>>, %arg8: memref<128x512xf32, #tpu.memory_space<vmem>>, %arg9: memref<!tpu.dma_semaphore, #tpu.memory_space<semaphore_mem>>) attributes {dimension_semantics = [#tpu.dimension_semantics<arbitrary>], iteration_bounds = array<i64: 1>, scalar_prefetch = 0 : i64, scratch_operands = 4 : i64, tpu.core_type = #tpu.core_type<tc>, window_params = [{transform_indices = @transform_0, window_bounds = array<i64: 8, 8, 512>}, {}, {pipeline_mode = #tpu.pipeline_mode<synchronous>, transform_indices = @transform_2, window_bounds = array<i64: 128, 128>}, {pipeline_mode = #tpu.pipeline_mode<synchronous>, transform_indices = @transform_3, window_bounds = array<i64: 1, 128>}, {pipeline_mode = #tpu.pipeline_mode<synchronous>, transform_indices = @transform_4, window_bounds = array<i64: 8, 128>}]} {
    %c0_i32 = arith.constant 0 : i32
    %0 = arith.cmpi eq, %arg0, %c0_i32 : i32
    %1 = arith.extui %0 : i1 to i32
    %c0_i32_0 = arith.constant 0 : i32
    %2 = arith.cmpi ne, %1, %c0_i32_0 : i32
    scf.if %2 {
      tpu.enqueue_dma source(%arg2 : memref<128x512xf32, #tpu.memory_space<any>>) target(%arg8 : memref<128x512xf32, #tpu.memory_space<vmem>>) target_semaphore(%arg9 : memref<!tpu.dma_semaphore, #tpu.memory_space<semaphore_mem>>)
      %cst_130 = arith.constant 0.000000e+00 : f32
      %286 = vector.broadcast %cst_130 : f32 to vector<8x128xf32>
      %c0_131 = arith.constant 0 : index
      %c0_132 = arith.constant 0 : index
      %287 = vector.load %arg6[%c0_131, %c0_132] : memref<8x128xf32, #tpu.memory_space<vmem>>, vector<8x128xf32>
      tpu.vector_store %arg6[%c0_131, %c0_132], %286 {strides = array<i32>} : memref<8x128xf32, #tpu.memory_space<vmem>>, vector<8x128xf32>,
      %cst_133 = arith.constant 0.000000e+00 : f32
      %288 = vector.broadcast %cst_133 : f32 to vector<8x128xf32>
      %c0_134 = arith.constant 0 : index
      %c0_135 = arith.constant 0 : index
      %289 = vector.load %arg7[%c0_134, %c0_135] : memref<8x128xf32, #tpu.memory_space<vmem>>, vector<8x128xf32>
      tpu.vector_store %arg7[%c0_134, %c0_135], %288 {strides = array<i32>} : memref<8x128xf32, #tpu.memory_space<vmem>>, vector<8x128xf32>,
      tpu.wait_dma2 semaphore(%arg9 : memref<!tpu.dma_semaphore, #tpu.memory_space<semaphore_mem>>) src(%arg2 : memref<128x512xf32, #tpu.memory_space<any>>) dst(%arg8 : memref<128x512xf32, #tpu.memory_space<vmem>>)
    } else {
    }
    %c0_i32_1 = arith.constant 0 : i32
    %3 = arith.index_cast %c0_i32_1 : i32 to index
    %c0 = arith.constant 0 : index
    %c0_2 = arith.constant 0 : index
    %4 = vector.load %arg1[%3, %c0, %c0_2] : memref<8x8x512xf32, #tpu.memory_space<vmem>>, vector<1x8x512xf32>
    %5 = vector.shape_cast %4 : vector<1x8x512xf32> to vector<8x512xf32>
    %c0_3 = arith.constant 0 : index
    %c0_4 = arith.constant 0 : index
    %6 = vector.load %arg6[%c0_3, %c0_4] : memref<8x128xf32, #tpu.memory_space<vmem>>, vector<8x128xf32>
    %c0_5 = arith.constant 0 : index
    %c0_6 = arith.constant 0 : index
    %7 = vector.load %arg8[%c0_5, %c0_6] : memref<128x512xf32, #tpu.memory_space<vmem>>, vector<128x512xf32>
    %cst = arith.constant dense<0.000000e+00> : vector<8x512xf32>
    %8 = tpu.matmul %6, %7, %cst {dimension_numbers = #tpu.dot_dimension_numbers<[1], [0], [0], [1], [0, 0, 1, 1], [], []>} : vector<8x128xf32>, vector<128x512xf32>, vector<8x512xf32> -> vector<8x512xf32>
    %9 = arith.addf %5, %8 : vector<8x512xf32>
    %10 = vector.extract_strided_slice %9 {offsets = [0, 0], sizes = [8, 128], strides = [1, 1]} : vector<8x512xf32> to vector<8x128xf32>
    %11 = arith.negf %10 : vector<8x128xf32>
    %12 = math.exp %11 : vector<8x128xf32>
    %cst_7 = arith.constant 1.000000e+00 : f32
    %13 = vector.broadcast %cst_7 : f32 to vector<8x128xf32>
    %14 = arith.addf %13, %12 : vector<8x128xf32>
    %15 = arith.divf %13, %14 : vector<8x128xf32>
    %16 = vector.extract_strided_slice %9 {offsets = [0, 128], sizes = [8, 128], strides = [1, 1]} : vector<8x512xf32> to vector<8x128xf32>
    %17 = arith.negf %16 : vector<8x128xf32>
    %18 = math.exp %17 : vector<8x128xf32>
    %cst_8 = arith.constant 1.000000e+00 : f32
    %19 = vector.broadcast %cst_8 : f32 to vector<8x128xf32>
    %20 = arith.addf %19, %18 : vector<8x128xf32>
    %21 = arith.divf %19, %20 : vector<8x128xf32>
    %22 = vector.extract_strided_slice %9 {offsets = [0, 256], sizes = [8, 128], strides = [1, 1]} : vector<8x512xf32> to vector<8x128xf32>
    %23 = math.tanh %22 : vector<8x128xf32>
    %24 = vector.extract_strided_slice %9 {offsets = [0, 384], sizes = [8, 128], strides = [1, 1]} : vector<8x512xf32> to vector<8x128xf32>
    %25 = arith.negf %24 : vector<8x128xf32>
    %26 = math.exp %25 : vector<8x128xf32>
    %cst_9 = arith.constant 1.000000e+00 : f32
    %27 = vector.broadcast %cst_9 : f32 to vector<8x128xf32>
    %28 = arith.addf %27, %26 : vector<8x128xf32>
    %29 = arith.divf %27, %28 : vector<8x128xf32>
    %c0_10 = arith.constant 0 : index
    %c0_11 = arith.constant 0 : index
    %30 = vector.load %arg7[%c0_10, %c0_11] : memref<8x128xf32, #tpu.memory_space<vmem>>, vector<8x128xf32>
    %31 = arith.mulf %21, %30 : vector<8x128xf32>
    %32 = arith.mulf %15, %23 : vector<8x128xf32>
    %33 = arith.addf %31, %32 : vector<8x128xf32>
    %34 = math.tanh %33 : vector<8x128xf32>
    %35 = arith.mulf %29, %34 : vector<8x128xf32>
    %c0_12 = arith.constant 0 : index
    %c0_13 = arith.constant 0 : index
    %36 = vector.load %arg7[%c0_12, %c0_13] : memref<8x128xf32, #tpu.memory_space<vmem>>, vector<8x128xf32>
    tpu.vector_store %arg7[%c0_12, %c0_13], %33 {strides = array<i32>} : memref<8x128xf32, #tpu.memory_space<vmem>>, vector<8x128xf32>,
    %c0_14 = arith.constant 0 : index
    %c0_15 = arith.constant 0 : index
    %37 = vector.load %arg6[%c0_14, %c0_15] : memref<8x128xf32, #tpu.memory_space<vmem>>, vector<8x128xf32>
    tpu.vector_store %arg6[%c0_14, %c0_15], %35 {strides = array<i32>} : memref<8x128xf32, #tpu.memory_space<vmem>>, vector<8x128xf32>,
    %c1_i32 = arith.constant 1 : i32
    %38 = arith.index_cast %c1_i32 : i32 to index
    %c0_16 = arith.constant 0 : index
    %c0_17 = arith.constant 0 : index
    %39 = vector.load %arg1[%38, %c0_16, %c0_17] : memref<8x8x512xf32, #tpu.memory_space<vmem>>, vector<1x8x512xf32>
    %40 = vector.shape_cast %39 : vector<1x8x512xf32> to vector<8x512xf32>
    %c0_18 = arith.constant 0 : index
    %c0_19 = arith.constant 0 : index
    %41 = vector.load %arg6[%c0_18, %c0_19] : memref<8x128xf32, #tpu.memory_space<vmem>>, vector<8x128xf32>
    %c0_20 = arith.constant 0 : index
    %c0_21 = arith.constant 0 : index
    %42 = vector.load %arg8[%c0_20, %c0_21] : memref<128x512xf32, #tpu.memory_space<vmem>>, vector<128x512xf32>
    %cst_22 = arith.constant dense<0.000000e+00> : vector<8x512xf32>
    %43 = tpu.matmul %41, %42, %cst_22 {dimension_numbers = #tpu.dot_dimension_numbers<[1], [0], [0], [1], [0, 0, 1, 1], [], []>} : vector<8x128xf32>, vector<128x512xf32>, vector<8x512xf32> -> vector<8x512xf32>
    %44 = arith.addf %40, %43 : vector<8x512xf32>
    %45 = vector.extract_strided_slice %44 {offsets = [0, 0], sizes = [8, 128], strides = [1, 1]} : vector<8x512xf32> to vector<8x128xf32>
    %46 = arith.negf %45 : vector<8x128xf32>
    %47 = math.exp %46 : vector<8x128xf32>
    %cst_23 = arith.constant 1.000000e+00 : f32
    %48 = vector.broadcast %cst_23 : f32 to vector<8x128xf32>
    %49 = arith.addf %48, %47 : vector<8x128xf32>
    %50 = arith.divf %48, %49 : vector<8x128xf32>
    %51 = vector.extract_strided_slice %44 {offsets = [0, 128], sizes = [8, 128], strides = [1, 1]} : vector<8x512xf32> to vector<8x128xf32>
    %52 = arith.negf %51 : vector<8x128xf32>
    %53 = math.exp %52 : vector<8x128xf32>
    %cst_24 = arith.constant 1.000000e+00 : f32
    %54 = vector.broadcast %cst_24 : f32 to vector<8x128xf32>
    %55 = arith.addf %54, %53 : vector<8x128xf32>
    %56 = arith.divf %54, %55 : vector<8x128xf32>
    %57 = vector.extract_strided_slice %44 {offsets = [0, 256], sizes = [8, 128], strides = [1, 1]} : vector<8x512xf32> to vector<8x128xf32>
    %58 = math.tanh %57 : vector<8x128xf32>
    %59 = vector.extract_strided_slice %44 {offsets = [0, 384], sizes = [8, 128], strides = [1, 1]} : vector<8x512xf32> to vector<8x128xf32>
    %60 = arith.negf %59 : vector<8x128xf32>
    %61 = math.exp %60 : vector<8x128xf32>
    %cst_25 = arith.constant 1.000000e+00 : f32
    %62 = vector.broadcast %cst_25 : f32 to vector<8x128xf32>
    %63 = arith.addf %62, %61 : vector<8x128xf32>
    %64 = arith.divf %62, %63 : vector<8x128xf32>
    %c0_26 = arith.constant 0 : index
    %c0_27 = arith.constant 0 : index
    %65 = vector.load %arg7[%c0_26, %c0_27] : memref<8x128xf32, #tpu.memory_space<vmem>>, vector<8x128xf32>
    %66 = arith.mulf %56, %65 : vector<8x128xf32>
    %67 = arith.mulf %50, %58 : vector<8x128xf32>
    %68 = arith.addf %66, %67 : vector<8x128xf32>
    %69 = math.tanh %68 : vector<8x128xf32>
    %70 = arith.mulf %64, %69 : vector<8x128xf32>
    %c0_28 = arith.constant 0 : index
    %c0_29 = arith.constant 0 : index
    %71 = vector.load %arg7[%c0_28, %c0_29] : memref<8x128xf32, #tpu.memory_space<vmem>>, vector<8x128xf32>
    tpu.vector_store %arg7[%c0_28, %c0_29], %68 {strides = array<i32>} : memref<8x128xf32, #tpu.memory_space<vmem>>, vector<8x128xf32>,
    %c0_30 = arith.constant 0 : index
    %c0_31 = arith.constant 0 : index
    %72 = vector.load %arg6[%c0_30, %c0_31] : memref<8x128xf32, #tpu.memory_space<vmem>>, vector<8x128xf32>
    tpu.vector_store %arg6[%c0_30, %c0_31], %70 {strides = array<i32>} : memref<8x128xf32, #tpu.memory_space<vmem>>, vector<8x128xf32>,
    %c2_i32 = arith.constant 2 : i32
    %73 = arith.index_cast %c2_i32 : i32 to index
    %c0_32 = arith.constant 0 : index
    %c0_33 = arith.constant 0 : index
    %74 = vector.load %arg1[%73, %c0_32, %c0_33] : memref<8x8x512xf32, #tpu.memory_space<vmem>>, vector<1x8x512xf32>
    %75 = vector.shape_cast %74 : vector<1x8x512xf32> to vector<8x512xf32>
    %c0_34 = arith.constant 0 : index
    %c0_35 = arith.constant 0 : index
    %76 = vector.load %arg6[%c0_34, %c0_35] : memref<8x128xf32, #tpu.memory_space<vmem>>, vector<8x128xf32>
    %c0_36 = arith.constant 0 : index
    %c0_37 = arith.constant 0 : index
    %77 = vector.load %arg8[%c0_36, %c0_37] : memref<128x512xf32, #tpu.memory_space<vmem>>, vector<128x512xf32>
    %cst_38 = arith.constant dense<0.000000e+00> : vector<8x512xf32>
    %78 = tpu.matmul %76, %77, %cst_38 {dimension_numbers = #tpu.dot_dimension_numbers<[1], [0], [0], [1], [0, 0, 1, 1], [], []>} : vector<8x128xf32>, vector<128x512xf32>, vector<8x512xf32> -> vector<8x512xf32>
    %79 = arith.addf %75, %78 : vector<8x512xf32>
    %80 = vector.extract_strided_slice %79 {offsets = [0, 0], sizes = [8, 128], strides = [1, 1]} : vector<8x512xf32> to vector<8x128xf32>
    %81 = arith.negf %80 : vector<8x128xf32>
    %82 = math.exp %81 : vector<8x128xf32>
    %cst_39 = arith.constant 1.000000e+00 : f32
    %83 = vector.broadcast %cst_39 : f32 to vector<8x128xf32>
    %84 = arith.addf %83, %82 : vector<8x128xf32>
    %85 = arith.divf %83, %84 : vector<8x128xf32>
    %86 = vector.extract_strided_slice %79 {offsets = [0, 128], sizes = [8, 128], strides = [1, 1]} : vector<8x512xf32> to vector<8x128xf32>
    %87 = arith.negf %86 : vector<8x128xf32>
    %88 = math.exp %87 : vector<8x128xf32>
    %cst_40 = arith.constant 1.000000e+00 : f32
    %89 = vector.broadcast %cst_40 : f32 to vector<8x128xf32>
    %90 = arith.addf %89, %88 : vector<8x128xf32>
    %91 = arith.divf %89, %90 : vector<8x128xf32>
    %92 = vector.extract_strided_slice %79 {offsets = [0, 256], sizes = [8, 128], strides = [1, 1]} : vector<8x512xf32> to vector<8x128xf32>
    %93 = math.tanh %92 : vector<8x128xf32>
    %94 = vector.extract_strided_slice %79 {offsets = [0, 384], sizes = [8, 128], strides = [1, 1]} : vector<8x512xf32> to vector<8x128xf32>
    %95 = arith.negf %94 : vector<8x128xf32>
    %96 = math.exp %95 : vector<8x128xf32>
    %cst_41 = arith.constant 1.000000e+00 : f32
    %97 = vector.broadcast %cst_41 : f32 to vector<8x128xf32>
    %98 = arith.addf %97, %96 : vector<8x128xf32>
    %99 = arith.divf %97, %98 : vector<8x128xf32>
    %c0_42 = arith.constant 0 : index
    %c0_43 = arith.constant 0 : index
    %100 = vector.load %arg7[%c0_42, %c0_43] : memref<8x128xf32, #tpu.memory_space<vmem>>, vector<8x128xf32>
    %101 = arith.mulf %91, %100 : vector<8x128xf32>
    %102 = arith.mulf %85, %93 : vector<8x128xf32>
    %103 = arith.addf %101, %102 : vector<8x128xf32>
    %104 = math.tanh %103 : vector<8x128xf32>
    %105 = arith.mulf %99, %104 : vector<8x128xf32>
    %c0_44 = arith.constant 0 : index
    %c0_45 = arith.constant 0 : index
    %106 = vector.load %arg7[%c0_44, %c0_45] : memref<8x128xf32, #tpu.memory_space<vmem>>, vector<8x128xf32>
    tpu.vector_store %arg7[%c0_44, %c0_45], %103 {strides = array<i32>} : memref<8x128xf32, #tpu.memory_space<vmem>>, vector<8x128xf32>,
    %c0_46 = arith.constant 0 : index
    %c0_47 = arith.constant 0 : index
    %107 = vector.load %arg6[%c0_46, %c0_47] : memref<8x128xf32, #tpu.memory_space<vmem>>, vector<8x128xf32>
    tpu.vector_store %arg6[%c0_46, %c0_47], %105 {strides = array<i32>} : memref<8x128xf32, #tpu.memory_space<vmem>>, vector<8x128xf32>,
    %c3_i32 = arith.constant 3 : i32
    %108 = arith.index_cast %c3_i32 : i32 to index
    %c0_48 = arith.constant 0 : index
    %c0_49 = arith.constant 0 : index
    %109 = vector.load %arg1[%108, %c0_48, %c0_49] : memref<8x8x512xf32, #tpu.memory_space<vmem>>, vector<1x8x512xf32>
    %110 = vector.shape_cast %109 : vector<1x8x512xf32> to vector<8x512xf32>
    %c0_50 = arith.constant 0 : index
    %c0_51 = arith.constant 0 : index
    %111 = vector.load %arg6[%c0_50, %c0_51] : memref<8x128xf32, #tpu.memory_space<vmem>>, vector<8x128xf32>
    %c0_52 = arith.constant 0 : index
    %c0_53 = arith.constant 0 : index
    %112 = vector.load %arg8[%c0_52, %c0_53] : memref<128x512xf32, #tpu.memory_space<vmem>>, vector<128x512xf32>
    %cst_54 = arith.constant dense<0.000000e+00> : vector<8x512xf32>
    %113 = tpu.matmul %111, %112, %cst_54 {dimension_numbers = #tpu.dot_dimension_numbers<[1], [0], [0], [1], [0, 0, 1, 1], [], []>} : vector<8x128xf32>, vector<128x512xf32>, vector<8x512xf32> -> vector<8x512xf32>
    %114 = arith.addf %110, %113 : vector<8x512xf32>
    %115 = vector.extract_strided_slice %114 {offsets = [0, 0], sizes = [8, 128], strides = [1, 1]} : vector<8x512xf32> to vector<8x128xf32>
    %116 = arith.negf %115 : vector<8x128xf32>
    %117 = math.exp %116 : vector<8x128xf32>
    %cst_55 = arith.constant 1.000000e+00 : f32
    %118 = vector.broadcast %cst_55 : f32 to vector<8x128xf32>
    %119 = arith.addf %118, %117 : vector<8x128xf32>
    %120 = arith.divf %118, %119 : vector<8x128xf32>
    %121 = vector.extract_strided_slice %114 {offsets = [0, 128], sizes = [8, 128], strides = [1, 1]} : vector<8x512xf32> to vector<8x128xf32>
    %122 = arith.negf %121 : vector<8x128xf32>
    %123 = math.exp %122 : vector<8x128xf32>
    %cst_56 = arith.constant 1.000000e+00 : f32
    %124 = vector.broadcast %cst_56 : f32 to vector<8x128xf32>
    %125 = arith.addf %124, %123 : vector<8x128xf32>
    %126 = arith.divf %124, %125 : vector<8x128xf32>
    %127 = vector.extract_strided_slice %114 {offsets = [0, 256], sizes = [8, 128], strides = [1, 1]} : vector<8x512xf32> to vector<8x128xf32>
    %128 = math.tanh %127 : vector<8x128xf32>
    %129 = vector.extract_strided_slice %114 {offsets = [0, 384], sizes = [8, 128], strides = [1, 1]} : vector<8x512xf32> to vector<8x128xf32>
    %130 = arith.negf %129 : vector<8x128xf32>
    %131 = math.exp %130 : vector<8x128xf32>
    %cst_57 = arith.constant 1.000000e+00 : f32
    %132 = vector.broadcast %cst_57 : f32 to vector<8x128xf32>
    %133 = arith.addf %132, %131 : vector<8x128xf32>
    %134 = arith.divf %132, %133 : vector<8x128xf32>
    %c0_58 = arith.constant 0 : index
    %c0_59 = arith.constant 0 : index
    %135 = vector.load %arg7[%c0_58, %c0_59] : memref<8x128xf32, #tpu.memory_space<vmem>>, vector<8x128xf32>
    %136 = arith.mulf %126, %135 : vector<8x128xf32>
    %137 = arith.mulf %120, %128 : vector<8x128xf32>
    %138 = arith.addf %136, %137 : vector<8x128xf32>
    %139 = math.tanh %138 : vector<8x128xf32>
    %140 = arith.mulf %134, %139 : vector<8x128xf32>
    %c0_60 = arith.constant 0 : index
    %c0_61 = arith.constant 0 : index
    %141 = vector.load %arg7[%c0_60, %c0_61] : memref<8x128xf32, #tpu.memory_space<vmem>>, vector<8x128xf32>
    tpu.vector_store %arg7[%c0_60, %c0_61], %138 {strides = array<i32>} : memref<8x128xf32, #tpu.memory_space<vmem>>, vector<8x128xf32>,
    %c0_62 = arith.constant 0 : index
    %c0_63 = arith.constant 0 : index
    %142 = vector.load %arg6[%c0_62, %c0_63] : memref<8x128xf32, #tpu.memory_space<vmem>>, vector<8x128xf32>
    tpu.vector_store %arg6[%c0_62, %c0_63], %140 {strides = array<i32>} : memref<8x128xf32, #tpu.memory_space<vmem>>, vector<8x128xf32>,
    %c4_i32 = arith.constant 4 : i32
    %143 = arith.index_cast %c4_i32 : i32 to index
    %c0_64 = arith.constant 0 : index
    %c0_65 = arith.constant 0 : index
    %144 = vector.load %arg1[%143, %c0_64, %c0_65] : memref<8x8x512xf32, #tpu.memory_space<vmem>>, vector<1x8x512xf32>
    %145 = vector.shape_cast %144 : vector<1x8x512xf32> to vector<8x512xf32>
    %c0_66 = arith.constant 0 : index
    %c0_67 = arith.constant 0 : index
    %146 = vector.load %arg6[%c0_66, %c0_67] : memref<8x128xf32, #tpu.memory_space<vmem>>, vector<8x128xf32>
    %c0_68 = arith.constant 0 : index
    %c0_69 = arith.constant 0 : index
    %147 = vector.load %arg8[%c0_68, %c0_69] : memref<128x512xf32, #tpu.memory_space<vmem>>, vector<128x512xf32>
    %cst_70 = arith.constant dense<0.000000e+00> : vector<8x512xf32>
    %148 = tpu.matmul %146, %147, %cst_70 {dimension_numbers = #tpu.dot_dimension_numbers<[1], [0], [0], [1], [0, 0, 1, 1], [], []>} : vector<8x128xf32>, vector<128x512xf32>, vector<8x512xf32> -> vector<8x512xf32>
    %149 = arith.addf %145, %148 : vector<8x512xf32>
    %150 = vector.extract_strided_slice %149 {offsets = [0, 0], sizes = [8, 128], strides = [1, 1]} : vector<8x512xf32> to vector<8x128xf32>
    %151 = arith.negf %150 : vector<8x128xf32>
    %152 = math.exp %151 : vector<8x128xf32>
    %cst_71 = arith.constant 1.000000e+00 : f32
    %153 = vector.broadcast %cst_71 : f32 to vector<8x128xf32>
    %154 = arith.addf %153, %152 : vector<8x128xf32>
    %155 = arith.divf %153, %154 : vector<8x128xf32>
    %156 = vector.extract_strided_slice %149 {offsets = [0, 128], sizes = [8, 128], strides = [1, 1]} : vector<8x512xf32> to vector<8x128xf32>
    %157 = arith.negf %156 : vector<8x128xf32>
    %158 = math.exp %157 : vector<8x128xf32>
    %cst_72 = arith.constant 1.000000e+00 : f32
    %159 = vector.broadcast %cst_72 : f32 to vector<8x128xf32>
    %160 = arith.addf %159, %158 : vector<8x128xf32>
    %161 = arith.divf %159, %160 : vector<8x128xf32>
    %162 = vector.extract_strided_slice %149 {offsets = [0, 256], sizes = [8, 128], strides = [1, 1]} : vector<8x512xf32> to vector<8x128xf32>
    %163 = math.tanh %162 : vector<8x128xf32>
    %164 = vector.extract_strided_slice %149 {offsets = [0, 384], sizes = [8, 128], strides = [1, 1]} : vector<8x512xf32> to vector<8x128xf32>
    %165 = arith.negf %164 : vector<8x128xf32>
    %166 = math.exp %165 : vector<8x128xf32>
    %cst_73 = arith.constant 1.000000e+00 : f32
    %167 = vector.broadcast %cst_73 : f32 to vector<8x128xf32>
    %168 = arith.addf %167, %166 : vector<8x128xf32>
    %169 = arith.divf %167, %168 : vector<8x128xf32>
    %c0_74 = arith.constant 0 : index
    %c0_75 = arith.constant 0 : index
    %170 = vector.load %arg7[%c0_74, %c0_75] : memref<8x128xf32, #tpu.memory_space<vmem>>, vector<8x128xf32>
    %171 = arith.mulf %161, %170 : vector<8x128xf32>
    %172 = arith.mulf %155, %163 : vector<8x128xf32>
    %173 = arith.addf %171, %172 : vector<8x128xf32>
    %174 = math.tanh %173 : vector<8x128xf32>
    %175 = arith.mulf %169, %174 : vector<8x128xf32>
    %c0_76 = arith.constant 0 : index
    %c0_77 = arith.constant 0 : index
    %176 = vector.load %arg7[%c0_76, %c0_77] : memref<8x128xf32, #tpu.memory_space<vmem>>, vector<8x128xf32>
    tpu.vector_store %arg7[%c0_76, %c0_77], %173 {strides = array<i32>} : memref<8x128xf32, #tpu.memory_space<vmem>>, vector<8x128xf32>,
    %c0_78 = arith.constant 0 : index
    %c0_79 = arith.constant 0 : index
    %177 = vector.load %arg6[%c0_78, %c0_79] : memref<8x128xf32, #tpu.memory_space<vmem>>, vector<8x128xf32>
    tpu.vector_store %arg6[%c0_78, %c0_79], %175 {strides = array<i32>} : memref<8x128xf32, #tpu.memory_space<vmem>>, vector<8x128xf32>,
    %c5_i32 = arith.constant 5 : i32
    %178 = arith.index_cast %c5_i32 : i32 to index
    %c0_80 = arith.constant 0 : index
    %c0_81 = arith.constant 0 : index
    %179 = vector.load %arg1[%178, %c0_80, %c0_81] : memref<8x8x512xf32, #tpu.memory_space<vmem>>, vector<1x8x512xf32>
    %180 = vector.shape_cast %179 : vector<1x8x512xf32> to vector<8x512xf32>
    %c0_82 = arith.constant 0 : index
    %c0_83 = arith.constant 0 : index
    %181 = vector.load %arg6[%c0_82, %c0_83] : memref<8x128xf32, #tpu.memory_space<vmem>>, vector<8x128xf32>
    %c0_84 = arith.constant 0 : index
    %c0_85 = arith.constant 0 : index
    %182 = vector.load %arg8[%c0_84, %c0_85] : memref<128x512xf32, #tpu.memory_space<vmem>>, vector<128x512xf32>
    %cst_86 = arith.constant dense<0.000000e+00> : vector<8x512xf32>
    %183 = tpu.matmul %181, %182, %cst_86 {dimension_numbers = #tpu.dot_dimension_numbers<[1], [0], [0], [1], [0, 0, 1, 1], [], []>} : vector<8x128xf32>, vector<128x512xf32>, vector<8x512xf32> -> vector<8x512xf32>
    %184 = arith.addf %180, %183 : vector<8x512xf32>
    %185 = vector.extract_strided_slice %184 {offsets = [0, 0], sizes = [8, 128], strides = [1, 1]} : vector<8x512xf32> to vector<8x128xf32>
    %186 = arith.negf %185 : vector<8x128xf32>
    %187 = math.exp %186 : vector<8x128xf32>
    %cst_87 = arith.constant 1.000000e+00 : f32
    %188 = vector.broadcast %cst_87 : f32 to vector<8x128xf32>
    %189 = arith.addf %188, %187 : vector<8x128xf32>
    %190 = arith.divf %188, %189 : vector<8x128xf32>
    %191 = vector.extract_strided_slice %184 {offsets = [0, 128], sizes = [8, 128], strides = [1, 1]} : vector<8x512xf32> to vector<8x128xf32>
    %192 = arith.negf %191 : vector<8x128xf32>
    %193 = math.exp %192 : vector<8x128xf32>
    %cst_88 = arith.constant 1.000000e+00 : f32
    %194 = vector.broadcast %cst_88 : f32 to vector<8x128xf32>
    %195 = arith.addf %194, %193 : vector<8x128xf32>
    %196 = arith.divf %194, %195 : vector<8x128xf32>
    %197 = vector.extract_strided_slice %184 {offsets = [0, 256], sizes = [8, 128], strides = [1, 1]} : vector<8x512xf32> to vector<8x128xf32>
    %198 = math.tanh %197 : vector<8x128xf32>
    %199 = vector.extract_strided_slice %184 {offsets = [0, 384], sizes = [8, 128], strides = [1, 1]} : vector<8x512xf32> to vector<8x128xf32>
    %200 = arith.negf %199 : vector<8x128xf32>
    %201 = math.exp %200 : vector<8x128xf32>
    %cst_89 = arith.constant 1.000000e+00 : f32
    %202 = vector.broadcast %cst_89 : f32 to vector<8x128xf32>
    %203 = arith.addf %202, %201 : vector<8x128xf32>
    %204 = arith.divf %202, %203 : vector<8x128xf32>
    %c0_90 = arith.constant 0 : index
    %c0_91 = arith.constant 0 : index
    %205 = vector.load %arg7[%c0_90, %c0_91] : memref<8x128xf32, #tpu.memory_space<vmem>>, vector<8x128xf32>
    %206 = arith.mulf %196, %205 : vector<8x128xf32>
    %207 = arith.mulf %190, %198 : vector<8x128xf32>
    %208 = arith.addf %206, %207 : vector<8x128xf32>
    %209 = math.tanh %208 : vector<8x128xf32>
    %210 = arith.mulf %204, %209 : vector<8x128xf32>
    %c0_92 = arith.constant 0 : index
    %c0_93 = arith.constant 0 : index
    %211 = vector.load %arg7[%c0_92, %c0_93] : memref<8x128xf32, #tpu.memory_space<vmem>>, vector<8x128xf32>
    tpu.vector_store %arg7[%c0_92, %c0_93], %208 {strides = array<i32>} : memref<8x128xf32, #tpu.memory_space<vmem>>, vector<8x128xf32>,
    %c0_94 = arith.constant 0 : index
    %c0_95 = arith.constant 0 : index
    %212 = vector.load %arg6[%c0_94, %c0_95] : memref<8x128xf32, #tpu.memory_space<vmem>>, vector<8x128xf32>
    tpu.vector_store %arg6[%c0_94, %c0_95], %210 {strides = array<i32>} : memref<8x128xf32, #tpu.memory_space<vmem>>, vector<8x128xf32>,
    %c6_i32 = arith.constant 6 : i32
    %213 = arith.index_cast %c6_i32 : i32 to index
    %c0_96 = arith.constant 0 : index
    %c0_97 = arith.constant 0 : index
    %214 = vector.load %arg1[%213, %c0_96, %c0_97] : memref<8x8x512xf32, #tpu.memory_space<vmem>>, vector<1x8x512xf32>
    %215 = vector.shape_cast %214 : vector<1x8x512xf32> to vector<8x512xf32>
    %c0_98 = arith.constant 0 : index
    %c0_99 = arith.constant 0 : index
    %216 = vector.load %arg6[%c0_98, %c0_99] : memref<8x128xf32, #tpu.memory_space<vmem>>, vector<8x128xf32>
    %c0_100 = arith.constant 0 : index
    %c0_101 = arith.constant 0 : index
    %217 = vector.load %arg8[%c0_100, %c0_101] : memref<128x512xf32, #tpu.memory_space<vmem>>, vector<128x512xf32>
    %cst_102 = arith.constant dense<0.000000e+00> : vector<8x512xf32>
    %218 = tpu.matmul %216, %217, %cst_102 {dimension_numbers = #tpu.dot_dimension_numbers<[1], [0], [0], [1], [0, 0, 1, 1], [], []>} : vector<8x128xf32>, vector<128x512xf32>, vector<8x512xf32> -> vector<8x512xf32>
    %219 = arith.addf %215, %218 : vector<8x512xf32>
    %220 = vector.extract_strided_slice %219 {offsets = [0, 0], sizes = [8, 128], strides = [1, 1]} : vector<8x512xf32> to vector<8x128xf32>
    %221 = arith.negf %220 : vector<8x128xf32>
    %222 = math.exp %221 : vector<8x128xf32>
    %cst_103 = arith.constant 1.000000e+00 : f32
    %223 = vector.broadcast %cst_103 : f32 to vector<8x128xf32>
    %224 = arith.addf %223, %222 : vector<8x128xf32>
    %225 = arith.divf %223, %224 : vector<8x128xf32>
    %226 = vector.extract_strided_slice %219 {offsets = [0, 128], sizes = [8, 128], strides = [1, 1]} : vector<8x512xf32> to vector<8x128xf32>
    %227 = arith.negf %226 : vector<8x128xf32>
    %228 = math.exp %227 : vector<8x128xf32>
    %cst_104 = arith.constant 1.000000e+00 : f32
    %229 = vector.broadcast %cst_104 : f32 to vector<8x128xf32>
    %230 = arith.addf %229, %228 : vector<8x128xf32>
    %231 = arith.divf %229, %230 : vector<8x128xf32>
    %232 = vector.extract_strided_slice %219 {offsets = [0, 256], sizes = [8, 128], strides = [1, 1]} : vector<8x512xf32> to vector<8x128xf32>
    %233 = math.tanh %232 : vector<8x128xf32>
    %234 = vector.extract_strided_slice %219 {offsets = [0, 384], sizes = [8, 128], strides = [1, 1]} : vector<8x512xf32> to vector<8x128xf32>
    %235 = arith.negf %234 : vector<8x128xf32>
    %236 = math.exp %235 : vector<8x128xf32>
    %cst_105 = arith.constant 1.000000e+00 : f32
    %237 = vector.broadcast %cst_105 : f32 to vector<8x128xf32>
    %238 = arith.addf %237, %236 : vector<8x128xf32>
    %239 = arith.divf %237, %238 : vector<8x128xf32>
    %c0_106 = arith.constant 0 : index
    %c0_107 = arith.constant 0 : index
    %240 = vector.load %arg7[%c0_106, %c0_107] : memref<8x128xf32, #tpu.memory_space<vmem>>, vector<8x128xf32>
    %241 = arith.mulf %231, %240 : vector<8x128xf32>
    %242 = arith.mulf %225, %233 : vector<8x128xf32>
    %243 = arith.addf %241, %242 : vector<8x128xf32>
    %244 = math.tanh %243 : vector<8x128xf32>
    %245 = arith.mulf %239, %244 : vector<8x128xf32>
    %c0_108 = arith.constant 0 : index
    %c0_109 = arith.constant 0 : index
    %246 = vector.load %arg7[%c0_108, %c0_109] : memref<8x128xf32, #tpu.memory_space<vmem>>, vector<8x128xf32>
    tpu.vector_store %arg7[%c0_108, %c0_109], %243 {strides = array<i32>} : memref<8x128xf32, #tpu.memory_space<vmem>>, vector<8x128xf32>,
    %c0_110 = arith.constant 0 : index
    %c0_111 = arith.constant 0 : index
    %247 = vector.load %arg6[%c0_110, %c0_111] : memref<8x128xf32, #tpu.memory_space<vmem>>, vector<8x128xf32>
    tpu.vector_store %arg6[%c0_110, %c0_111], %245 {strides = array<i32>} : memref<8x128xf32, #tpu.memory_space<vmem>>, vector<8x128xf32>,
    %c7_i32 = arith.constant 7 : i32
    %248 = arith.index_cast %c7_i32 : i32 to index
    %c0_112 = arith.constant 0 : index
    %c0_113 = arith.constant 0 : index
    %249 = vector.load %arg1[%248, %c0_112, %c0_113] : memref<8x8x512xf32, #tpu.memory_space<vmem>>, vector<1x8x512xf32>
    %250 = vector.shape_cast %249 : vector<1x8x512xf32> to vector<8x512xf32>
    %c0_114 = arith.constant 0 : index
    %c0_115 = arith.constant 0 : index
    %251 = vector.load %arg6[%c0_114, %c0_115] : memref<8x128xf32, #tpu.memory_space<vmem>>, vector<8x128xf32>
    %c0_116 = arith.constant 0 : index
    %c0_117 = arith.constant 0 : index
    %252 = vector.load %arg8[%c0_116, %c0_117] : memref<128x512xf32, #tpu.memory_space<vmem>>, vector<128x512xf32>
    %cst_118 = arith.constant dense<0.000000e+00> : vector<8x512xf32>
    %253 = tpu.matmul %251, %252, %cst_118 {dimension_numbers = #tpu.dot_dimension_numbers<[1], [0], [0], [1], [0, 0, 1, 1], [], []>} : vector<8x128xf32>, vector<128x512xf32>, vector<8x512xf32> -> vector<8x512xf32>
    %254 = arith.addf %250, %253 : vector<8x512xf32>
    %255 = vector.extract_strided_slice %254 {offsets = [0, 0], sizes = [8, 128], strides = [1, 1]} : vector<8x512xf32> to vector<8x128xf32>
    %256 = arith.negf %255 : vector<8x128xf32>
    %257 = math.exp %256 : vector<8x128xf32>
    %cst_119 = arith.constant 1.000000e+00 : f32
    %258 = vector.broadcast %cst_119 : f32 to vector<8x128xf32>
    %259 = arith.addf %258, %257 : vector<8x128xf32>
    %260 = arith.divf %258, %259 : vector<8x128xf32>
    %261 = vector.extract_strided_slice %254 {offsets = [0, 128], sizes = [8, 128], strides = [1, 1]} : vector<8x512xf32> to vector<8x128xf32>
    %262 = arith.negf %261 : vector<8x128xf32>
    %263 = math.exp %262 : vector<8x128xf32>
    %cst_120 = arith.constant 1.000000e+00 : f32
    %264 = vector.broadcast %cst_120 : f32 to vector<8x128xf32>
    %265 = arith.addf %264, %263 : vector<8x128xf32>
    %266 = arith.divf %264, %265 : vector<8x128xf32>
    %267 = vector.extract_strided_slice %254 {offsets = [0, 256], sizes = [8, 128], strides = [1, 1]} : vector<8x512xf32> to vector<8x128xf32>
    %268 = math.tanh %267 : vector<8x128xf32>
    %269 = vector.extract_strided_slice %254 {offsets = [0, 384], sizes = [8, 128], strides = [1, 1]} : vector<8x512xf32> to vector<8x128xf32>
    %270 = arith.negf %269 : vector<8x128xf32>
    %271 = math.exp %270 : vector<8x128xf32>
    %cst_121 = arith.constant 1.000000e+00 : f32
    %272 = vector.broadcast %cst_121 : f32 to vector<8x128xf32>
    %273 = arith.addf %272, %271 : vector<8x128xf32>
    %274 = arith.divf %272, %273 : vector<8x128xf32>
    %c0_122 = arith.constant 0 : index
    %c0_123 = arith.constant 0 : index
    %275 = vector.load %arg7[%c0_122, %c0_123] : memref<8x128xf32, #tpu.memory_space<vmem>>, vector<8x128xf32>
    %276 = arith.mulf %266, %275 : vector<8x128xf32>
    %277 = arith.mulf %260, %268 : vector<8x128xf32>
    %278 = arith.addf %276, %277 : vector<8x128xf32>
    %279 = math.tanh %278 : vector<8x128xf32>
    %280 = arith.mulf %274, %279 : vector<8x128xf32>
    %c0_124 = arith.constant 0 : index
    %c0_125 = arith.constant 0 : index
    %281 = vector.load %arg7[%c0_124, %c0_125] : memref<8x128xf32, #tpu.memory_space<vmem>>, vector<8x128xf32>
    tpu.vector_store %arg7[%c0_124, %c0_125], %278 {strides = array<i32>} : memref<8x128xf32, #tpu.memory_space<vmem>>, vector<8x128xf32>,
    %c0_126 = arith.constant 0 : index
    %c0_127 = arith.constant 0 : index
    %282 = vector.load %arg6[%c0_126, %c0_127] : memref<8x128xf32, #tpu.memory_space<vmem>>, vector<8x128xf32>
    tpu.vector_store %arg6[%c0_126, %c0_127], %280 {strides = array<i32>} : memref<8x128xf32, #tpu.memory_space<vmem>>, vector<8x128xf32>,
    %c8_i32 = arith.constant 8 : i32
    %c0_i32_128 = arith.constant 0 : i32
    %283 = arith.cmpi eq, %arg0, %c0_i32_128 : i32
    %284 = arith.extui %283 : i1 to i32
    %c0_i32_129 = arith.constant 0 : i32
    %285 = arith.cmpi ne, %284, %c0_i32_129 : i32
    scf.if %285 {
      %c0_130 = arith.constant 0 : index
      %c0_131 = arith.constant 0 : index
      %286 = vector.load %arg6[%c0_130, %c0_131] : memref<8x128xf32, #tpu.memory_space<vmem>>, vector<8x128xf32>
      %c0_132 = arith.constant 0 : index
      %c0_133 = arith.constant 0 : index
      %287 = vector.load %arg3[%c0_132, %c0_133] : memref<128x128xf32, #tpu.memory_space<vmem>>, vector<128x128xf32>
      %cst_134 = arith.constant dense<0.000000e+00> : vector<8x128xf32>
      %288 = tpu.matmul %286, %287, %cst_134 {dimension_numbers = #tpu.dot_dimension_numbers<[1], [0], [0], [1], [0, 0, 1, 1], [], []>} : vector<8x128xf32>, vector<128x128xf32>, vector<8x128xf32> -> vector<8x128xf32>
      %c0_135 = arith.constant 0 : index
      %c0_136 = arith.constant 0 : index
      %289 = vector.load %arg4[%c0_135, %c0_136] : memref<1x128xf32, #tpu.memory_space<vmem>>, vector<1x128xf32>
      %290 = vector.broadcast %289 : vector<1x128xf32> to vector<8x128xf32>
      %291 = arith.addf %288, %290 : vector<8x128xf32>
      %c0_137 = arith.constant 0 : index
      %c0_138 = arith.constant 0 : index
      %292 = vector.load %arg5[%c0_137, %c0_138] : memref<8x128xf32, #tpu.memory_space<vmem>>, vector<8x128xf32>
      tpu.vector_store %arg5[%c0_137, %c0_138], %291 {strides = array<i32>} : memref<8x128xf32, #tpu.memory_space<vmem>>, vector<8x128xf32>,
    } else {
    }
    return
  }
  func.func @transform_0(%arg0: i32) -> (i32, i32, i32) {
    %c0_i32 = arith.constant 0 : i32
    %c0_i32_0 = arith.constant 0 : i32
    %c0_i32_1 = arith.constant 0 : i32
    return %arg0, %c0_i32, %c0_i32_0 : i32, i32, i32
  }
  func.func @transform_2(%arg0: i32) -> (i32, i32) {
    %c0_i32 = arith.constant 0 : i32
    %c0_i32_0 = arith.constant 0 : i32
    %c0_i32_1 = arith.constant 0 : i32
    return %c0_i32, %c0_i32_0 : i32, i32
  }
  func.func @transform_3(%arg0: i32) -> (i32, i32) {
    %c0_i32 = arith.constant 0 : i32
    %c0_i32_0 = arith.constant 0 : i32
    %c0_i32_1 = arith.constant 0 : i32
    return %c0_i32, %c0_i32_0 : i32, i32
  }
  func.func @transform_4(%arg0: i32) -> (i32, i32) {
    %c0_i32 = arith.constant 0 : i32
    %c0_i32_0 = arith.constant 0 : i32
    %c0_i32_1 = arith.constant 0 : i32
    return %c0_i32, %c0_i32_0 : i32, i32
  }
}

</mosaic_0001>

<bundles_post_ra>
// kernel: lstm_model_forward.6
= control target key start
LH: loop header
LB: loop body
LE: loop exit
PB: predicated region body
PF: predicated region fallthrough
CT: control target
= control target key end

     0   :  { %v435_v3 = vmov 0.0   ;;  %s827_s1 = inlined_call_operand.vmem [shape: f32[128,512], index: 1, kind: input, shape index: {}]   ;;  %s828_s0 = inlined_call_operand.vmem [shape: f32[64,128], index: 0, kind: input, shape index: {}]   ;;  %s829_s2 = inlined_call_operand.vmem [shape: f32[1,512], index: 2, kind: input, shape index: {}]   ;;  %s830_s3 = inlined_call_operand.vmem [shape: f32[64,512], index: 3, kind: output, shape index: {}]  }
   0x1   :  { %v23_v0 = vld [vmem:[%s827_s1 + $0x8] sm:$0xff]  ;;  %v25_v2 = vld [vmem:[%s827_s1 + $0x18] sm:$0xff]  ;;  %172 = vmatprep.mubr.f32.mxu0 %v435_v3  ;;  %285 = vmatprep.mubr.f32.mxu1 %v435_v3  ;;  %v22_v6 = vld [vmem:[%s827_s1] sm:$0xff] }
   0x2   :  { %v27_v1 = vld [vmem:[%s827_s1 + $0x28] sm:$0xff]  ;;  %v29_v5 = vld [vmem:[%s827_s1 + $0x38] sm:$0xff]  ;;  %v26_v7 = vld [vmem:[%s827_s1 + $0x20] sm:$0xff] }
   0x3   :  { %v370_v4 = vpack.c.bf16 %v27_v1, %v23_v0  ;;  %v402_v8 = vpack.c.bf16 %v29_v5, %v25_v2  ;;  %v372_v9 = vpack.c.bf16 %v26_v7, %v22_v6  ;;  %v24_v10 = vld [vmem:[%s827_s1 + $0x10] sm:$0xff]  ;;  %v31_v12 = vld [vmem:[%s827_s1 + $0x48] sm:$0xff]  ;;  %v33_v15 = vld [vmem:[%s827_s1 + $0x58] sm:$0xff] }
   0x4   :  { %v28_v11 = vld [vmem:[%s827_s1 + $0x30] sm:$0xff]  ;;  %v35_v14 = vld [vmem:[%s827_s1 + $0x68] sm:$0xff]  ;;  %v37_v16 = vld [vmem:[%s827_s1 + $0x78] sm:$0xff] }
   0x5   :  { %371 = vmatprep.subr.bf16.mxu0 %v370_v4  ;;  %v404_v13 = vpack.c.bf16 %v28_v11, %v24_v10  ;;  %403 = vmatprep.subr.bf16.mxu1 %v402_v8  ;;  %v374_v17 = vpack.c.bf16 %v35_v14, %v31_v12  ;;  %v406_v18 = vpack.c.bf16 %v37_v16, %v33_v15  ;;  %v30_v19 = vld [vmem:[%s827_s1 + $0x40] sm:$0xff]  ;;  %v32_v21 = vld [vmem:[%s827_s1 + $0x50] sm:$0xff]  ;;  %v39_v24 = vld [vmem:[%s827_s1 + $0x88] sm:$0xff] }
   0x6   :  { %373 = vmatpush1.bf16.msra.mxu0 %v372_v9  ;;  %v34_v20 = vld [vmem:[%s827_s1 + $0x60] sm:$0xff]  ;;  %v36_v23 = vld [vmem:[%s827_s1 + $0x70] sm:$0xff]  ;;  %v43_v25 = vld [vmem:[%s827_s1 + $0xa8] sm:$0xff] }
   0x7   :  { %405 = vmatpush1.bf16.msra.mxu1 %v404_v13  ;;  %v376_v22 = vpack.c.bf16 %v34_v20, %v30_v19  ;;  %375 = vmatprep.subr.bf16.mxu0 %v374_v17  ;;  %v408_v26 = vpack.c.bf16 %v36_v23, %v32_v21  ;;  %v378_v27 = vpack.c.bf16 %v43_v25, %v39_v24  ;;  %v41_v28 = vld [vmem:[%s827_s1 + $0x98] sm:$0xff]  ;;  %v38_v30 = vld [vmem:[%s827_s1 + $0x80] sm:$0xff]  ;;  %v40_v33 = vld [vmem:[%s827_s1 + $0x90] sm:$0xff] }
   0x8   :  { %407 = vmatprep.subr.bf16.mxu1 %v406_v18  ;;  %v45_v29 = vld [vmem:[%s827_s1 + $0xb8] sm:$0xff]  ;;  %v42_v32 = vld [vmem:[%s827_s1 + $0xa0] sm:$0xff]  ;;  %v44_v34 = vld [vmem:[%s827_s1 + $0xb0] sm:$0xff] }
   0x9   :  { %v410_v31 = vpack.c.bf16 %v45_v29, %v41_v28  ;;  %v380_v35 = vpack.c.bf16 %v42_v32, %v38_v30  ;;  %v47_v36 = vld [vmem:[%s827_s1 + $0xc8] sm:$0xff]  ;;  %v49_v38 = vld [vmem:[%s827_s1 + $0xd8] sm:$0xff]  ;;  %v412_v39 = vpack.c.bf16 %v44_v34, %v40_v33  ;;  %v46_v42 = vld [vmem:[%s827_s1 + $0xc0] sm:$0xff] }
   0xa   :  { %377 = vmatpush1.bf16.msra.mxu0 %v376_v22  ;;  %v51_v37 = vld [vmem:[%s827_s1 + $0xe8] sm:$0xff]  ;;  %v53_v41 = vld [vmem:[%s827_s1 + $0xf8] sm:$0xff]  ;;  %v50_v43 = vld [vmem:[%s827_s1 + $0xe0] sm:$0xff] }
   0xb   :  { %409 = vmatpush1.bf16.msra.mxu1 %v408_v26  ;;  %379 = vmatprep.subr.bf16.mxu0 %v378_v27  ;;  %v382_v40 = vpack.c.bf16 %v51_v37, %v47_v36  ;;  %v414_v44 = vpack.c.bf16 %v53_v41, %v49_v38  ;;  %v48_v45 = vld [vmem:[%s827_s1 + $0xd0] sm:$0xff]  ;;  %v55_v47 = vld [vmem:[%s827_s1 + $0x108] sm:$0xff]  ;;  %v57_v49 = vld [vmem:[%s827_s1 + $0x118] sm:$0xff]  ;;  %v384_v51 = vpack.c.bf16 %v50_v43, %v46_v42  ;;  %v88_v42 = vlaneseq }
   0xc   :  { %411 = vmatprep.subr.bf16.mxu1 %v410_v31  ;;  %v52_v46 = vld [vmem:[%s827_s1 + $0xf0] sm:$0xff]  ;;  %v59_v48 = vld [vmem:[%s827_s1 + $0x128] sm:$0xff]  ;;  %v61_v50 = vld [vmem:[%s827_s1 + $0x138] sm:$0xff] }
   0xd   :  { %v416_v52 = vpack.c.bf16 %v52_v46, %v48_v45  ;;  %v386_v53 = vpack.c.bf16 %v59_v48, %v55_v47  ;;  %v54_v54 = vld [vmem:[%s827_s1 + $0x100] sm:$0xff]  ;;  %v56_v56 = vld [vmem:[%s827_s1 + $0x110] sm:$0xff]  ;;  %v418_v57 = vpack.c.bf16 %v61_v50, %v57_v49  ;;  %v63_v59 = vld [vmem:[%s827_s1 + $0x148] sm:$0xff]  ;;  %v89_v43 = vshrl.u32 %v88_v42, 7 }
   0xe   :  { %381 = vmatpush1.bf16.msra.mxu0 %v380_v35  ;;  %v58_v55 = vld [vmem:[%s827_s1 + $0x120] sm:$0xff]  ;;  %v60_v58 = vld [vmem:[%s827_s1 + $0x130] sm:$0xff]  ;;  %v67_v60 = vld [vmem:[%s827_s1 + $0x168] sm:$0xff] }
   0xf   :  { %413 = vmatpush1.bf16.msra.mxu1 %v412_v39  ;;  %383 = vmatprep.subr.bf16.mxu0 %v382_v40  ;;  %v65_v61 = vld [vmem:[%s827_s1 + $0x158] sm:$0xff]  ;;  %v388_v63 = vpack.c.bf16 %v58_v55, %v54_v54  ;;  %v420_v0 = vpack.c.bf16 %v60_v58, %v56_v56  ;;  %v390_v1 = vpack.c.bf16 %v67_v60, %v63_v59  ;;  %v62_v2 = vld [vmem:[%s827_s1 + $0x140] sm:$0xff]  ;;  %v64_v5 = vld [vmem:[%s827_s1 + $0x150] sm:$0xff]  ;;  %v98_v46 = vsub.s32 2, %v89_v43 }
  0x10   :  { %415 = vmatprep.subr.bf16.mxu1 %v414_v44  ;;  %v69_v62 = vld [vmem:[%s827_s1 + $0x178] sm:$0xff]  ;;  %v66_v4 = vld [vmem:[%s827_s1 + $0x160] sm:$0xff]  ;;  %v68_v7 = vld [vmem:[%s827_s1 + $0x170] sm:$0xff]  ;;  %v90_v44 = vsub.s32 0, %v89_v43  ;;  %v94_v47 = vsub.s32 1, %v89_v43  ;;  %v102_v48 = vsub.s32 3, %v89_v43 }
  0x11   :  { %v422_v6 = vpack.c.bf16 %v69_v62, %v65_v61  ;;  %v71_v8 = vld [vmem:[%s827_s1 + $0x188] sm:$0xff]  ;;  %v73_v10 = vld [vmem:[%s827_s1 + $0x198] sm:$0xff]  ;;  %v392_v12 = vpack.c.bf16 %v66_v4, %v62_v2  ;;  %v424_v13 = vpack.c.bf16 %v68_v7, %v64_v5  ;;  %v70_v15 = vld [vmem:[%s827_s1 + $0x180] sm:$0xff] }
  0x12   :  { %385 = vmatpush1.bf16.msra.mxu0 %v384_v51  ;;  %v75_v9 = vld [vmem:[%s827_s1 + $0x1a8] sm:$0xff]  ;;  %v77_v11 = vld [vmem:[%s827_s1 + $0x1b8] sm:$0xff]  ;;  %v74_v16 = vld [vmem:[%s827_s1 + $0x1a0] sm:$0xff] }
  0x13   :  { %417 = vmatpush1.bf16.msra.mxu1 %v416_v52  ;;  %387 = vmatprep.subr.bf16.mxu0 %v386_v53  ;;  %v394_v14 = vpack.c.bf16 %v75_v9, %v71_v8  ;;  %v72_v17 = vld [vmem:[%s827_s1 + $0x190] sm:$0xff]  ;;  %v426_v18 = vpack.c.bf16 %v77_v11, %v73_v10  ;;  %v79_v20 = vld [vmem:[%s827_s1 + $0x1c8] sm:$0xff]  ;;  %v81_v22 = vld [vmem:[%s827_s1 + $0x1d8] sm:$0xff]  ;;  %v396_v24 = vpack.c.bf16 %v74_v16, %v70_v15 }
  0x14   :  { %419 = vmatprep.subr.bf16.mxu1 %v418_v57  ;;  %v76_v19 = vld [vmem:[%s827_s1 + $0x1b0] sm:$0xff]  ;;  %v83_v21 = vld [vmem:[%s827_s1 + $0x1e8] sm:$0xff]  ;;  %v85_v23 = vld [vmem:[%s827_s1 + $0x1f8] sm:$0xff] }
  0x15   :  { %v428_v25 = vpack.c.bf16 %v76_v19, %v72_v17  ;;  %v398_v26 = vpack.c.bf16 %v83_v21, %v79_v20  ;;  %v78_v27 = vld [vmem:[%s827_s1 + $0x1c0] sm:$0xff]  ;;  %v430_v29 = vpack.c.bf16 %v85_v23, %v81_v22  ;;  %v80_v30 = vld [vmem:[%s827_s1 + $0x1d0] sm:$0xff]  ;;  %v15_v35 = vld [vmem:[%s828_s0 + $0x8] sm:$0xff] }
  0x16   :  { %389 = vmatpush1.bf16.msra.mxu0 %v388_v63  ;;  %v82_v28 = vld [vmem:[%s827_s1 + $0x1e0] sm:$0xff]  ;;  %v84_v31 = vld [vmem:[%s827_s1 + $0x1f0] sm:$0xff]  ;;  %v17_v37 = vld [vmem:[%s828_s0 + $0x18] sm:$0xff] }
  0x17   :  { %421 = vmatpush1.bf16.msra.mxu1 %v420_v0  ;;  %391 = vmatprep.subr.bf16.mxu0 %v390_v1  ;;  %v400_v32 = vpack.c.bf16 %v82_v28, %v78_v27  ;;  %v432_v33 = vpack.c.bf16 %v84_v31, %v80_v30  ;;  %v14_v34 = vld [vmem:[%s828_s0] sm:$0xff]  ;;  %v16_v36 = vld [vmem:[%s828_s0 + $0x10] sm:$0xff]  ;;  %v19_v39 = vld [vmem:[%s828_s0 + $0x28] sm:$0xff] }
  0x18   :  { %423 = vmatprep.subr.bf16.mxu1 %v422_v6  ;;  %v18_v38 = vld [vmem:[%s828_s0 + $0x20] sm:$0xff]  ;;  %v20_v40 = vld [vmem:[%s828_s0 + $0x30] sm:$0xff]  ;;  %v21_v41 = vld [vmem:[%s828_s0 + $0x38] sm:$0xff] }
  0x19   :  { %v86_v45 = vld [vmem:[%s829_s2] sm:$0xf] }
  0x1a   :  { %393 = vmatpush1.bf16.msra.mxu0 %v392_v12  ;;  %v691_v49 = vrot.slane %v86_v45, %v90_v44  ;;  %v693_v50 = vrot.slane %v86_v45, %v98_v46  ;;  %v695_v51 = vrot.slane %v86_v45, %v94_v47  ;;  %v697_v52 = vrot.slane %v86_v45, %v102_v48 }
  0x1b   :  { %425 = vmatpush1.bf16.msra.mxu1 %v424_v13  ;;  %395 = vmatprep.subr.bf16.mxu0 %v394_v14 }
  0x1c   :  { %427 = vmatprep.subr.bf16.mxu1 %v426_v18 }
  0x1e   :  { %397 = vmatpush1.bf16.msra.mxu0 %v396_v24 }
  0x1f   :  { %429 = vmatpush1.bf16.msra.mxu1 %v428_v25  ;;  %399 = vmatprep.subr.bf16.mxu0 %v398_v26 }
  0x20   :  { %431 = vmatprep.subr.bf16.mxu1 %v430_v29 }
  0x22   :  { %401 = vmatpush1.bf16.msra.mxu0 %v400_v32 }
  0x23   :  { %433 = vmatpush1.bf16.msra.mxu1 %v432_v33 }
  0x25   :  { %173 = vmatmul.mubr.f32.vlgmr.msra.gmra.mrb[0].mxu0 %v14_v34 }
  0x26   :  { %286 = vmatmul.mubr.f32.vlgmr.msra.gmra.mrb[0].mxu1 %v14_v34  ;;  %178 = vmatprep.mubr.f32.mxu0 %v435_v3 }
  0x27   :  { %291 = vmatprep.mubr.f32.mxu1 %v435_v3 }
  0x29   :  { %179 = vmatmul.mubr.f32.gmra.mrb[2].mxu0 %v15_v35 }
  0x2a   :  { %292 = vmatmul.mubr.f32.gmra.mrb[2].mxu1 %v15_v35  ;;  %184 = vmatprep.mubr.f32.mxu0 %v435_v3 }
  0x2b   :  { %297 = vmatprep.mubr.f32.mxu1 %v435_v3 }
  0x2d   :  { %185 = vmatmul.mubr.f32.gmra.mrb[4].mxu0 %v16_v36 }
  0x2e   :  { %298 = vmatmul.mubr.f32.gmra.mrb[4].mxu1 %v16_v36  ;;  %190 = vmatprep.mubr.f32.mxu0 %v435_v3 }
  0x2f   :  { %303 = vmatprep.mubr.f32.mxu1 %v435_v3 }
  0x31   :  { %191 = vmatmul.mubr.f32.gmra.mrb[6].mxu0 %v17_v37 }
  0x32   :  { %304 = vmatmul.mubr.f32.gmra.mrb[6].mxu1 %v17_v37  ;;  %196 = vmatprep.mubr.f32.mxu0 %v435_v3 }
  0x33   :  { %309 = vmatprep.mubr.f32.mxu1 %v435_v3 }
  0x35   :  { %197 = vmatmul.mubr.f32.gmra.mrb[8].mxu0 %v18_v38 }
  0x36   :  { %310 = vmatmul.mubr.f32.gmra.mrb[8].mxu1 %v18_v38  ;;  %202 = vmatprep.mubr.f32.mxu0 %v435_v3 }
  0x37   :  { %315 = vmatprep.mubr.f32.mxu1 %v435_v3 }
  0x39   :  { %203 = vmatmul.mubr.f32.gmra.mrb[10].mxu0 %v19_v39 }
  0x3a   :  { %316 = vmatmul.mubr.f32.gmra.mrb[10].mxu1 %v19_v39  ;;  %208 = vmatprep.mubr.f32.mxu0 %v435_v3 }
  0x3b   :  { %321 = vmatprep.mubr.f32.mxu1 %v435_v3 }
  0x3d   :  { %209 = vmatmul.mubr.f32.gmra.mrb[12].mxu0 %v20_v40 }
  0x3e   :  { %322 = vmatmul.mubr.f32.gmra.mrb[12].mxu1 %v20_v40  ;;  %214 = vmatprep.mubr.f32.mxu0 %v435_v3 }
  0x3f   :  { %327 = vmatprep.mubr.f32.mxu1 %v435_v3 }
  0x41   :  { %215 = vmatmul.mubr.f32.gmra.mrb[14].mxu0 %v21_v41 }
  0x42   :  { %328 = vmatmul.mubr.f32.gmra.mrb[14].mxu1 %v21_v41 }
  0xf8   :  { %v174_v3 = vpop.f32.mrb[0].mxu0 }
  0xf9   :  { %v175_v53 = vadd.f32 %v174_v3, %v691_v49  ;;  %v287_v54 = vpop.f32.mrb[0].mxu1  ;;  %v176_v55 = vpop.f32.mrb[1].mxu0 }
  0xfa   :  { %v288_v56 = vadd.f32 %v287_v54, %v693_v50  ;;  %v177_v57 = vadd.f32 %v176_v55, %v695_v51  ;;  %v289_v58 = vpop.f32.mrb[1].mxu1 }
  0xfb   :  { %334 = vst [vmem:[%s830_s3] sm:$0xff] %v175_v53  ;;  %v290_v59 = vadd.f32 %v289_v58, %v697_v52 }
  0xfc   :  { %336 = vst [vmem:[%s830_s3 + $0x10] sm:$0xff] %v288_v56  ;;  %335 = vst [vmem:[%s830_s3 + $0x8] sm:$0xff] %v177_v57  ;;  %v180_v60 = vpop.f32.mrb[2].mxu0 }
  0xfd   :  { %337 = vst [vmem:[%s830_s3 + $0x18] sm:$0xff] %v290_v59  ;;  %v181_v61 = vadd.f32 %v180_v60, %v691_v49  ;;  %v293_v62 = vpop.f32.mrb[2].mxu1  ;;  %v182_v63 = vpop.f32.mrb[3].mxu0 }
  0xfe   :  { %v294_v0 = vadd.f32 %v293_v62, %v693_v50  ;;  %v183_v1 = vadd.f32 %v182_v63, %v695_v51  ;;  %v295_v2 = vpop.f32.mrb[3].mxu1 }
  0xff   :  { %338 = vst [vmem:[%s830_s3 + $0x20] sm:$0xff] %v181_v61  ;;  %v296_v4 = vadd.f32 %v295_v2, %v697_v52 }
 0x100   :  { %340 = vst [vmem:[%s830_s3 + $0x30] sm:$0xff] %v294_v0  ;;  %339 = vst [vmem:[%s830_s3 + $0x28] sm:$0xff] %v183_v1  ;;  %v186_v5 = vpop.f32.mrb[4].mxu0 }
 0x101   :  { %341 = vst [vmem:[%s830_s3 + $0x38] sm:$0xff] %v296_v4  ;;  %v187_v6 = vadd.f32 %v186_v5, %v691_v49  ;;  %v299_v7 = vpop.f32.mrb[4].mxu1  ;;  %v188_v8 = vpop.f32.mrb[5].mxu0 }
 0x102   :  { %v300_v9 = vadd.f32 %v299_v7, %v693_v50  ;;  %v189_v10 = vadd.f32 %v188_v8, %v695_v51  ;;  %v301_v11 = vpop.f32.mrb[5].mxu1 }
 0x103   :  { %342 = vst [vmem:[%s830_s3 + $0x40] sm:$0xff] %v187_v6  ;;  %v302_v12 = vadd.f32 %v301_v11, %v697_v52 }
 0x104   :  { %344 = vst [vmem:[%s830_s3 + $0x50] sm:$0xff] %v300_v9  ;;  %343 = vst [vmem:[%s830_s3 + $0x48] sm:$0xff] %v189_v10  ;;  %v192_v13 = vpop.f32.mrb[6].mxu0 }
 0x105   :  { %345 = vst [vmem:[%s830_s3 + $0x58] sm:$0xff] %v302_v12  ;;  %v193_v14 = vadd.f32 %v192_v13, %v691_v49  ;;  %v305_v15 = vpop.f32.mrb[6].mxu1  ;;  %v194_v16 = vpop.f32.mrb[7].mxu0 }
 0x106   :  { %v306_v17 = vadd.f32 %v305_v15, %v693_v50  ;;  %v195_v18 = vadd.f32 %v194_v16, %v695_v51  ;;  %v307_v19 = vpop.f32.mrb[7].mxu1 }
 0x107   :  { %346 = vst [vmem:[%s830_s3 + $0x60] sm:$0xff] %v193_v14  ;;  %v308_v20 = vadd.f32 %v307_v19, %v697_v52 }
 0x108   :  { %348 = vst [vmem:[%s830_s3 + $0x70] sm:$0xff] %v306_v17  ;;  %347 = vst [vmem:[%s830_s3 + $0x68] sm:$0xff] %v195_v18  ;;  %v198_v21 = vpop.f32.mrb[8].mxu0 }
 0x109   :  { %349 = vst [vmem:[%s830_s3 + $0x78] sm:$0xff] %v308_v20  ;;  %v199_v22 = vadd.f32 %v198_v21, %v691_v49  ;;  %v311_v23 = vpop.f32.mrb[8].mxu1  ;;  %v200_v24 = vpop.f32.mrb[9].mxu0 }
 0x10a   :  { %v312_v25 = vadd.f32 %v311_v23, %v693_v50  ;;  %v201_v26 = vadd.f32 %v200_v24, %v695_v51  ;;  %v313_v27 = vpop.f32.mrb[9].mxu1 }
 0x10b   :  { %350 = vst [vmem:[%s830_s3 + $0x80] sm:$0xff] %v199_v22  ;;  %v314_v28 = vadd.f32 %v313_v27, %v697_v52 }
 0x10c   :  { %352 = vst [vmem:[%s830_s3 + $0x90] sm:$0xff] %v312_v25  ;;  %351 = vst [vmem:[%s830_s3 + $0x88] sm:$0xff] %v201_v26  ;;  %v204_v29 = vpop.f32.mrb[10].mxu0 }
 0x10d   :  { %353 = vst [vmem:[%s830_s3 + $0x98] sm:$0xff] %v314_v28  ;;  %v205_v30 = vadd.f32 %v204_v29, %v691_v49  ;;  %v317_v31 = vpop.f32.mrb[10].mxu1  ;;  %v206_v32 = vpop.f32.mrb[11].mxu0 }
 0x10e   :  { %v318_v33 = vadd.f32 %v317_v31, %v693_v50  ;;  %v207_v34 = vadd.f32 %v206_v32, %v695_v51  ;;  %v319_v35 = vpop.f32.mrb[11].mxu1 }
 0x10f   :  { %354 = vst [vmem:[%s830_s3 + $0xa0] sm:$0xff] %v205_v30  ;;  %v320_v36 = vadd.f32 %v319_v35, %v697_v52 }
 0x110   :  { %356 = vst [vmem:[%s830_s3 + $0xb0] sm:$0xff] %v318_v33  ;;  %355 = vst [vmem:[%s830_s3 + $0xa8] sm:$0xff] %v207_v34  ;;  %v210_v37 = vpop.f32.mrb[12].mxu0 }
 0x111   :  { %357 = vst [vmem:[%s830_s3 + $0xb8] sm:$0xff] %v320_v36  ;;  %v211_v38 = vadd.f32 %v210_v37, %v691_v49  ;;  %v323_v39 = vpop.f32.mrb[12].mxu1  ;;  %v212_v40 = vpop.f32.mrb[13].mxu0 }
 0x112   :  { %v324_v41 = vadd.f32 %v323_v39, %v693_v50  ;;  %v213_v42 = vadd.f32 %v212_v40, %v695_v51  ;;  %v325_v43 = vpop.f32.mrb[13].mxu1 }
 0x113   :  { %358 = vst [vmem:[%s830_s3 + $0xc0] sm:$0xff] %v211_v38  ;;  %v326_v44 = vadd.f32 %v325_v43, %v697_v52 }
 0x114   :  { %360 = vst [vmem:[%s830_s3 + $0xd0] sm:$0xff] %v324_v41  ;;  %359 = vst [vmem:[%s830_s3 + $0xc8] sm:$0xff] %v213_v42  ;;  %v216_v45 = vpop.f32.mrb[14].mxu0 }
 0x115   :  { %361 = vst [vmem:[%s830_s3 + $0xd8] sm:$0xff] %v326_v44  ;;  %v217_v46 = vadd.f32 %v216_v45, %v691_v49  ;;  %v329_v47 = vpop.f32.mrb[14].mxu1  ;;  %v218_v48 = vpop.f32.mrb[15].mxu0 }
 0x116   :  { %v330_v3 = vadd.f32 %v329_v47, %v693_v50  ;;  %v219_v53 = vadd.f32 %v218_v48, %v695_v51  ;;  %v331_v54 = vpop.f32.mrb[15].mxu1 }
 0x117   :  { %362 = vst [vmem:[%s830_s3 + $0xe0] sm:$0xff] %v217_v46  ;;  %v332_v55 = vadd.f32 %v331_v54, %v697_v52 }
 0x118   :  { %364 = vst [vmem:[%s830_s3 + $0xf0] sm:$0xff] %v330_v3  ;;  %363 = vst [vmem:[%s830_s3 + $0xe8] sm:$0xff] %v219_v53 }
 0x119   :  { %365 = vst [vmem:[%s830_s3 + $0xf8] sm:$0xff] %v332_v55 }

// kernel: lstm_model_forward.4
= control target key start
LH: loop header
LB: loop body
LE: loop exit
PB: predicated region body
PF: predicated region fallthrough
CT: control target
= control target key end

     0   :  { %8 = vsyncpa [#allocation3], 0  ;;  %s740_s0 = inlined_call_operand.vmem [shape: f32[64,128], index: 0, kind: input, shape index: {}]   ;;  %s741_s1 = inlined_call_operand.hbm [shape: f32[128,512], index: 1, kind: input, shape index: {}]   ;;  %s742_s2 = inlined_call_operand.hbm [shape: f32[1,512], index: 2, kind: input, shape index: {}]   ;;  %s743_s3 = inlined_call_operand.vmem [shape: f32[64,512], index: 3, kind: output, shape index: {}]  }
   0x1   :  { %9 = vsyncpa [#allocation5], 0  ;;  %s515_s12 = smov [#allocation2]   ;;  %s467_s16 = scalar_lea.hbm %s741_s1, 8192 }
   0x2   :  { %s17_s13 = sshll.u32 %s515_s12, 4  ;;  %p468_p0 = scmp.ne.s32.totalorder %s741_s1, %s467_s16  ;;  %s18_s13 = int_to_ptr.vmem [resolvable:$true] %s17_s13 }
   0x3   :  { %p471_p1 = scmp.lt.u32.totalorder %s467_s16, %s741_s1 }
   0x5   :  { %p473_p2 = pnand %p471_p1, %p468_p0 }
   0x7   :  { %476 = shalt.err (!%p473_p2)
}
   0x8   :  { %s477_s21 = scalar_lea.vmem %s18_s13, 8192  ;;  %p482_p4 = scmp.lt.s32.totalorder %s18_s13, %s18_s13 }
   0x9   :  { %p478_p3 = scmp.ne.s32.totalorder %s18_s13, %s477_s21  ;;  %p483_p5 = scmp.lt.s32.totalorder %s477_s21, %s477_s21 }
   0xb   :  { %p484_p6 = por %p483_p5, %p482_p4 }
   0xd   :  { %p485_p7 = pnand %p484_p6, %p478_p3 }
   0xf   :  { %488 = shalt.err (!%p485_p7)
}
  0x10   :  { %s516_s22 = smov 512   ;;  %s517_s23 = smov 32  }
  0x11   :  { %23 = dma.hbm_to_vmem [thread:$0]  %s741_s1, 8192, %s18_s13, [#allocation3], %s516_s22, %s516_s22, %s517_s23  }
  0x12   :  { %s518_s26 = smov [#allocation4]   ;;  %s489_s30 = scalar_lea.hbm %s742_s2, 64 }
  0x13   :  { %s30_s27 = sshll.u32 %s518_s26, 4  ;;  %p490_p8 = scmp.ne.s32.totalorder %s742_s2, %s489_s30  ;;  %s31_s27 = int_to_ptr.vmem [resolvable:$true] %s30_s27 }
  0x14   :  { %p493_p9 = scmp.lt.u32.totalorder %s489_s30, %s742_s2 }
  0x16   :  { %p495_p10 = pnand %p493_p9, %p490_p8 }
  0x18   :  { %498 = shalt.err (!%p495_p10)
}
  0x19   :  { %s499_s8 = scalar_lea.vmem %s31_s27, 64  ;;  %p504_p12 = scmp.lt.s32.totalorder %s31_s27, %s31_s27 }
  0x1a   :  { %p500_p11 = scmp.ne.s32.totalorder %s31_s27, %s499_s8  ;;  %p505_p13 = scmp.lt.s32.totalorder %s499_s8, %s499_s8 }
  0x1c   :  { %p506_p0 = por %p505_p13, %p504_p12 }
  0x1e   :  { %p507_p1 = pnand %p506_p0, %p500_p11 }
  0x20   :  { %510 = shalt.err (!%p507_p1)
}
  0x21   :  { %33 = dma.hbm_to_vmem [thread:$0]  %s742_s2, 64, %s31_s27, [#allocation5]  }
  0x22   :  { %511 = dma.done.wait [#allocation3], 8192  }
  0x23   :  { %512 = vsyncadd [#allocation3], 4294959104 }
  0x24   :  { %513 = dma.done.wait [#allocation5], 64  }
  0x25   :  { %514 = vsyncadd [#allocation5], 4294967232  ;;  %v519_v0 = vmov 0.0   ;;  %v49_v1 = vld [vmem:[#allocation2 + $0x8] sm:$0xff]  ;;  %v51_v3 = vld [vmem:[#allocation2 + $0x18] sm:$0xff] }
  0x26   :  { %198 = vmatprep.mubr.f32.mxu0 %v519_v0  ;;  %311 = vmatprep.mubr.f32.mxu1 %v519_v0  ;;  %v53_v2 = vld [vmem:[#allocation2 + $0x28] sm:$0xff]  ;;  %v55_v5 = vld [vmem:[#allocation2 + $0x38] sm:$0xff]  ;;  %v48_v6 = vld [vmem:[#allocation2] sm:$0xff] }
  0x27   :  { %v398_v4 = vpack.c.bf16 %v53_v2, %v49_v1  ;;  %v52_v7 = vld [vmem:[#allocation2 + $0x20] sm:$0xff]  ;;  %v430_v8 = vpack.c.bf16 %v55_v5, %v51_v3  ;;  %v50_v10 = vld [vmem:[#allocation2 + $0x10] sm:$0xff]  ;;  %v57_v12 = vld [vmem:[#allocation2 + $0x48] sm:$0xff] }
  0x28   :  { %v400_v9 = vpack.c.bf16 %v52_v7, %v48_v6  ;;  %v54_v11 = vld [vmem:[#allocation2 + $0x30] sm:$0xff]  ;;  %v61_v14 = vld [vmem:[#allocation2 + $0x68] sm:$0xff]  ;;  %v59_v15 = vld [vmem:[#allocation2 + $0x58] sm:$0xff] }
  0x29   :  { %399 = vmatprep.subr.bf16.mxu0 %v398_v4  ;;  %v432_v13 = vpack.c.bf16 %v54_v11, %v50_v10  ;;  %v63_v16 = vld [vmem:[#allocation2 + $0x78] sm:$0xff]  ;;  %431 = vmatprep.subr.bf16.mxu1 %v430_v8  ;;  %v402_v17 = vpack.c.bf16 %v61_v14, %v57_v12  ;;  %v56_v19 = vld [vmem:[#allocation2 + $0x40] sm:$0xff]  ;;  %v58_v21 = vld [vmem:[#allocation2 + $0x50] sm:$0xff] }
  0x2a   :  { %401 = vmatpush1.bf16.msra.mxu0 %v400_v9  ;;  %v434_v18 = vpack.c.bf16 %v63_v16, %v59_v15  ;;  %v60_v20 = vld [vmem:[#allocation2 + $0x60] sm:$0xff]  ;;  %v62_v23 = vld [vmem:[#allocation2 + $0x70] sm:$0xff]  ;;  %v65_v24 = vld [vmem:[#allocation2 + $0x88] sm:$0xff] }
  0x2b   :  { %433 = vmatpush1.bf16.msra.mxu1 %v432_v13  ;;  %v404_v22 = vpack.c.bf16 %v60_v20, %v56_v19  ;;  %v69_v25 = vld [vmem:[#allocation2 + $0xa8] sm:$0xff]  ;;  %403 = vmatprep.subr.bf16.mxu0 %v402_v17  ;;  %v436_v26 = vpack.c.bf16 %v62_v23, %v58_v21  ;;  %v67_v28 = vld [vmem:[#allocation2 + $0x98] sm:$0xff]  ;;  %v64_v30 = vld [vmem:[#allocation2 + $0x80] sm:$0xff] }
  0x2c   :  { %435 = vmatprep.subr.bf16.mxu1 %v434_v18  ;;  %v406_v27 = vpack.c.bf16 %v69_v25, %v65_v24  ;;  %v71_v29 = vld [vmem:[#allocation2 + $0xb8] sm:$0xff]  ;;  %v68_v32 = vld [vmem:[#allocation2 + $0xa0] sm:$0xff]  ;;  %v66_v33 = vld [vmem:[#allocation2 + $0x90] sm:$0xff] }
  0x2d   :  { %v438_v31 = vpack.c.bf16 %v71_v29, %v67_v28  ;;  %v70_v34 = vld [vmem:[#allocation2 + $0xb0] sm:$0xff]  ;;  %v408_v35 = vpack.c.bf16 %v68_v32, %v64_v30  ;;  %v73_v36 = vld [vmem:[#allocation2 + $0xc8] sm:$0xff]  ;;  %v75_v38 = vld [vmem:[#allocation2 + $0xd8] sm:$0xff] }
  0x2e   :  { %405 = vmatpush1.bf16.msra.mxu0 %v404_v22  ;;  %v77_v37 = vld [vmem:[#allocation2 + $0xe8] sm:$0xff]  ;;  %v440_v39 = vpack.c.bf16 %v70_v34, %v66_v33  ;;  %v79_v41 = vld [vmem:[#allocation2 + $0xf8] sm:$0xff]  ;;  %v72_v42 = vld [vmem:[#allocation2 + $0xc0] sm:$0xff] }
  0x2f   :  { %437 = vmatpush1.bf16.msra.mxu1 %v436_v26  ;;  %407 = vmatprep.subr.bf16.mxu0 %v406_v27  ;;  %v410_v40 = vpack.c.bf16 %v77_v37, %v73_v36  ;;  %v76_v43 = vld [vmem:[#allocation2 + $0xe0] sm:$0xff]  ;;  %v442_v44 = vpack.c.bf16 %v79_v41, %v75_v38  ;;  %v74_v45 = vld [vmem:[#allocation2 + $0xd0] sm:$0xff]  ;;  %v81_v47 = vld [vmem:[#allocation2 + $0x108] sm:$0xff] }
  0x30   :  { %439 = vmatprep.subr.bf16.mxu1 %v438_v31  ;;  %v78_v46 = vld [vmem:[#allocation2 + $0xf0] sm:$0xff]  ;;  %v85_v48 = vld [vmem:[#allocation2 + $0x128] sm:$0xff]  ;;  %v83_v49 = vld [vmem:[#allocation2 + $0x118] sm:$0xff]  ;;  %v412_v51 = vpack.c.bf16 %v76_v43, %v72_v42  ;;  %v114_v42 = vlaneseq }
  0x31   :  { %v87_v50 = vld [vmem:[#allocation2 + $0x138] sm:$0xff]  ;;  %v444_v52 = vpack.c.bf16 %v78_v46, %v74_v45  ;;  %v414_v53 = vpack.c.bf16 %v85_v48, %v81_v47  ;;  %v80_v54 = vld [vmem:[#allocation2 + $0x100] sm:$0xff]  ;;  %v82_v56 = vld [vmem:[#allocation2 + $0x110] sm:$0xff] }
  0x32   :  { %409 = vmatpush1.bf16.msra.mxu0 %v408_v35  ;;  %v84_v55 = vld [vmem:[#allocation2 + $0x120] sm:$0xff]  ;;  %v446_v57 = vpack.c.bf16 %v87_v50, %v83_v49  ;;  %v86_v58 = vld [vmem:[#allocation2 + $0x130] sm:$0xff]  ;;  %v89_v59 = vld [vmem:[#allocation2 + $0x148] sm:$0xff]  ;;  %v115_v43 = vshrl.u32 %v114_v42, 7 }
  0x33   :  { %441 = vmatpush1.bf16.msra.mxu1 %v440_v39  ;;  %411 = vmatprep.subr.bf16.mxu0 %v410_v40  ;;  %v93_v60 = vld [vmem:[#allocation2 + $0x168] sm:$0xff]  ;;  %v91_v61 = vld [vmem:[#allocation2 + $0x158] sm:$0xff]  ;;  %v416_v63 = vpack.c.bf16 %v84_v55, %v80_v54  ;;  %v448_v1 = vpack.c.bf16 %v86_v58, %v82_v56  ;;  %v88_v3 = vld [vmem:[#allocation2 + $0x140] sm:$0xff] }
  0x34   :  { %443 = vmatprep.subr.bf16.mxu1 %v442_v44  ;;  %v95_v62 = vld [vmem:[#allocation2 + $0x178] sm:$0xff]  ;;  %v418_v2 = vpack.c.bf16 %v93_v60, %v89_v59  ;;  %v92_v4 = vld [vmem:[#allocation2 + $0x160] sm:$0xff]  ;;  %v90_v5 = vld [vmem:[#allocation2 + $0x150] sm:$0xff]  ;;  %v116_v44 = vsub.s32 0, %v115_v43  ;;  %v124_v46 = vsub.s32 2, %v115_v43  ;;  %v120_v47 = vsub.s32 1, %v115_v43 }
  0x35   :  { %v450_v6 = vpack.c.bf16 %v95_v62, %v91_v61  ;;  %v94_v7 = vld [vmem:[#allocation2 + $0x170] sm:$0xff]  ;;  %v97_v8 = vld [vmem:[#allocation2 + $0x188] sm:$0xff]  ;;  %v99_v10 = vld [vmem:[#allocation2 + $0x198] sm:$0xff]  ;;  %v420_v12 = vpack.c.bf16 %v92_v4, %v88_v3  ;;  %v128_v48 = vsub.s32 3, %v115_v43 }
  0x36   :  { %413 = vmatpush1.bf16.msra.mxu0 %v412_v51  ;;  %v101_v9 = vld [vmem:[#allocation2 + $0x1a8] sm:$0xff]  ;;  %v103_v11 = vld [vmem:[#allocation2 + $0x1b8] sm:$0xff]  ;;  %v452_v13 = vpack.c.bf16 %v94_v7, %v90_v5  ;;  %v96_v15 = vld [vmem:[#allocation2 + $0x180] sm:$0xff] }
  0x37   :  { %445 = vmatpush1.bf16.msra.mxu1 %v444_v52  ;;  %415 = vmatprep.subr.bf16.mxu0 %v414_v53  ;;  %v422_v14 = vpack.c.bf16 %v101_v9, %v97_v8  ;;  %v100_v16 = vld [vmem:[#allocation2 + $0x1a0] sm:$0xff]  ;;  %v98_v17 = vld [vmem:[#allocation2 + $0x190] sm:$0xff]  ;;  %v454_v18 = vpack.c.bf16 %v103_v11, %v99_v10  ;;  %v105_v20 = vld [vmem:[#allocation2 + $0x1c8] sm:$0xff] }
  0x38   :  { %447 = vmatprep.subr.bf16.mxu1 %v446_v57  ;;  %v102_v19 = vld [vmem:[#allocation2 + $0x1b0] sm:$0xff]  ;;  %v109_v21 = vld [vmem:[#allocation2 + $0x1e8] sm:$0xff]  ;;  %v107_v22 = vld [vmem:[#allocation2 + $0x1d8] sm:$0xff]  ;;  %v424_v24 = vpack.c.bf16 %v100_v16, %v96_v15 }
  0x39   :  { %v111_v23 = vld [vmem:[#allocation2 + $0x1f8] sm:$0xff]  ;;  %v456_v25 = vpack.c.bf16 %v102_v19, %v98_v17  ;;  %v426_v26 = vpack.c.bf16 %v109_v21, %v105_v20  ;;  %v104_v27 = vld [vmem:[#allocation2 + $0x1c0] sm:$0xff]  ;;  %v106_v30 = vld [vmem:[#allocation2 + $0x1d0] sm:$0xff] }
  0x3a   :  { %417 = vmatpush1.bf16.msra.mxu0 %v416_v63  ;;  %v108_v28 = vld [vmem:[#allocation2 + $0x1e0] sm:$0xff]  ;;  %v458_v29 = vpack.c.bf16 %v111_v23, %v107_v22  ;;  %v110_v31 = vld [vmem:[#allocation2 + $0x1f0] sm:$0xff]  ;;  %v41_v35 = vld [vmem:[%s740_s0 + $0x8] sm:$0xff] }
  0x3b   :  { %449 = vmatpush1.bf16.msra.mxu1 %v448_v1  ;;  %419 = vmatprep.subr.bf16.mxu0 %v418_v2  ;;  %v428_v32 = vpack.c.bf16 %v108_v28, %v104_v27  ;;  %v460_v33 = vpack.c.bf16 %v110_v31, %v106_v30  ;;  %v40_v34 = vld [vmem:[%s740_s0] sm:$0xff]  ;;  %v42_v36 = vld [vmem:[%s740_s0 + $0x10] sm:$0xff]  ;;  %v43_v37 = vld [vmem:[%s740_s0 + $0x18] sm:$0xff] }
  0x3c   :  { %451 = vmatprep.subr.bf16.mxu1 %v450_v6  ;;  %v44_v38 = vld [vmem:[%s740_s0 + $0x20] sm:$0xff]  ;;  %v45_v39 = vld [vmem:[%s740_s0 + $0x28] sm:$0xff]  ;;  %v46_v40 = vld [vmem:[%s740_s0 + $0x30] sm:$0xff] }
  0x3d   :  { %v47_v41 = vld [vmem:[%s740_s0 + $0x38] sm:$0xff]  ;;  %v112_v45 = vld [vmem:[#allocation4] sm:$0xf] }
  0x3e   :  { %421 = vmatpush1.bf16.msra.mxu0 %v420_v12  ;;  %v604_v49 = vrot.slane %v112_v45, %v116_v44  ;;  %v606_v50 = vrot.slane %v112_v45, %v124_v46  ;;  %v608_v51 = vrot.slane %v112_v45, %v120_v47  ;;  %v610_v52 = vrot.slane %v112_v45, %v128_v48 }
  0x3f   :  { %453 = vmatpush1.bf16.msra.mxu1 %v452_v13  ;;  %423 = vmatprep.subr.bf16.mxu0 %v422_v14 }
  0x40   :  { %455 = vmatprep.subr.bf16.mxu1 %v454_v18 }
  0x42   :  { %425 = vmatpush1.bf16.msra.mxu0 %v424_v24 }
  0x43   :  { %457 = vmatpush1.bf16.msra.mxu1 %v456_v25  ;;  %427 = vmatprep.subr.bf16.mxu0 %v426_v26 }
  0x44   :  { %459 = vmatprep.subr.bf16.mxu1 %v458_v29 }
  0x46   :  { %429 = vmatpush1.bf16.msra.mxu0 %v428_v32 }
  0x47   :  { %461 = vmatpush1.bf16.msra.mxu1 %v460_v33 }
  0x49   :  { %199 = vmatmul.mubr.f32.vlgmr.msra.gmra.mrb[0].mxu0 %v40_v34 }
  0x4a   :  { %312 = vmatmul.mubr.f32.vlgmr.msra.gmra.mrb[0].mxu1 %v40_v34  ;;  %204 = vmatprep.mubr.f32.mxu0 %v519_v0 }
  0x4b   :  { %317 = vmatprep.mubr.f32.mxu1 %v519_v0 }
  0x4d   :  { %205 = vmatmul.mubr.f32.gmra.mrb[2].mxu0 %v41_v35 }
  0x4e   :  { %318 = vmatmul.mubr.f32.gmra.mrb[2].mxu1 %v41_v35  ;;  %210 = vmatprep.mubr.f32.mxu0 %v519_v0 }
  0x4f   :  { %323 = vmatprep.mubr.f32.mxu1 %v519_v0 }
  0x51   :  { %211 = vmatmul.mubr.f32.gmra.mrb[4].mxu0 %v42_v36 }
  0x52   :  { %324 = vmatmul.mubr.f32.gmra.mrb[4].mxu1 %v42_v36  ;;  %216 = vmatprep.mubr.f32.mxu0 %v519_v0 }
  0x53   :  { %329 = vmatprep.mubr.f32.mxu1 %v519_v0 }
  0x55   :  { %217 = vmatmul.mubr.f32.gmra.mrb[6].mxu0 %v43_v37 }
  0x56   :  { %330 = vmatmul.mubr.f32.gmra.mrb[6].mxu1 %v43_v37  ;;  %222 = vmatprep.mubr.f32.mxu0 %v519_v0 }
  0x57   :  { %335 = vmatprep.mubr.f32.mxu1 %v519_v0 }
  0x59   :  { %223 = vmatmul.mubr.f32.gmra.mrb[8].mxu0 %v44_v38 }
  0x5a   :  { %336 = vmatmul.mubr.f32.gmra.mrb[8].mxu1 %v44_v38  ;;  %228 = vmatprep.mubr.f32.mxu0 %v519_v0 }
  0x5b   :  { %341 = vmatprep.mubr.f32.mxu1 %v519_v0 }
  0x5d   :  { %229 = vmatmul.mubr.f32.gmra.mrb[10].mxu0 %v45_v39 }
  0x5e   :  { %342 = vmatmul.mubr.f32.gmra.mrb[10].mxu1 %v45_v39  ;;  %234 = vmatprep.mubr.f32.mxu0 %v519_v0 }
  0x5f   :  { %347 = vmatprep.mubr.f32.mxu1 %v519_v0 }
  0x61   :  { %235 = vmatmul.mubr.f32.gmra.mrb[12].mxu0 %v46_v40 }
  0x62   :  { %348 = vmatmul.mubr.f32.gmra.mrb[12].mxu1 %v46_v40  ;;  %240 = vmatprep.mubr.f32.mxu0 %v519_v0 }
  0x63   :  { %353 = vmatprep.mubr.f32.mxu1 %v519_v0 }
  0x65   :  { %241 = vmatmul.mubr.f32.gmra.mrb[14].mxu0 %v47_v41 }
  0x66   :  { %354 = vmatmul.mubr.f32.gmra.mrb[14].mxu1 %v47_v41 }
 0x11c   :  { %v200_v53 = vpop.f32.mrb[0].mxu0 }
 0x11d   :  { %v201_v0 = vadd.f32 %v200_v53, %v604_v49  ;;  %v313_v54 = vpop.f32.mrb[0].mxu1  ;;  %v202_v55 = vpop.f32.mrb[1].mxu0 }
 0x11e   :  { %v314_v56 = vadd.f32 %v313_v54, %v606_v50  ;;  %v203_v57 = vadd.f32 %v202_v55, %v608_v51  ;;  %v315_v58 = vpop.f32.mrb[1].mxu1 }
 0x11f   :  { %360 = vst [vmem:[%s743_s3] sm:$0xff] %v201_v0  ;;  %v316_v59 = vadd.f32 %v315_v58, %v610_v52 }
 0x120   :  { %362 = vst [vmem:[%s743_s3 + $0x10] sm:$0xff] %v314_v56  ;;  %361 = vst [vmem:[%s743_s3 + $0x8] sm:$0xff] %v203_v57  ;;  %v206_v60 = vpop.f32.mrb[2].mxu0 }
 0x121   :  { %363 = vst [vmem:[%s743_s3 + $0x18] sm:$0xff] %v316_v59  ;;  %v207_v61 = vadd.f32 %v206_v60, %v604_v49  ;;  %v319_v62 = vpop.f32.mrb[2].mxu1  ;;  %v208_v63 = vpop.f32.mrb[3].mxu0 }
 0x122   :  { %v320_v1 = vadd.f32 %v319_v62, %v606_v50  ;;  %v209_v2 = vadd.f32 %v208_v63, %v608_v51  ;;  %v321_v3 = vpop.f32.mrb[3].mxu1 }
 0x123   :  { %364 = vst [vmem:[%s743_s3 + $0x20] sm:$0xff] %v207_v61  ;;  %v322_v4 = vadd.f32 %v321_v3, %v610_v52 }
 0x124   :  { %366 = vst [vmem:[%s743_s3 + $0x30] sm:$0xff] %v320_v1  ;;  %365 = vst [vmem:[%s743_s3 + $0x28] sm:$0xff] %v209_v2  ;;  %v212_v5 = vpop.f32.mrb[4].mxu0 }
 0x125   :  { %367 = vst [vmem:[%s743_s3 + $0x38] sm:$0xff] %v322_v4  ;;  %v213_v6 = vadd.f32 %v212_v5, %v604_v49  ;;  %v325_v7 = vpop.f32.mrb[4].mxu1  ;;  %v214_v8 = vpop.f32.mrb[5].mxu0 }
 0x126   :  { %v326_v9 = vadd.f32 %v325_v7, %v606_v50  ;;  %v215_v10 = vadd.f32 %v214_v8, %v608_v51  ;;  %v327_v11 = vpop.f32.mrb[5].mxu1 }
 0x127   :  { %368 = vst [vmem:[%s743_s3 + $0x40] sm:$0xff] %v213_v6  ;;  %v328_v12 = vadd.f32 %v327_v11, %v610_v52 }
 0x128   :  { %370 = vst [vmem:[%s743_s3 + $0x50] sm:$0xff] %v326_v9  ;;  %369 = vst [vmem:[%s743_s3 + $0x48] sm:$0xff] %v215_v10  ;;  %v218_v13 = vpop.f32.mrb[6].mxu0 }
 0x129   :  { %371 = vst [vmem:[%s743_s3 + $0x58] sm:$0xff] %v328_v12  ;;  %v219_v14 = vadd.f32 %v218_v13, %v604_v49  ;;  %v331_v15 = vpop.f32.mrb[6].mxu1  ;;  %v220_v16 = vpop.f32.mrb[7].mxu0 }
 0x12a   :  { %v332_v17 = vadd.f32 %v331_v15, %v606_v50  ;;  %v221_v18 = vadd.f32 %v220_v16, %v608_v51  ;;  %v333_v19 = vpop.f32.mrb[7].mxu1 }
 0x12b   :  { %372 = vst [vmem:[%s743_s3 + $0x60] sm:$0xff] %v219_v14  ;;  %v334_v20 = vadd.f32 %v333_v19, %v610_v52 }
 0x12c   :  { %374 = vst [vmem:[%s743_s3 + $0x70] sm:$0xff] %v332_v17  ;;  %373 = vst [vmem:[%s743_s3 + $0x68] sm:$0xff] %v221_v18  ;;  %v224_v21 = vpop.f32.mrb[8].mxu0 }
 0x12d   :  { %375 = vst [vmem:[%s743_s3 + $0x78] sm:$0xff] %v334_v20  ;;  %v225_v22 = vadd.f32 %v224_v21, %v604_v49  ;;  %v337_v23 = vpop.f32.mrb[8].mxu1  ;;  %v226_v24 = vpop.f32.mrb[9].mxu0 }
 0x12e   :  { %v338_v25 = vadd.f32 %v337_v23, %v606_v50  ;;  %v227_v26 = vadd.f32 %v226_v24, %v608_v51  ;;  %v339_v27 = vpop.f32.mrb[9].mxu1 }
 0x12f   :  { %376 = vst [vmem:[%s743_s3 + $0x80] sm:$0xff] %v225_v22  ;;  %v340_v28 = vadd.f32 %v339_v27, %v610_v52 }
 0x130   :  { %378 = vst [vmem:[%s743_s3 + $0x90] sm:$0xff] %v338_v25  ;;  %377 = vst [vmem:[%s743_s3 + $0x88] sm:$0xff] %v227_v26  ;;  %v230_v29 = vpop.f32.mrb[10].mxu0 }
 0x131   :  { %379 = vst [vmem:[%s743_s3 + $0x98] sm:$0xff] %v340_v28  ;;  %v231_v30 = vadd.f32 %v230_v29, %v604_v49  ;;  %v343_v31 = vpop.f32.mrb[10].mxu1  ;;  %v232_v32 = vpop.f32.mrb[11].mxu0 }
 0x132   :  { %v344_v33 = vadd.f32 %v343_v31, %v606_v50  ;;  %v233_v34 = vadd.f32 %v232_v32, %v608_v51  ;;  %v345_v35 = vpop.f32.mrb[11].mxu1 }
 0x133   :  { %380 = vst [vmem:[%s743_s3 + $0xa0] sm:$0xff] %v231_v30  ;;  %v346_v36 = vadd.f32 %v345_v35, %v610_v52 }
 0x134   :  { %382 = vst [vmem:[%s743_s3 + $0xb0] sm:$0xff] %v344_v33  ;;  %381 = vst [vmem:[%s743_s3 + $0xa8] sm:$0xff] %v233_v34  ;;  %v236_v37 = vpop.f32.mrb[12].mxu0 }
 0x135   :  { %383 = vst [vmem:[%s743_s3 + $0xb8] sm:$0xff] %v346_v36  ;;  %v237_v38 = vadd.f32 %v236_v37, %v604_v49  ;;  %v349_v39 = vpop.f32.mrb[12].mxu1  ;;  %v238_v40 = vpop.f32.mrb[13].mxu0 }
 0x136   :  { %v350_v41 = vadd.f32 %v349_v39, %v606_v50  ;;  %v239_v42 = vadd.f32 %v238_v40, %v608_v51  ;;  %v351_v43 = vpop.f32.mrb[13].mxu1 }
 0x137   :  { %384 = vst [vmem:[%s743_s3 + $0xc0] sm:$0xff] %v237_v38  ;;  %v352_v44 = vadd.f32 %v351_v43, %v610_v52 }
 0x138   :  { %386 = vst [vmem:[%s743_s3 + $0xd0] sm:$0xff] %v350_v41  ;;  %385 = vst [vmem:[%s743_s3 + $0xc8] sm:$0xff] %v239_v42  ;;  %v242_v45 = vpop.f32.mrb[14].mxu0 }
 0x139   :  { %387 = vst [vmem:[%s743_s3 + $0xd8] sm:$0xff] %v352_v44  ;;  %v243_v46 = vadd.f32 %v242_v45, %v604_v49  ;;  %v355_v47 = vpop.f32.mrb[14].mxu1  ;;  %v244_v48 = vpop.f32.mrb[15].mxu0 }
 0x13a   :  { %v356_v53 = vadd.f32 %v355_v47, %v606_v50  ;;  %v245_v0 = vadd.f32 %v244_v48, %v608_v51  ;;  %v357_v54 = vpop.f32.mrb[15].mxu1 }
 0x13b   :  { %388 = vst [vmem:[%s743_s3 + $0xe0] sm:$0xff] %v243_v46  ;;  %v358_v55 = vadd.f32 %v357_v54, %v610_v52 }
 0x13c   :  { %390 = vst [vmem:[%s743_s3 + $0xf0] sm:$0xff] %v356_v53  ;;  %389 = vst [vmem:[%s743_s3 + $0xe8] sm:$0xff] %v245_v0 }
 0x13d   :  { %391 = vst [vmem:[%s743_s3 + $0xf8] sm:$0xff] %v358_v55 }
 0x13e   :  { %396 = vsyncpa [#allocation3], 1 }
 0x13f   :  { %397 = vsyncpa [#allocation5], 1 }

// kernel: lstm_model_forward.5
= control target key start
LH: loop header
LB: loop body
LE: loop exit
PB: predicated region body
PF: predicated region fallthrough
CT: control target
= control target key end

     0   :  { %s3691_s0 = inlined_call_operand.vmem [shape: f32[8,8,512], index: 0, kind: input, shape index: {}]   ;;  %s3692_s1 = inlined_call_operand.vmem [shape: f32[128,512], index: 1, kind: input, shape index: {}]   ;;  %s3693_s2 = inlined_call_operand.vmem [shape: f32[8,8,128], index: 2, kind: output, shape index: {}]  }
   0x1   :  { %v2885_v0 = vld [vmem:[%s3692_s1] sm:$0xff]  ;;  %v2890_v1 = vld [vmem:[%s3692_s1 + $0x8] sm:$0xff]  ;;  %v2895_v2 = vld [vmem:[%s3692_s1 + $0x10] sm:$0xff] }
   0x2   :  { %v2900_v3 = vld [vmem:[%s3692_s1 + $0x18] sm:$0xff]  ;;  %v53_v4 = vld [vmem:[%s3692_s1 + $0x20] sm:$0xff]  ;;  %v55_v5 = vld [vmem:[%s3692_s1 + $0x28] sm:$0xff] }
   0x3   :  { %v2911_v6 = vld [vmem:[%s3692_s1 + $0x30] sm:$0xff]  ;;  %v2916_v7 = vld [vmem:[%s3692_s1 + $0x38] sm:$0xff]  ;;  %v2921_v8 = vld [vmem:[%s3692_s1 + $0x40] sm:$0xff] }
   0x4   :  { %v63_v9 = vld [vmem:[%s3692_s1 + $0x48] sm:$0xff]  ;;  %v2929_v10 = vld [vmem:[%s3692_s1 + $0x50] sm:$0xff]  ;;  %v2934_v11 = vld [vmem:[%s3692_s1 + $0x58] sm:$0xff] }
   0x5   :  { %v69_v12 = vld [vmem:[%s3692_s1 + $0x60] sm:$0xff]  ;;  %v71_v13 = vld [vmem:[%s3692_s1 + $0x68] sm:$0xff]  ;;  %v2945_v14 = vld [vmem:[%s3692_s1 + $0x70] sm:$0xff] }
   0x6   :  { %v75_v15 = vld [vmem:[%s3692_s1 + $0x78] sm:$0xff]  ;;  %v2953_v16 = vld [vmem:[%s3692_s1 + $0x80] sm:$0xff]  ;;  %v79_v17 = vld [vmem:[%s3692_s1 + $0x88] sm:$0xff] }
   0x7   :  { %v2961_v18 = vld [vmem:[%s3692_s1 + $0x90] sm:$0xff]  ;;  %v2966_v19 = vld [vmem:[%s3692_s1 + $0x98] sm:$0xff]  ;;  %v2971_v20 = vld [vmem:[%s3692_s1 + $0xa0] sm:$0xff] }
   0x8   :  { %v87_v21 = vld [vmem:[%s3692_s1 + $0xa8] sm:$0xff]  ;;  %v2979_v22 = vld [vmem:[%s3692_s1 + $0xb0] sm:$0xff]  ;;  %v91_v23 = vld [vmem:[%s3692_s1 + $0xb8] sm:$0xff] }
   0x9   :  { %v2987_v24 = vld [vmem:[%s3692_s1 + $0xc0] sm:$0xff]  ;;  %v2992_v25 = vld [vmem:[%s3692_s1 + $0xc8] sm:$0xff]  ;;  %v2997_v26 = vld [vmem:[%s3692_s1 + $0xd0] sm:$0xff] }
   0xa   :  { %v3002_v27 = vld [vmem:[%s3692_s1 + $0xd8] sm:$0xff]  ;;  %v3007_v28 = vld [vmem:[%s3692_s1 + $0xe0] sm:$0xff]  ;;  %v103_v29 = vld [vmem:[%s3692_s1 + $0xe8] sm:$0xff] }
   0xb   :  { %v3015_v30 = vld [vmem:[%s3692_s1 + $0xf0] sm:$0xff]  ;;  %v107_v31 = vld [vmem:[%s3692_s1 + $0xf8] sm:$0xff]  ;;  %v3023_v32 = vld [vmem:[%s3692_s1 + $0x100] sm:$0xff] }
   0xc   :  { %v3028_v33 = vld [vmem:[%s3692_s1 + $0x108] sm:$0xff]  ;;  %v3033_v34 = vld [vmem:[%s3692_s1 + $0x110] sm:$0xff]  ;;  %v3038_v35 = vld [vmem:[%s3692_s1 + $0x118] sm:$0xff] }
   0xd   :  { %v3043_v36 = vld [vmem:[%s3692_s1 + $0x120] sm:$0xff]  ;;  %v119_v37 = vld [vmem:[%s3692_s1 + $0x128] sm:$0xff]  ;;  %v3051_v38 = vld [vmem:[%s3692_s1 + $0x130] sm:$0xff] }
   0xe   :  { %v123_v39 = vld [vmem:[%s3692_s1 + $0x138] sm:$0xff]  ;;  %v3059_v40 = vld [vmem:[%s3692_s1 + $0x140] sm:$0xff]  ;;  %v3064_v41 = vld [vmem:[%s3692_s1 + $0x148] sm:$0xff] }
   0xf   :  { %v3069_v42 = vld [vmem:[%s3692_s1 + $0x150] sm:$0xff]  ;;  %v3074_v43 = vld [vmem:[%s3692_s1 + $0x158] sm:$0xff]  ;;  %v3079_v44 = vld [vmem:[%s3692_s1 + $0x160] sm:$0xff] }
  0x10   :  { %v135_v45 = vld [vmem:[%s3692_s1 + $0x168] sm:$0xff]  ;;  %v3087_v46 = vld [vmem:[%s3692_s1 + $0x170] sm:$0xff]  ;;  %v139_v47 = vld [vmem:[%s3692_s1 + $0x178] sm:$0xff] }
  0x11   :  { %v3095_v48 = vld [vmem:[%s3692_s1 + $0x180] sm:$0xff]  ;;  %v3100_v49 = vld [vmem:[%s3692_s1 + $0x188] sm:$0xff]  ;;  %v3105_v50 = vld [vmem:[%s3692_s1 + $0x190] sm:$0xff] }
  0x12   :  { %v3110_v51 = vld [vmem:[%s3692_s1 + $0x198] sm:$0xff]  ;;  %v3115_v52 = vld [vmem:[%s3692_s1 + $0x1a0] sm:$0xff]  ;;  %v151_v53 = vld [vmem:[%s3692_s1 + $0x1a8] sm:$0xff] }
  0x13   :  { %v3123_v54 = vld [vmem:[%s3692_s1 + $0x1b0] sm:$0xff]  ;;  %v155_v55 = vld [vmem:[%s3692_s1 + $0x1b8] sm:$0xff]  ;;  %v3131_v56 = vld [vmem:[%s3692_s1 + $0x1c0] sm:$0xff] }
  0x14   :  { %3694 = vst [vmem:[#allocation8_spill] sm:$0xff] %v3131_v56  ;;  %v3136_v57 = vld [vmem:[%s3692_s1 + $0x1c8] sm:$0xff]  ;;  %v3141_v58 = vld [vmem:[%s3692_s1 + $0x1d0] sm:$0xff]  ;;  %v3146_v59 = vld [vmem:[%s3692_s1 + $0x1d8] sm:$0xff] }
  0x15   :  { %3695 = vst [vmem:[#allocation9_spill] sm:$0xff] %v3141_v58  ;;  %3696 = vst [vmem:[#allocation10_spill] sm:$0xff] %v3146_v59  ;;  %v3151_v60 = vld [vmem:[%s3692_s1 + $0x1e0] sm:$0xff]  ;;  %v167_v61 = vld [vmem:[%s3692_s1 + $0x1e8] sm:$0xff] }
  0x16   :  { %3697 = vst [vmem:[#allocation11_spill] sm:$0xff] %v3151_v60  ;;  %v3159_v62 = vld [vmem:[%s3692_s1 + $0x1f0] sm:$0xff]  ;;  %v171_v63 = vld [vmem:[%s3692_s1 + $0x1f8] sm:$0xff] }
  0x17   :  { %3698 = vst [vmem:[#allocation12_spill] sm:$0xff] %v3159_v62 }
  0x18   :  { %180 = vsyncadd [#allocation5], 8192  ;;  %v3165_v58 = vpack.c.bf16 %v55_v5, %v2890_v1  ;;  %v3168_v56 = vpack.c.bf16 %v53_v4, %v2885_v0  ;;  %v3170_v60 = vpack.c.bf16 %v71_v13, %v63_v9 }
  0x19   :  { %2864 = dma.done.wait [#allocation5], 8192 }
  0x1a   :  { %2865 = vsyncadd [#allocation5], 4294959104  ;;  %2224 = vmatprep.subr.bf16.mxu0 %v3165_v58  ;;  %v3175_v62 = vpack.c.bf16 %v2916_v7, %v2900_v3  ;;  %v3179_v59 = vpack.c.bf16 %v2911_v6, %v2895_v2  ;;  %v3183_v1 = vpack.c.bf16 %v69_v12, %v2921_v8  ;;  %v3186_v0 = vpack.c.bf16 %v75_v15, %v2934_v11 }
  0x1b   :  { %2226 = vmatpush1.bf16.msra.mxu0 %v3168_v56  ;;  %v3189_v4 = vpack.c.bf16 %v87_v21, %v79_v17  ;;  %v3195_v2 = vpack.c.bf16 %v2945_v14, %v2929_v10  ;;  %v3199_v3 = vpack.c.bf16 %v91_v23, %v2966_v19  ;;  %v2866_v5 = vmov 0.0  }
  0x1c   :  { %2228 = vmatprep.subr.bf16.mxu0 %v3170_v60  ;;  %2256 = vmatprep.subr.bf16.mxu1 %v3175_v62  ;;  %v3205_v6 = vpack.c.bf16 %v2971_v20, %v2953_v16  ;;  %v3209_v7 = vpack.c.bf16 %v103_v29, %v2992_v25  ;;  %v3215_v8 = vpack.c.bf16 %v2979_v22, %v2961_v18  ;;  %v3699_v25 = vld [vmem:[#allocation10_spill] sm:$0xff] }
  0x1d   :  { %2258 = vmatpush1.bf16.msra.mxu1 %v3179_v59  ;;  %320 = vmatprep.mubr.f32.mxu0 %v2866_v5  ;;  %v3219_v9 = vpack.c.bf16 %v107_v31, %v3002_v27  ;;  %v3224_v10 = vpack.c.bf16 %v3007_v28, %v2987_v24  ;;  %v3228_v11 = vpack.c.bf16 %v119_v37, %v3028_v33  ;;  %v3700_v27 = vld [vmem:[#allocation8_spill] sm:$0xff]  ;;  %v3701_v28 = vld [vmem:[#allocation11_spill] sm:$0xff] }
  0x1e   :  { %2260 = vmatprep.subr.bf16.mxu1 %v3186_v0  ;;  %391 = vmatprep.mubr.f32.mxu1 %v2866_v5  ;;  %v3233_v12 = vpack.c.bf16 %v3015_v30, %v2997_v26  ;;  %v3237_v13 = vpack.c.bf16 %v123_v39, %v3038_v35  ;;  %v3242_v14 = vpack.c.bf16 %v3043_v36, %v3023_v32  ;;  %v3702_v30 = vld [vmem:[#allocation9_spill] sm:$0xff]  ;;  %v3703_v31 = vld [vmem:[#allocation12_spill] sm:$0xff] }
  0x1f   :  { %2230 = vmatpush1.bf16.msra.mxu0 %v3183_v1  ;;  %v3246_v15 = vpack.c.bf16 %v135_v45, %v3064_v41  ;;  %v3251_v16 = vpack.c.bf16 %v3051_v38, %v3033_v34  ;;  %v3255_v17 = vpack.c.bf16 %v139_v47, %v3074_v43  ;;  %v3260_v18 = vpack.c.bf16 %v3079_v44, %v3059_v40  ;;  %v187_v33 = vld [vmem:[%s3691_s0] sm:$0xff]  ;;  %v188_v34 = vld [vmem:[%s3691_s0 + $0x8] sm:$0xff]  ;;  %v190_v43 = vld [vmem:[%s3691_s0 + $0x18] sm:$0xff] }
  0x20   :  { %2232 = vmatprep.subr.bf16.mxu0 %v3189_v4  ;;  %v3264_v19 = vpack.c.bf16 %v151_v53, %v3100_v49  ;;  %v3269_v20 = vpack.c.bf16 %v3087_v46, %v3069_v42  ;;  %v3273_v21 = vpack.c.bf16 %v155_v55, %v3110_v51  ;;  %v3278_v22 = vpack.c.bf16 %v3115_v52, %v3095_v48  ;;  %v189_v45 = vld [vmem:[%s3691_s0 + $0x10] sm:$0xff] }
  0x21   :  { %2262 = vmatpush1.bf16.msra.mxu1 %v3195_v2  ;;  %v3282_v23 = vpack.c.bf16 %v167_v61, %v3136_v57  ;;  %v3287_v24 = vpack.c.bf16 %v3123_v54, %v3105_v50  ;;  %v3291_v26 = vpack.c.bf16 %v171_v63, %v3699_v25  ;;  %v3296_v29 = vpack.c.bf16 %v3701_v28, %v3700_v27 }
  0x22   :  { %2264 = vmatprep.subr.bf16.mxu1 %v3199_v3  ;;  %v3302_v32 = vpack.c.bf16 %v3703_v31, %v3702_v30  ;;  %v2166_v31 = vld [vmem:[%s3691_s0 + $0x20] sm:$0xff] }
  0x23   :  { %2234 = vmatpush1.bf16.msra.mxu0 %v3205_v6 }
  0x24   :  { %2236 = vmatprep.subr.bf16.mxu0 %v3209_v7 }
  0x25   :  { %2266 = vmatpush1.bf16.msra.mxu1 %v3215_v8 }
  0x26   :  { %2268 = vmatprep.subr.bf16.mxu1 %v3219_v9 }
  0x27   :  { %2238 = vmatpush1.bf16.msra.mxu0 %v3224_v10 }
  0x28   :  { %2240 = vmatprep.subr.bf16.mxu0 %v3228_v11 }
  0x29   :  { %2270 = vmatpush1.bf16.msra.mxu1 %v3233_v12 }
  0x2a   :  { %2272 = vmatprep.subr.bf16.mxu1 %v3237_v13 }
  0x2b   :  { %2242 = vmatpush1.bf16.msra.mxu0 %v3242_v14 }
  0x2c   :  { %2244 = vmatprep.subr.bf16.mxu0 %v3246_v15 }
  0x2d   :  { %2274 = vmatpush1.bf16.msra.mxu1 %v3251_v16 }
  0x2e   :  { %2276 = vmatprep.subr.bf16.mxu1 %v3255_v17 }
  0x2f   :  { %2246 = vmatpush1.bf16.msra.mxu0 %v3260_v18 }
  0x30   :  { %2248 = vmatprep.subr.bf16.mxu0 %v3264_v19 }
  0x31   :  { %2278 = vmatpush1.bf16.msra.mxu1 %v3269_v20 }
  0x32   :  { %2280 = vmatprep.subr.bf16.mxu1 %v3273_v21 }
  0x33   :  { %2250 = vmatpush1.bf16.msra.mxu0 %v3278_v22 }
  0x34   :  { %2252 = vmatprep.subr.bf16.mxu0 %v3282_v23 }
  0x35   :  { %2282 = vmatpush1.bf16.msra.mxu1 %v3287_v24 }
  0x36   :  { %2284 = vmatprep.subr.bf16.mxu1 %v3291_v26 }
  0x37   :  { %2254 = vmatpush1.bf16.msra.mxu0 %v3296_v29 }
  0x38   :  { %2288 = vmatprep.subr.bf16.mxu0 %v3165_v58 }
  0x39   :  { %2286 = vmatpush1.bf16.msra.mxu1 %v3302_v32 }
  0x3a   :  { %321 = vmatmul.mubr.f32.vlgmr.msra.gmra.mrb[0].mxu0 %v2866_v5  ;;  %2320 = vmatprep.subr.bf16.mxu1 %v3175_v62 }
  0x3b   :  { %2290 = vmatpush1.bf16.msra.mxu0 %v3168_v56  ;;  %564 = vmatprep.mubr.f32.mxu0 %v2866_v5 }
  0x3c   :  { %392 = vmatmul.mubr.f32.vlgmr.msra.gmra.mrb[0].mxu1 %v2866_v5  ;;  %2292 = vmatprep.subr.bf16.mxu0 %v3170_v60 }
  0x3d   :  { %2322 = vmatpush1.bf16.msra.mxu1 %v3179_v59  ;;  %635 = vmatprep.mubr.f32.mxu1 %v2866_v5 }
  0x3e   :  { %2324 = vmatprep.subr.bf16.mxu1 %v3186_v0 }
  0x3f   :  { %2294 = vmatpush1.bf16.msra.mxu0 %v3183_v1 }
  0x40   :  { %2296 = vmatprep.subr.bf16.mxu0 %v3189_v4 }
  0x41   :  { %2326 = vmatpush1.bf16.msra.mxu1 %v3195_v2 }
  0x42   :  { %2328 = vmatprep.subr.bf16.mxu1 %v3199_v3 }
  0x43   :  { %2298 = vmatpush1.bf16.msra.mxu0 %v3205_v6 }
  0x44   :  { %2300 = vmatprep.subr.bf16.mxu0 %v3209_v7 }
  0x45   :  { %2330 = vmatpush1.bf16.msra.mxu1 %v3215_v8 }
  0x46   :  { %2332 = vmatprep.subr.bf16.mxu1 %v3219_v9 }
  0x47   :  { %2302 = vmatpush1.bf16.msra.mxu0 %v3224_v10 }
  0x48   :  { %2304 = vmatprep.subr.bf16.mxu0 %v3228_v11 }
  0x49   :  { %2334 = vmatpush1.bf16.msra.mxu1 %v3233_v12 }
  0x4a   :  { %2336 = vmatprep.subr.bf16.mxu1 %v3237_v13 }
  0x4b   :  { %2306 = vmatpush1.bf16.msra.mxu0 %v3242_v14 }
  0x4c   :  { %2308 = vmatprep.subr.bf16.mxu0 %v3246_v15 }
  0x4d   :  { %2338 = vmatpush1.bf16.msra.mxu1 %v3251_v16 }
  0x4e   :  { %2340 = vmatprep.subr.bf16.mxu1 %v3255_v17 }
  0x4f   :  { %2310 = vmatpush1.bf16.msra.mxu0 %v3260_v18 }
  0x50   :  { %2312 = vmatprep.subr.bf16.mxu0 %v3264_v19 }
  0x51   :  { %2342 = vmatpush1.bf16.msra.mxu1 %v3269_v20 }
  0x52   :  { %2344 = vmatprep.subr.bf16.mxu1 %v3273_v21 }
  0x53   :  { %2314 = vmatpush1.bf16.msra.mxu0 %v3278_v22 }
  0x54   :  { %2316 = vmatprep.subr.bf16.mxu0 %v3282_v23 }
  0x55   :  { %2346 = vmatpush1.bf16.msra.mxu1 %v3287_v24 }
  0x56   :  { %2348 = vmatprep.subr.bf16.mxu1 %v3291_v26 }
  0x57   :  { %2318 = vmatpush1.bf16.msra.mxu0 %v3296_v29 }
  0x58   :  { %2352 = vmatprep.subr.bf16.mxu0 %v3165_v58 }
  0x59   :  { %2350 = vmatpush1.bf16.msra.mxu1 %v3302_v32 }
  0x5a   :  { %2384 = vmatprep.subr.bf16.mxu1 %v3175_v62 }
 0x10d   :  { %v322_v35 = vpop.f32.mrb[0].mxu0 }
 0x10e   :  { %v398_v36 = vadd.f32 %v322_v35, %v187_v33  ;;  %v324_v37 = vpop.f32.mrb[1].mxu0  ;;  %v2167_v33 = vld [vmem:[%s3691_s0 + $0x28] sm:$0xff] }
 0x10f   :  { %v399_v38 = vadd.f32 %v324_v37, %v188_v34  ;;  %v393_v39 = vpop.f32.mrb[0].mxu1 }
 0x110   :  { %v2163_v40 = vmul.f32 -1.442695, %v398_v36  ;;  %v395_v41 = vpop.f32.mrb[1].mxu1  ;;  %v400_v47 = vadd.f32 %v393_v39, %v189_v45 }
 0x111   :  { %v2164_v42 = vmul.f32 -1.442695, %v399_v38  ;;  %v401_v44 = vadd.f32 %v395_v41, %v190_v43 }
 0x112   :  { %2736 = vpow2.f32 %v2163_v40 }
 0x113   :  { %2738 = vpow2.f32 %v2164_v42  ;;  %v2165_v46 = vmul.f32 -1.442695, %v401_v44  ;;  %v2169_v42 = vld [vmem:[%s3691_s0 + $0x38] sm:$0xff]  ;;  %v2168_v44 = vld [vmem:[%s3691_s0 + $0x30] sm:$0xff] }
 0x115   :  { %2740 = vpow2.f32 %v2165_v46 }
 0x116   :  { %2742 = vtanh.f32 %v400_v47 }
 0x11c   :  { %v2737_v48 = vpop.eup %2736 }
 0x11d   :  { %v2739_v49 = vpop.eup %2738  ;;  %v405_v50 = vadd.f32 1.0, %v2737_v48 }
 0x11e   :  { %v411_v51 = vadd.f32 1.0, %v2739_v49 }
 0x11f   :  { %2744 = vrcp.f32 %v405_v50  ;;  %v2741_v52 = vpop.eup %2740 }
 0x120   :  { %2746 = vrcp.f32 %v411_v51  ;;  %v2743_v53 = vpop.eup %2742  ;;  %v418_v55 = vadd.f32 1.0, %v2741_v52 }
 0x122   :  { %2748 = vrcp.f32 %v418_v55 }
 0x129   :  { %v2745_v54 = vpop.eup %2744 }
 0x12a   :  { %v2747_v57 = vpop.eup %2746  ;;  %v423_v61 = vmul.f32 %v2745_v54, %v2743_v53 }
 0x12b   :  { %v422_v63 = vmul.f32 0.0, %v2747_v57 }
 0x12c   :  { %v2749_v27 = vpop.eup %2748 }
 0x12d   :  { %v3357_v25 = vadd.f32 %v423_v61, %v422_v63 }
 0x12f   :  { %2750 = vtanh.f32 %v3357_v25 }
 0x139   :  { %v2751_v28 = vpop.eup %2750 }
 0x13a   :  { %v426_v30 = vmul.f32 %v2751_v28, %v2749_v27 }
 0x13c   :  { %429 = vst [vmem:[%s3693_s2] sm:$0xff] %v426_v30  ;;  %565 = vmatmul.mubr.f32.vlgmr.msra.gmra.mrb[2].mxu0 %v426_v30  ;;  %636 = vmatmul.mubr.f32.vlgmr.msra.gmra.mrb[2].mxu1 %v426_v30 }
 0x13d   :  { %2354 = vmatpush1.bf16.msra.mxu0 %v3168_v56  ;;  %2386 = vmatpush1.bf16.msra.mxu1 %v3179_v59 }
 0x13e   :  { %2356 = vmatprep.subr.bf16.mxu0 %v3170_v60  ;;  %2388 = vmatprep.subr.bf16.mxu1 %v3186_v0 }
 0x13f   :  { %809 = vmatprep.mubr.f32.mxu0 %v2866_v5  ;;  %880 = vmatprep.mubr.f32.mxu1 %v2866_v5 }
 0x141   :  { %2358 = vmatpush1.bf16.msra.mxu0 %v3183_v1  ;;  %2390 = vmatpush1.bf16.msra.mxu1 %v3195_v2 }
 0x142   :  { %2360 = vmatprep.subr.bf16.mxu0 %v3189_v4  ;;  %2392 = vmatprep.subr.bf16.mxu1 %v3199_v3 }
 0x145   :  { %2362 = vmatpush1.bf16.msra.mxu0 %v3205_v6  ;;  %2394 = vmatpush1.bf16.msra.mxu1 %v3215_v8 }
 0x146   :  { %2364 = vmatprep.subr.bf16.mxu0 %v3209_v7  ;;  %2396 = vmatprep.subr.bf16.mxu1 %v3219_v9 }
 0x149   :  { %2366 = vmatpush1.bf16.msra.mxu0 %v3224_v10  ;;  %2398 = vmatpush1.bf16.msra.mxu1 %v3233_v12 }
 0x14a   :  { %2368 = vmatprep.subr.bf16.mxu0 %v3228_v11  ;;  %2400 = vmatprep.subr.bf16.mxu1 %v3237_v13 }
 0x14d   :  { %2370 = vmatpush1.bf16.msra.mxu0 %v3242_v14  ;;  %2402 = vmatpush1.bf16.msra.mxu1 %v3251_v16 }
 0x14e   :  { %2372 = vmatprep.subr.bf16.mxu0 %v3246_v15  ;;  %2404 = vmatprep.subr.bf16.mxu1 %v3255_v17 }
 0x151   :  { %2374 = vmatpush1.bf16.msra.mxu0 %v3260_v18  ;;  %2406 = vmatpush1.bf16.msra.mxu1 %v3269_v20 }
 0x152   :  { %2376 = vmatprep.subr.bf16.mxu0 %v3264_v19  ;;  %2408 = vmatprep.subr.bf16.mxu1 %v3273_v21 }
 0x155   :  { %2378 = vmatpush1.bf16.msra.mxu0 %v3278_v22  ;;  %2410 = vmatpush1.bf16.msra.mxu1 %v3287_v24 }
 0x156   :  { %2380 = vmatprep.subr.bf16.mxu0 %v3282_v23  ;;  %2412 = vmatprep.subr.bf16.mxu1 %v3291_v26 }
 0x159   :  { %2382 = vmatpush1.bf16.msra.mxu0 %v3296_v29  ;;  %2414 = vmatpush1.bf16.msra.mxu1 %v3302_v32 }
 0x15a   :  { %2416 = vmatprep.subr.bf16.mxu0 %v3165_v58  ;;  %2448 = vmatprep.subr.bf16.mxu1 %v3175_v62 }
 0x20f   :  { %v566_v34 = vpop.f32.mrb[2].mxu0  ;;  %v637_v35 = vpop.f32.mrb[2].mxu1 }
 0x210   :  { %v642_v36 = vadd.f32 %v2166_v31, %v566_v34  ;;  %v568_v37 = vpop.f32.mrb[3].mxu0  ;;  %v639_v38 = vpop.f32.mrb[3].mxu1  ;;  %v644_v46 = vadd.f32 %v2168_v44, %v637_v35  ;;  %v2175_v31 = vld [vmem:[%s3691_s0 + $0x48] sm:$0xff] }
 0x211   :  { %v643_v39 = vadd.f32 %v2167_v33, %v568_v37  ;;  %v645_v43 = vadd.f32 %v2169_v42, %v639_v38 }
 0x212   :  { %v2170_v40 = vmul.f32 -1.442695, %v642_v36 }
 0x213   :  { %v2171_v41 = vmul.f32 -1.442695, %v643_v39  ;;  %v2172_v45 = vmul.f32 -1.442695, %v645_v43  ;;  %v2176_v43 = vld [vmem:[%s3691_s0 + $0x50] sm:$0xff] }
 0x214   :  { %2752 = vpow2.f32 %v2170_v40 }
 0x215   :  { %2754 = vpow2.f32 %v2171_v41  ;;  %v2177_v41 = vld [vmem:[%s3691_s0 + $0x58] sm:$0xff] }
 0x216   :  { %2756 = vpow2.f32 %v2172_v45 }
 0x217   :  { %2758 = vtanh.f32 %v644_v46 }
 0x21e   :  { %v2753_v47 = vpop.eup %2752 }
 0x21f   :  { %v2755_v48 = vpop.eup %2754  ;;  %v649_v49 = vadd.f32 1.0, %v2753_v47 }
 0x220   :  { %v655_v50 = vadd.f32 1.0, %v2755_v48  ;;  %v2757_v51 = vpop.eup %2756 }
 0x221   :  { %2760 = vrcp.f32 %v649_v49  ;;  %v2759_v52 = vpop.eup %2758  ;;  %v662_v57 = vadd.f32 1.0, %v2757_v51 }
 0x222   :  { %2762 = vrcp.f32 %v655_v50 }
 0x223   :  { %2764 = vrcp.f32 %v662_v57 }
 0x22b   :  { %v2761_v53 = vpop.eup %2760 }
 0x22c   :  { %v2763_v54 = vpop.eup %2762  ;;  %v667_v55 = vmul.f32 %v2761_v53, %v2759_v52 }
 0x22d   :  { %v666_v61 = vmul.f32 %v2763_v54, %v3357_v25  ;;  %v2765_v27 = vpop.eup %2764  ;;  %v2174_v25 = vld [vmem:[%s3691_s0 + $0x40] sm:$0xff] }
 0x22f   :  { %v3410_v63 = vadd.f32 %v667_v55, %v666_v61 }
 0x231   :  { %2766 = vtanh.f32 %v3410_v63 }
 0x23b   :  { %v2767_v28 = vpop.eup %2766 }
 0x23c   :  { %v670_v30 = vmul.f32 %v2767_v28, %v2765_v27 }
 0x23e   :  { %2173 = vst [vmem:[%s3693_s2 + $0x8] sm:$0xff] %v670_v30  ;;  %810 = vmatmul.mubr.f32.vlgmr.msra.gmra.mrb[4].mxu0 %v670_v30  ;;  %881 = vmatmul.mubr.f32.vlgmr.msra.gmra.mrb[4].mxu1 %v670_v30 }
 0x23f   :  { %2418 = vmatpush1.bf16.msra.mxu0 %v3168_v56  ;;  %2450 = vmatpush1.bf16.msra.mxu1 %v3179_v59 }
 0x240   :  { %2420 = vmatprep.subr.bf16.mxu0 %v3170_v60  ;;  %2452 = vmatprep.subr.bf16.mxu1 %v3186_v0 }
 0x241   :  { %1054 = vmatprep.mubr.f32.mxu0 %v2866_v5  ;;  %1125 = vmatprep.mubr.f32.mxu1 %v2866_v5 }
 0x243   :  { %2422 = vmatpush1.bf16.msra.mxu0 %v3183_v1  ;;  %2454 = vmatpush1.bf16.msra.mxu1 %v3195_v2 }
 0x244   :  { %2424 = vmatprep.subr.bf16.mxu0 %v3189_v4  ;;  %2456 = vmatprep.subr.bf16.mxu1 %v3199_v3 }
 0x247   :  { %2426 = vmatpush1.bf16.msra.mxu0 %v3205_v6  ;;  %2458 = vmatpush1.bf16.msra.mxu1 %v3215_v8 }
 0x248   :  { %2428 = vmatprep.subr.bf16.mxu0 %v3209_v7  ;;  %2460 = vmatprep.subr.bf16.mxu1 %v3219_v9 }
 0x24b   :  { %2430 = vmatpush1.bf16.msra.mxu0 %v3224_v10  ;;  %2462 = vmatpush1.bf16.msra.mxu1 %v3233_v12 }
 0x24c   :  { %2432 = vmatprep.subr.bf16.mxu0 %v3228_v11  ;;  %2464 = vmatprep.subr.bf16.mxu1 %v3237_v13 }
 0x24f   :  { %2434 = vmatpush1.bf16.msra.mxu0 %v3242_v14  ;;  %2466 = vmatpush1.bf16.msra.mxu1 %v3251_v16 }
 0x250   :  { %2436 = vmatprep.subr.bf16.mxu0 %v3246_v15  ;;  %2468 = vmatprep.subr.bf16.mxu1 %v3255_v17 }
 0x253   :  { %2438 = vmatpush1.bf16.msra.mxu0 %v3260_v18  ;;  %2470 = vmatpush1.bf16.msra.mxu1 %v3269_v20 }
 0x254   :  { %2440 = vmatprep.subr.bf16.mxu0 %v3264_v19  ;;  %2472 = vmatprep.subr.bf16.mxu1 %v3273_v21 }
 0x257   :  { %2442 = vmatpush1.bf16.msra.mxu0 %v3278_v22  ;;  %2474 = vmatpush1.bf16.msra.mxu1 %v3287_v24 }
 0x258   :  { %2444 = vmatprep.subr.bf16.mxu0 %v3282_v23  ;;  %2476 = vmatprep.subr.bf16.mxu1 %v3291_v26 }
 0x25b   :  { %2446 = vmatpush1.bf16.msra.mxu0 %v3296_v29  ;;  %2478 = vmatpush1.bf16.msra.mxu1 %v3302_v32 }
 0x25c   :  { %2480 = vmatprep.subr.bf16.mxu0 %v3165_v58  ;;  %2512 = vmatprep.subr.bf16.mxu1 %v3175_v62 }
 0x311   :  { %v811_v33 = vpop.f32.mrb[4].mxu0  ;;  %v882_v34 = vpop.f32.mrb[4].mxu1 }
 0x312   :  { %v887_v35 = vadd.f32 %v2174_v25, %v811_v33  ;;  %v813_v36 = vpop.f32.mrb[5].mxu0  ;;  %v884_v37 = vpop.f32.mrb[5].mxu1  ;;  %v889_v45 = vadd.f32 %v2176_v43, %v882_v34  ;;  %v2183_v25 = vld [vmem:[%s3691_s0 + $0x68] sm:$0xff] }
 0x313   :  { %v888_v38 = vadd.f32 %v2175_v31, %v813_v36  ;;  %v890_v42 = vadd.f32 %v2177_v41, %v884_v37 }
 0x314   :  { %v2178_v39 = vmul.f32 -1.442695, %v887_v35 }
 0x315   :  { %v2179_v40 = vmul.f32 -1.442695, %v888_v38  ;;  %v2180_v44 = vmul.f32 -1.442695, %v890_v42  ;;  %v2184_v42 = vld [vmem:[%s3691_s0 + $0x70] sm:$0xff] }
 0x316   :  { %2768 = vpow2.f32 %v2178_v39 }
 0x317   :  { %2770 = vpow2.f32 %v2179_v40  ;;  %v2185_v40 = vld [vmem:[%s3691_s0 + $0x78] sm:$0xff] }
 0x318   :  { %2772 = vpow2.f32 %v2180_v44 }
 0x319   :  { %2774 = vtanh.f32 %v889_v45 }
 0x320   :  { %v2769_v46 = vpop.eup %2768 }
 0x321   :  { %v2771_v47 = vpop.eup %2770  ;;  %v894_v48 = vadd.f32 1.0, %v2769_v46 }
 0x322   :  { %v900_v49 = vadd.f32 1.0, %v2771_v47  ;;  %v2773_v50 = vpop.eup %2772 }
 0x323   :  { %2776 = vrcp.f32 %v894_v48  ;;  %v2775_v51 = vpop.eup %2774  ;;  %v907_v55 = vadd.f32 1.0, %v2773_v50 }
 0x324   :  { %2778 = vrcp.f32 %v900_v49 }
 0x325   :  { %2780 = vrcp.f32 %v907_v55 }
 0x32d   :  { %v2777_v52 = vpop.eup %2776 }
 0x32e   :  { %v2779_v53 = vpop.eup %2778  ;;  %v912_v54 = vmul.f32 %v2777_v52, %v2775_v51 }
 0x32f   :  { %v911_v57 = vmul.f32 %v2779_v53, %v3410_v63  ;;  %v2781_v27 = vpop.eup %2780  ;;  %v2182_v63 = vld [vmem:[%s3691_s0 + $0x60] sm:$0xff] }
 0x331   :  { %v3463_v61 = vadd.f32 %v912_v54, %v911_v57 }
 0x333   :  { %2782 = vtanh.f32 %v3463_v61 }
 0x33d   :  { %v2783_v28 = vpop.eup %2782 }
 0x33e   :  { %v915_v30 = vmul.f32 %v2783_v28, %v2781_v27 }
 0x340   :  { %2181 = vst [vmem:[%s3693_s2 + $0x10] sm:$0xff] %v915_v30  ;;  %1055 = vmatmul.mubr.f32.vlgmr.msra.gmra.mrb[6].mxu0 %v915_v30  ;;  %1126 = vmatmul.mubr.f32.vlgmr.msra.gmra.mrb[6].mxu1 %v915_v30 }
 0x341   :  { %2482 = vmatpush1.bf16.msra.mxu0 %v3168_v56  ;;  %2514 = vmatpush1.bf16.msra.mxu1 %v3179_v59 }
 0x342   :  { %2484 = vmatprep.subr.bf16.mxu0 %v3170_v60  ;;  %2516 = vmatprep.subr.bf16.mxu1 %v3186_v0 }
 0x343   :  { %1299 = vmatprep.mubr.f32.mxu0 %v2866_v5  ;;  %1370 = vmatprep.mubr.f32.mxu1 %v2866_v5 }
 0x345   :  { %2486 = vmatpush1.bf16.msra.mxu0 %v3183_v1  ;;  %2518 = vmatpush1.bf16.msra.mxu1 %v3195_v2 }
 0x346   :  { %2488 = vmatprep.subr.bf16.mxu0 %v3189_v4  ;;  %2520 = vmatprep.subr.bf16.mxu1 %v3199_v3 }
 0x349   :  { %2490 = vmatpush1.bf16.msra.mxu0 %v3205_v6  ;;  %2522 = vmatpush1.bf16.msra.mxu1 %v3215_v8 }
 0x34a   :  { %2492 = vmatprep.subr.bf16.mxu0 %v3209_v7  ;;  %2524 = vmatprep.subr.bf16.mxu1 %v3219_v9 }
 0x34d   :  { %2494 = vmatpush1.bf16.msra.mxu0 %v3224_v10  ;;  %2526 = vmatpush1.bf16.msra.mxu1 %v3233_v12 }
 0x34e   :  { %2496 = vmatprep.subr.bf16.mxu0 %v3228_v11  ;;  %2528 = vmatprep.subr.bf16.mxu1 %v3237_v13 }
 0x351   :  { %2498 = vmatpush1.bf16.msra.mxu0 %v3242_v14  ;;  %2530 = vmatpush1.bf16.msra.mxu1 %v3251_v16 }
 0x352   :  { %2500 = vmatprep.subr.bf16.mxu0 %v3246_v15  ;;  %2532 = vmatprep.subr.bf16.mxu1 %v3255_v17 }
 0x355   :  { %2502 = vmatpush1.bf16.msra.mxu0 %v3260_v18  ;;  %2534 = vmatpush1.bf16.msra.mxu1 %v3269_v20 }
 0x356   :  { %2504 = vmatprep.subr.bf16.mxu0 %v3264_v19  ;;  %2536 = vmatprep.subr.bf16.mxu1 %v3273_v21 }
 0x359   :  { %2506 = vmatpush1.bf16.msra.mxu0 %v3278_v22  ;;  %2538 = vmatpush1.bf16.msra.mxu1 %v3287_v24 }
 0x35a   :  { %2508 = vmatprep.subr.bf16.mxu0 %v3282_v23  ;;  %2540 = vmatprep.subr.bf16.mxu1 %v3291_v26 }
 0x35d   :  { %2510 = vmatpush1.bf16.msra.mxu0 %v3296_v29  ;;  %2542 = vmatpush1.bf16.msra.mxu1 %v3302_v32 }
 0x35e   :  { %2544 = vmatprep.subr.bf16.mxu0 %v3165_v58  ;;  %2576 = vmatprep.subr.bf16.mxu1 %v3175_v62 }
 0x413   :  { %v1056_v31 = vpop.f32.mrb[6].mxu0  ;;  %v1127_v33 = vpop.f32.mrb[6].mxu1 }
 0x414   :  { %v1132_v34 = vadd.f32 %v2182_v63, %v1056_v31  ;;  %v1058_v35 = vpop.f32.mrb[7].mxu0  ;;  %v1129_v36 = vpop.f32.mrb[7].mxu1  ;;  %v1134_v44 = vadd.f32 %v2184_v42, %v1127_v33  ;;  %v2191_v63 = vld [vmem:[%s3691_s0 + $0x88] sm:$0xff] }
 0x415   :  { %v1133_v37 = vadd.f32 %v2183_v25, %v1058_v35  ;;  %v1135_v41 = vadd.f32 %v2185_v40, %v1129_v36 }
 0x416   :  { %v2186_v38 = vmul.f32 -1.442695, %v1132_v34 }
 0x417   :  { %v2187_v39 = vmul.f32 -1.442695, %v1133_v37  ;;  %v2188_v43 = vmul.f32 -1.442695, %v1135_v41  ;;  %v2192_v41 = vld [vmem:[%s3691_s0 + $0x90] sm:$0xff] }
 0x418   :  { %2784 = vpow2.f32 %v2186_v38 }
 0x419   :  { %2786 = vpow2.f32 %v2187_v39  ;;  %v2193_v39 = vld [vmem:[%s3691_s0 + $0x98] sm:$0xff] }
 0x41a   :  { %2788 = vpow2.f32 %v2188_v43 }
 0x41b   :  { %2790 = vtanh.f32 %v1134_v44 }
 0x422   :  { %v2785_v45 = vpop.eup %2784 }
 0x423   :  { %v2787_v46 = vpop.eup %2786  ;;  %v1139_v47 = vadd.f32 1.0, %v2785_v45 }
 0x424   :  { %v1145_v48 = vadd.f32 1.0, %v2787_v46  ;;  %v2789_v49 = vpop.eup %2788 }
 0x425   :  { %2792 = vrcp.f32 %v1139_v47  ;;  %v2791_v50 = vpop.eup %2790  ;;  %v1152_v54 = vadd.f32 1.0, %v2789_v49 }
 0x426   :  { %2794 = vrcp.f32 %v1145_v48 }
 0x427   :  { %2796 = vrcp.f32 %v1152_v54 }
 0x42f   :  { %v2793_v51 = vpop.eup %2792 }
 0x430   :  { %v2795_v52 = vpop.eup %2794  ;;  %v1157_v53 = vmul.f32 %v2793_v51, %v2791_v50 }
 0x431   :  { %v1156_v55 = vmul.f32 %v2795_v52, %v3463_v61  ;;  %v2797_v27 = vpop.eup %2796  ;;  %v2190_v61 = vld [vmem:[%s3691_s0 + $0x80] sm:$0xff] }
 0x433   :  { %v3516_v57 = vadd.f32 %v1157_v53, %v1156_v55 }
 0x435   :  { %2798 = vtanh.f32 %v3516_v57 }
 0x43f   :  { %v2799_v28 = vpop.eup %2798 }
 0x440   :  { %v1160_v30 = vmul.f32 %v2799_v28, %v2797_v27 }
 0x442   :  { %2189 = vst [vmem:[%s3693_s2 + $0x18] sm:$0xff] %v1160_v30  ;;  %1300 = vmatmul.mubr.f32.vlgmr.msra.gmra.mrb[8].mxu0 %v1160_v30  ;;  %1371 = vmatmul.mubr.f32.vlgmr.msra.gmra.mrb[8].mxu1 %v1160_v30 }
 0x443   :  { %2546 = vmatpush1.bf16.msra.mxu0 %v3168_v56  ;;  %2578 = vmatpush1.bf16.msra.mxu1 %v3179_v59 }
 0x444   :  { %2548 = vmatprep.subr.bf16.mxu0 %v3170_v60  ;;  %2580 = vmatprep.subr.bf16.mxu1 %v3186_v0 }
 0x445   :  { %1544 = vmatprep.mubr.f32.mxu0 %v2866_v5  ;;  %1615 = vmatprep.mubr.f32.mxu1 %v2866_v5 }
 0x447   :  { %2550 = vmatpush1.bf16.msra.mxu0 %v3183_v1  ;;  %2582 = vmatpush1.bf16.msra.mxu1 %v3195_v2 }
 0x448   :  { %2552 = vmatprep.subr.bf16.mxu0 %v3189_v4  ;;  %2584 = vmatprep.subr.bf16.mxu1 %v3199_v3 }
 0x44b   :  { %2554 = vmatpush1.bf16.msra.mxu0 %v3205_v6  ;;  %2586 = vmatpush1.bf16.msra.mxu1 %v3215_v8 }
 0x44c   :  { %2556 = vmatprep.subr.bf16.mxu0 %v3209_v7  ;;  %2588 = vmatprep.subr.bf16.mxu1 %v3219_v9 }
 0x44f   :  { %2558 = vmatpush1.bf16.msra.mxu0 %v3224_v10  ;;  %2590 = vmatpush1.bf16.msra.mxu1 %v3233_v12 }
 0x450   :  { %2560 = vmatprep.subr.bf16.mxu0 %v3228_v11  ;;  %2592 = vmatprep.subr.bf16.mxu1 %v3237_v13 }
 0x453   :  { %2562 = vmatpush1.bf16.msra.mxu0 %v3242_v14  ;;  %2594 = vmatpush1.bf16.msra.mxu1 %v3251_v16 }
 0x454   :  { %2564 = vmatprep.subr.bf16.mxu0 %v3246_v15  ;;  %2596 = vmatprep.subr.bf16.mxu1 %v3255_v17 }
 0x457   :  { %2566 = vmatpush1.bf16.msra.mxu0 %v3260_v18  ;;  %2598 = vmatpush1.bf16.msra.mxu1 %v3269_v20 }
 0x458   :  { %2568 = vmatprep.subr.bf16.mxu0 %v3264_v19  ;;  %2600 = vmatprep.subr.bf16.mxu1 %v3273_v21 }
 0x45b   :  { %2570 = vmatpush1.bf16.msra.mxu0 %v3278_v22  ;;  %2602 = vmatpush1.bf16.msra.mxu1 %v3287_v24 }
 0x45c   :  { %2572 = vmatprep.subr.bf16.mxu0 %v3282_v23  ;;  %2604 = vmatprep.subr.bf16.mxu1 %v3291_v26 }
 0x45f   :  { %2574 = vmatpush1.bf16.msra.mxu0 %v3296_v29  ;;  %2606 = vmatpush1.bf16.msra.mxu1 %v3302_v32 }
 0x460   :  { %2608 = vmatprep.subr.bf16.mxu0 %v3165_v58  ;;  %2640 = vmatprep.subr.bf16.mxu1 %v3175_v62 }
 0x515   :  { %v1301_v25 = vpop.f32.mrb[8].mxu0  ;;  %v1372_v31 = vpop.f32.mrb[8].mxu1 }
 0x516   :  { %v1377_v33 = vadd.f32 %v2190_v61, %v1301_v25  ;;  %v1303_v34 = vpop.f32.mrb[9].mxu0  ;;  %v1374_v35 = vpop.f32.mrb[9].mxu1  ;;  %v1379_v43 = vadd.f32 %v2192_v41, %v1372_v31  ;;  %v2199_v61 = vld [vmem:[%s3691_s0 + $0xa8] sm:$0xff] }
 0x517   :  { %v1378_v36 = vadd.f32 %v2191_v63, %v1303_v34  ;;  %v1380_v40 = vadd.f32 %v2193_v39, %v1374_v35 }
 0x518   :  { %v2194_v37 = vmul.f32 -1.442695, %v1377_v33 }
 0x519   :  { %v2195_v38 = vmul.f32 -1.442695, %v1378_v36  ;;  %v2196_v42 = vmul.f32 -1.442695, %v1380_v40 }
 0x51a   :  { %2800 = vpow2.f32 %v2194_v37 }
 0x51b   :  { %2802 = vpow2.f32 %v2195_v38  ;;  %v2200_v38 = vld [vmem:[%s3691_s0 + $0xb0] sm:$0xff] }
 0x51c   :  { %2804 = vpow2.f32 %v2196_v42 }
 0x51d   :  { %2806 = vtanh.f32 %v1379_v43 }
 0x524   :  { %v2801_v44 = vpop.eup %2800 }
 0x525   :  { %v2803_v45 = vpop.eup %2802  ;;  %v1384_v46 = vadd.f32 1.0, %v2801_v44 }
 0x526   :  { %v1390_v47 = vadd.f32 1.0, %v2803_v45  ;;  %v2805_v48 = vpop.eup %2804 }
 0x527   :  { %2808 = vrcp.f32 %v1384_v46  ;;  %v2807_v49 = vpop.eup %2806  ;;  %v1397_v53 = vadd.f32 1.0, %v2805_v48 }
 0x528   :  { %2810 = vrcp.f32 %v1390_v47 }
 0x529   :  { %2812 = vrcp.f32 %v1397_v53 }
 0x531   :  { %v2809_v50 = vpop.eup %2808 }
 0x532   :  { %v2811_v51 = vpop.eup %2810  ;;  %v1402_v52 = vmul.f32 %v2809_v50, %v2807_v49 }
 0x533   :  { %v1401_v54 = vmul.f32 %v2811_v51, %v3516_v57  ;;  %v2813_v27 = vpop.eup %2812  ;;  %v2198_v57 = vld [vmem:[%s3691_s0 + $0xa0] sm:$0xff] }
 0x535   :  { %v3569_v55 = vadd.f32 %v1402_v52, %v1401_v54 }
 0x537   :  { %2814 = vtanh.f32 %v3569_v55 }
 0x541   :  { %v2815_v28 = vpop.eup %2814 }
 0x542   :  { %v1405_v30 = vmul.f32 %v2815_v28, %v2813_v27 }
 0x544   :  { %2197 = vst [vmem:[%s3693_s2 + $0x20] sm:$0xff] %v1405_v30  ;;  %1545 = vmatmul.mubr.f32.vlgmr.msra.gmra.mrb[10].mxu0 %v1405_v30  ;;  %1616 = vmatmul.mubr.f32.vlgmr.msra.gmra.mrb[10].mxu1 %v1405_v30 }
 0x545   :  { %2610 = vmatpush1.bf16.msra.mxu0 %v3168_v56  ;;  %2642 = vmatpush1.bf16.msra.mxu1 %v3179_v59 }
 0x546   :  { %2612 = vmatprep.subr.bf16.mxu0 %v3170_v60  ;;  %2644 = vmatprep.subr.bf16.mxu1 %v3186_v0 }
 0x547   :  { %1789 = vmatprep.mubr.f32.mxu0 %v2866_v5  ;;  %1860 = vmatprep.mubr.f32.mxu1 %v2866_v5 }
 0x549   :  { %2614 = vmatpush1.bf16.msra.mxu0 %v3183_v1  ;;  %2646 = vmatpush1.bf16.msra.mxu1 %v3195_v2 }
 0x54a   :  { %2616 = vmatprep.subr.bf16.mxu0 %v3189_v4  ;;  %2648 = vmatprep.subr.bf16.mxu1 %v3199_v3 }
 0x54d   :  { %2618 = vmatpush1.bf16.msra.mxu0 %v3205_v6  ;;  %2650 = vmatpush1.bf16.msra.mxu1 %v3215_v8 }
 0x54e   :  { %2620 = vmatprep.subr.bf16.mxu0 %v3209_v7  ;;  %2652 = vmatprep.subr.bf16.mxu1 %v3219_v9 }
 0x551   :  { %2622 = vmatpush1.bf16.msra.mxu0 %v3224_v10  ;;  %2654 = vmatpush1.bf16.msra.mxu1 %v3233_v12 }
 0x552   :  { %2624 = vmatprep.subr.bf16.mxu0 %v3228_v11  ;;  %2656 = vmatprep.subr.bf16.mxu1 %v3237_v13 }
 0x555   :  { %2626 = vmatpush1.bf16.msra.mxu0 %v3242_v14  ;;  %2658 = vmatpush1.bf16.msra.mxu1 %v3251_v16 }
 0x556   :  { %2628 = vmatprep.subr.bf16.mxu0 %v3246_v15  ;;  %2660 = vmatprep.subr.bf16.mxu1 %v3255_v17 }
 0x559   :  { %2630 = vmatpush1.bf16.msra.mxu0 %v3260_v18  ;;  %2662 = vmatpush1.bf16.msra.mxu1 %v3269_v20 }
 0x55a   :  { %2632 = vmatprep.subr.bf16.mxu0 %v3264_v19  ;;  %2664 = vmatprep.subr.bf16.mxu1 %v3273_v21 }
 0x55d   :  { %2634 = vmatpush1.bf16.msra.mxu0 %v3278_v22  ;;  %2666 = vmatpush1.bf16.msra.mxu1 %v3287_v24 }
 0x55e   :  { %2636 = vmatprep.subr.bf16.mxu0 %v3282_v23  ;;  %2668 = vmatprep.subr.bf16.mxu1 %v3291_v26 }
 0x561   :  { %2638 = vmatpush1.bf16.msra.mxu0 %v3296_v29  ;;  %2670 = vmatpush1.bf16.msra.mxu1 %v3302_v32 }
 0x562   :  { %2672 = vmatprep.subr.bf16.mxu0 %v3165_v58  ;;  %2704 = vmatprep.subr.bf16.mxu1 %v3175_v62  ;;  %v2201_v58 = vld [vmem:[%s3691_s0 + $0xb8] sm:$0xff] }
 0x617   :  { %v1546_v63 = vpop.f32.mrb[10].mxu0  ;;  %v1617_v25 = vpop.f32.mrb[10].mxu1 }
 0x618   :  { %v1622_v31 = vadd.f32 %v2198_v57, %v1546_v63  ;;  %v1548_v33 = vpop.f32.mrb[11].mxu0  ;;  %v1619_v34 = vpop.f32.mrb[11].mxu1  ;;  %v1624_v40 = vadd.f32 %v2200_v38, %v1617_v25 }
 0x619   :  { %v1623_v35 = vadd.f32 %v2199_v61, %v1548_v33  ;;  %v1625_v62 = vadd.f32 %v2201_v58, %v1619_v34  ;;  %v2217_v34 = vld [vmem:[%s3691_s0 + $0xf8] sm:$0xff] }
 0x61a   :  { %v2202_v36 = vmul.f32 -1.442695, %v1622_v31 }
 0x61b   :  { %v2203_v37 = vmul.f32 -1.442695, %v1623_v35  ;;  %v2204_v39 = vmul.f32 -1.442695, %v1625_v62 }
 0x61c   :  { %2816 = vpow2.f32 %v2202_v36  ;;  %v2216_v36 = vld [vmem:[%s3691_s0 + $0xf0] sm:$0xff] }
 0x61d   :  { %2818 = vpow2.f32 %v2203_v37 }
 0x61e   :  { %2820 = vpow2.f32 %v2204_v39 }
 0x61f   :  { %2822 = vtanh.f32 %v1624_v40 }
 0x626   :  { %v2817_v41 = vpop.eup %2816 }
 0x627   :  { %v2819_v42 = vpop.eup %2818  ;;  %v1629_v43 = vadd.f32 1.0, %v2817_v41 }
 0x628   :  { %v1635_v44 = vadd.f32 1.0, %v2819_v42  ;;  %v2821_v45 = vpop.eup %2820 }
 0x629   :  { %2824 = vrcp.f32 %v1629_v43  ;;  %v2823_v46 = vpop.eup %2822  ;;  %v1642_v50 = vadd.f32 1.0, %v2821_v45 }
 0x62a   :  { %2826 = vrcp.f32 %v1635_v44 }
 0x62b   :  { %2828 = vrcp.f32 %v1642_v50 }
 0x633   :  { %v2825_v47 = vpop.eup %2824 }
 0x634   :  { %v2827_v48 = vpop.eup %2826  ;;  %v1647_v49 = vmul.f32 %v2825_v47, %v2823_v46 }
 0x635   :  { %v1646_v51 = vmul.f32 %v2827_v48, %v3569_v55  ;;  %v2829_v53 = vpop.eup %2828  ;;  %v2215_v55 = vld [vmem:[%s3691_s0 + $0xe8] sm:$0xff] }
 0x637   :  { %v3622_v52 = vadd.f32 %v1647_v49, %v1646_v51 }
 0x639   :  { %2830 = vtanh.f32 %v3622_v52 }
 0x643   :  { %v2831_v54 = vpop.eup %2830 }
 0x644   :  { %v1650_v27 = vmul.f32 %v2831_v54, %v2829_v53 }
 0x646   :  { %2205 = vst [vmem:[%s3693_s2 + $0x28] sm:$0xff] %v1650_v27  ;;  %1790 = vmatmul.mubr.f32.vlgmr.msra.gmra.mrb[12].mxu0 %v1650_v27  ;;  %1861 = vmatmul.mubr.f32.vlgmr.msra.gmra.mrb[12].mxu1 %v1650_v27 }
 0x647   :  { %2674 = vmatpush1.bf16.msra.mxu0 %v3168_v56  ;;  %2706 = vmatpush1.bf16.msra.mxu1 %v3179_v59  ;;  %v2206_v56 = vld [vmem:[%s3691_s0 + $0xc0] sm:$0xff]  ;;  %v2207_v59 = vld [vmem:[%s3691_s0 + $0xc8] sm:$0xff] }
 0x648   :  { %2676 = vmatprep.subr.bf16.mxu0 %v3170_v60  ;;  %2708 = vmatprep.subr.bf16.mxu1 %v3186_v0 }
 0x649   :  { %2034 = vmatprep.mubr.f32.mxu0 %v2866_v5  ;;  %2105 = vmatprep.mubr.f32.mxu1 %v2866_v5 }
 0x64b   :  { %2678 = vmatpush1.bf16.msra.mxu0 %v3183_v1  ;;  %2710 = vmatpush1.bf16.msra.mxu1 %v3195_v2 }
 0x64c   :  { %2680 = vmatprep.subr.bf16.mxu0 %v3189_v4  ;;  %2712 = vmatprep.subr.bf16.mxu1 %v3199_v3 }
 0x64f   :  { %2682 = vmatpush1.bf16.msra.mxu0 %v3205_v6  ;;  %2714 = vmatpush1.bf16.msra.mxu1 %v3215_v8 }
 0x650   :  { %2684 = vmatprep.subr.bf16.mxu0 %v3209_v7  ;;  %2716 = vmatprep.subr.bf16.mxu1 %v3219_v9  ;;  %v2209_v7 = vld [vmem:[%s3691_s0 + $0xd8] sm:$0xff]  ;;  %v2208_v9 = vld [vmem:[%s3691_s0 + $0xd0] sm:$0xff] }
 0x653   :  { %2686 = vmatpush1.bf16.msra.mxu0 %v3224_v10  ;;  %2718 = vmatpush1.bf16.msra.mxu1 %v3233_v12 }
 0x654   :  { %2688 = vmatprep.subr.bf16.mxu0 %v3228_v11  ;;  %2720 = vmatprep.subr.bf16.mxu1 %v3237_v13 }
 0x657   :  { %2690 = vmatpush1.bf16.msra.mxu0 %v3242_v14  ;;  %2722 = vmatpush1.bf16.msra.mxu1 %v3251_v16 }
 0x658   :  { %2692 = vmatprep.subr.bf16.mxu0 %v3246_v15  ;;  %2724 = vmatprep.subr.bf16.mxu1 %v3255_v17 }
 0x65b   :  { %2694 = vmatpush1.bf16.msra.mxu0 %v3260_v18  ;;  %2726 = vmatpush1.bf16.msra.mxu1 %v3269_v20 }
 0x65c   :  { %2696 = vmatprep.subr.bf16.mxu0 %v3264_v19  ;;  %2728 = vmatprep.subr.bf16.mxu1 %v3273_v21 }
 0x65f   :  { %2698 = vmatpush1.bf16.msra.mxu0 %v3278_v22  ;;  %2730 = vmatpush1.bf16.msra.mxu1 %v3287_v24 }
 0x660   :  { %2700 = vmatprep.subr.bf16.mxu0 %v3282_v23  ;;  %2732 = vmatprep.subr.bf16.mxu1 %v3291_v26 }
 0x663   :  { %2702 = vmatpush1.bf16.msra.mxu0 %v3296_v29  ;;  %2734 = vmatpush1.bf16.msra.mxu1 %v3302_v32  ;;  %v2214_v32 = vld [vmem:[%s3691_s0 + $0xe0] sm:$0xff] }
 0x719   :  { %v1791_v60 = vpop.f32.mrb[12].mxu0  ;;  %v1862_v1 = vpop.f32.mrb[12].mxu1 }
 0x71a   :  { %v1867_v0 = vadd.f32 %v2206_v56, %v1791_v60  ;;  %v1793_v4 = vpop.f32.mrb[13].mxu0  ;;  %v1864_v2 = vpop.f32.mrb[13].mxu1  ;;  %v1869_v11 = vadd.f32 %v2208_v9, %v1862_v1 }
 0x71b   :  { %v1868_v3 = vadd.f32 %v2207_v59, %v1793_v4  ;;  %v1870_v8 = vadd.f32 %v2209_v7, %v1864_v2 }
 0x71c   :  { %v2210_v5 = vmul.f32 -1.442695, %v1867_v0 }
 0x71d   :  { %v2211_v6 = vmul.f32 -1.442695, %v1868_v3  ;;  %v2212_v10 = vmul.f32 -1.442695, %v1870_v8 }
 0x71e   :  { %2832 = vpow2.f32 %v2210_v5 }
 0x71f   :  { %2834 = vpow2.f32 %v2211_v6 }
 0x720   :  { %2836 = vpow2.f32 %v2212_v10 }
 0x721   :  { %2838 = vtanh.f32 %v1869_v11 }
 0x728   :  { %v2833_v12 = vpop.eup %2832 }
 0x729   :  { %v2835_v13 = vpop.eup %2834  ;;  %v1874_v14 = vadd.f32 1.0, %v2833_v12 }
 0x72a   :  { %v1880_v15 = vadd.f32 1.0, %v2835_v13  ;;  %v2837_v16 = vpop.eup %2836 }
 0x72b   :  { %2840 = vrcp.f32 %v1874_v14  ;;  %v2839_v17 = vpop.eup %2838  ;;  %v1887_v21 = vadd.f32 1.0, %v2837_v16 }
 0x72c   :  { %2842 = vrcp.f32 %v1880_v15 }
 0x72d   :  { %2844 = vrcp.f32 %v1887_v21 }
 0x735   :  { %v2841_v18 = vpop.eup %2840 }
 0x736   :  { %v2843_v19 = vpop.eup %2842  ;;  %v1892_v20 = vmul.f32 %v2841_v18, %v2839_v17 }
 0x737   :  { %v1891_v22 = vmul.f32 %v2843_v19, %v3622_v52  ;;  %v2845_v24 = vpop.eup %2844 }
 0x739   :  { %v1893_v23 = vadd.f32 %v1892_v20, %v1891_v22 }
 0x73b   :  { %2846 = vtanh.f32 %v1893_v23 }
 0x745   :  { %v2847_v26 = vpop.eup %2846 }
 0x746   :  { %v1895_v29 = vmul.f32 %v2847_v26, %v2845_v24 }
 0x748   :  { %2213 = vst [vmem:[%s3693_s2 + $0x30] sm:$0xff] %v1895_v29  ;;  %2035 = vmatmul.mubr.f32.vlgmr.msra.gmra.mrb[14].mxu0 %v1895_v29  ;;  %2106 = vmatmul.mubr.f32.vlgmr.msra.gmra.mrb[14].mxu1 %v1895_v29 }
 0x81b   :  { %v2036_v28 = vpop.f32.mrb[14].mxu0  ;;  %v2107_v30 = vpop.f32.mrb[14].mxu1 }
 0x81c   :  { %v2112_v57 = vadd.f32 %v2214_v32, %v2036_v28  ;;  %v2038_v61 = vpop.f32.mrb[15].mxu0  ;;  %v2109_v63 = vpop.f32.mrb[15].mxu1  ;;  %v2114_v58 = vadd.f32 %v2216_v36, %v2107_v30 }
 0x81d   :  { %v2113_v25 = vadd.f32 %v2215_v55, %v2038_v61  ;;  %v2115_v35 = vadd.f32 %v2217_v34, %v2109_v63 }
 0x81e   :  { %v2218_v31 = vmul.f32 -1.442695, %v2112_v57 }
 0x81f   :  { %v2219_v33 = vmul.f32 -1.442695, %v2113_v25  ;;  %v2220_v37 = vmul.f32 -1.442695, %v2115_v35 }
 0x820   :  { %2848 = vpow2.f32 %v2218_v31 }
 0x821   :  { %2850 = vpow2.f32 %v2219_v33 }
 0x822   :  { %2852 = vpow2.f32 %v2220_v37 }
 0x823   :  { %2854 = vtanh.f32 %v2114_v58 }
 0x82a   :  { %v2849_v62 = vpop.eup %2848 }
 0x82b   :  { %v2851_v38 = vpop.eup %2850  ;;  %v2119_v39 = vadd.f32 1.0, %v2849_v62 }
 0x82c   :  { %v2125_v40 = vadd.f32 1.0, %v2851_v38  ;;  %v2853_v41 = vpop.eup %2852 }
 0x82d   :  { %2856 = vrcp.f32 %v2119_v39  ;;  %v2855_v42 = vpop.eup %2854  ;;  %v2132_v46 = vadd.f32 1.0, %v2853_v41 }
 0x82e   :  { %2858 = vrcp.f32 %v2125_v40 }
 0x82f   :  { %2860 = vrcp.f32 %v2132_v46 }
 0x837   :  { %v2857_v43 = vpop.eup %2856 }
 0x838   :  { %v2859_v44 = vpop.eup %2858  ;;  %v2137_v45 = vmul.f32 %v2857_v43, %v2855_v42 }
 0x839   :  { %v2136_v47 = vmul.f32 %v2859_v44, %v1893_v23  ;;  %v2861_v49 = vpop.eup %2860 }
 0x83b   :  { %v2138_v48 = vadd.f32 %v2137_v45, %v2136_v47 }
 0x83d   :  { %2862 = vtanh.f32 %v2138_v48 }
 0x847   :  { %v2863_v50 = vpop.eup %2862 }
 0x848   :  { %v2140_v51 = vmul.f32 %v2863_v50, %v2861_v49 }
 0x84a   :  { %2221 = vst [vmem:[%s3693_s2 + $0x38] sm:$0xff] %v2140_v51 }
 0x84b   :  { %2149 = vsyncmov [#allocation5] }
 0x84e   :  { %s2150_s17 = vpop.sfrf %2149 }
 0x84f   :  { %p2222_p0 = scmp.ne.s32.totalorder %s2150_s17, 0 }
 0x851   :  { %2154 = shalt.err (%p2222_p0)  }

// kernel: lstm_model_forward.7
= control target key start
LH: loop header
LB: loop body
LE: loop exit
PB: predicated region body
PF: predicated region fallthrough
CT: control target
= control target key end

     0   :  { %s3899_s0 = inlined_call_operand.vmem [shape: f32[8,8,512], index: 0, kind: input, shape index: {}]   ;;  %s3900_s1 = inlined_call_operand.vmem [shape: f32[128,512], index: 1, kind: input, shape index: {}]   ;;  %s3901_s2 = inlined_call_operand.vmem [shape: f32[128,128], index: 2, kind: input, shape index: {}]   ;;  %s3902_s3 = inlined_call_operand.vmem [shape: f32[1,128], index: 3, kind: input, shape index: {}]   ;;  %s3903_s4 = inlined_call_operand.vmem [shape: f32[8,128], index: 4, kind: output, shape index: {}]  }
   0x1   :  { %v3058_v0 = vld [vmem:[%s3900_s1] sm:$0xff]  ;;  %v3063_v1 = vld [vmem:[%s3900_s1 + $0x8] sm:$0xff]  ;;  %v3068_v2 = vld [vmem:[%s3900_s1 + $0x10] sm:$0xff] }
   0x2   :  { %v3073_v3 = vld [vmem:[%s3900_s1 + $0x18] sm:$0xff]  ;;  %v59_v4 = vld [vmem:[%s3900_s1 + $0x20] sm:$0xff]  ;;  %v61_v5 = vld [vmem:[%s3900_s1 + $0x28] sm:$0xff] }
   0x3   :  { %v3084_v6 = vld [vmem:[%s3900_s1 + $0x30] sm:$0xff]  ;;  %v3089_v7 = vld [vmem:[%s3900_s1 + $0x38] sm:$0xff]  ;;  %v3094_v8 = vld [vmem:[%s3900_s1 + $0x40] sm:$0xff] }
   0x4   :  { %v69_v9 = vld [vmem:[%s3900_s1 + $0x48] sm:$0xff]  ;;  %v3102_v10 = vld [vmem:[%s3900_s1 + $0x50] sm:$0xff]  ;;  %v3107_v11 = vld [vmem:[%s3900_s1 + $0x58] sm:$0xff] }
   0x5   :  { %v75_v12 = vld [vmem:[%s3900_s1 + $0x60] sm:$0xff]  ;;  %v77_v13 = vld [vmem:[%s3900_s1 + $0x68] sm:$0xff]  ;;  %v3118_v14 = vld [vmem:[%s3900_s1 + $0x70] sm:$0xff] }
   0x6   :  { %v81_v15 = vld [vmem:[%s3900_s1 + $0x78] sm:$0xff]  ;;  %v3126_v16 = vld [vmem:[%s3900_s1 + $0x80] sm:$0xff]  ;;  %v85_v17 = vld [vmem:[%s3900_s1 + $0x88] sm:$0xff] }
   0x7   :  { %v3134_v18 = vld [vmem:[%s3900_s1 + $0x90] sm:$0xff]  ;;  %v3139_v19 = vld [vmem:[%s3900_s1 + $0x98] sm:$0xff]  ;;  %v3144_v20 = vld [vmem:[%s3900_s1 + $0xa0] sm:$0xff] }
   0x8   :  { %v93_v21 = vld [vmem:[%s3900_s1 + $0xa8] sm:$0xff]  ;;  %v3152_v22 = vld [vmem:[%s3900_s1 + $0xb0] sm:$0xff]  ;;  %v97_v23 = vld [vmem:[%s3900_s1 + $0xb8] sm:$0xff] }
   0x9   :  { %v3160_v24 = vld [vmem:[%s3900_s1 + $0xc0] sm:$0xff]  ;;  %v3165_v25 = vld [vmem:[%s3900_s1 + $0xc8] sm:$0xff]  ;;  %v3170_v26 = vld [vmem:[%s3900_s1 + $0xd0] sm:$0xff] }
   0xa   :  { %v3175_v27 = vld [vmem:[%s3900_s1 + $0xd8] sm:$0xff]  ;;  %v3180_v28 = vld [vmem:[%s3900_s1 + $0xe0] sm:$0xff]  ;;  %v109_v29 = vld [vmem:[%s3900_s1 + $0xe8] sm:$0xff] }
   0xb   :  { %v3188_v30 = vld [vmem:[%s3900_s1 + $0xf0] sm:$0xff]  ;;  %v113_v31 = vld [vmem:[%s3900_s1 + $0xf8] sm:$0xff]  ;;  %v3196_v32 = vld [vmem:[%s3900_s1 + $0x100] sm:$0xff] }
   0xc   :  { %v3201_v33 = vld [vmem:[%s3900_s1 + $0x108] sm:$0xff]  ;;  %v3206_v34 = vld [vmem:[%s3900_s1 + $0x110] sm:$0xff]  ;;  %v3211_v35 = vld [vmem:[%s3900_s1 + $0x118] sm:$0xff] }
   0xd   :  { %v3216_v36 = vld [vmem:[%s3900_s1 + $0x120] sm:$0xff]  ;;  %v125_v37 = vld [vmem:[%s3900_s1 + $0x128] sm:$0xff]  ;;  %v3224_v38 = vld [vmem:[%s3900_s1 + $0x130] sm:$0xff] }
   0xe   :  { %v129_v39 = vld [vmem:[%s3900_s1 + $0x138] sm:$0xff]  ;;  %v3232_v40 = vld [vmem:[%s3900_s1 + $0x140] sm:$0xff]  ;;  %v3237_v41 = vld [vmem:[%s3900_s1 + $0x148] sm:$0xff] }
   0xf   :  { %v3242_v42 = vld [vmem:[%s3900_s1 + $0x150] sm:$0xff]  ;;  %v3247_v43 = vld [vmem:[%s3900_s1 + $0x158] sm:$0xff]  ;;  %v3252_v44 = vld [vmem:[%s3900_s1 + $0x160] sm:$0xff] }
  0x10   :  { %v141_v45 = vld [vmem:[%s3900_s1 + $0x168] sm:$0xff]  ;;  %v3260_v46 = vld [vmem:[%s3900_s1 + $0x170] sm:$0xff]  ;;  %v145_v47 = vld [vmem:[%s3900_s1 + $0x178] sm:$0xff] }
  0x11   :  { %v3268_v48 = vld [vmem:[%s3900_s1 + $0x180] sm:$0xff]  ;;  %v3273_v49 = vld [vmem:[%s3900_s1 + $0x188] sm:$0xff]  ;;  %v3278_v50 = vld [vmem:[%s3900_s1 + $0x190] sm:$0xff] }
  0x12   :  { %v3283_v51 = vld [vmem:[%s3900_s1 + $0x198] sm:$0xff]  ;;  %v3288_v52 = vld [vmem:[%s3900_s1 + $0x1a0] sm:$0xff]  ;;  %v157_v53 = vld [vmem:[%s3900_s1 + $0x1a8] sm:$0xff] }
  0x13   :  { %v3296_v54 = vld [vmem:[%s3900_s1 + $0x1b0] sm:$0xff]  ;;  %v161_v55 = vld [vmem:[%s3900_s1 + $0x1b8] sm:$0xff]  ;;  %v3304_v56 = vld [vmem:[%s3900_s1 + $0x1c0] sm:$0xff] }
  0x14   :  { %3904 = vst [vmem:[#allocation8_spill] sm:$0xff] %v3304_v56  ;;  %v3309_v57 = vld [vmem:[%s3900_s1 + $0x1c8] sm:$0xff]  ;;  %v3314_v58 = vld [vmem:[%s3900_s1 + $0x1d0] sm:$0xff]  ;;  %v3319_v59 = vld [vmem:[%s3900_s1 + $0x1d8] sm:$0xff] }
  0x15   :  { %3905 = vst [vmem:[#allocation9_spill] sm:$0xff] %v3314_v58  ;;  %3906 = vst [vmem:[#allocation10_spill] sm:$0xff] %v3319_v59  ;;  %v3324_v60 = vld [vmem:[%s3900_s1 + $0x1e0] sm:$0xff]  ;;  %v173_v61 = vld [vmem:[%s3900_s1 + $0x1e8] sm:$0xff] }
  0x16   :  { %3907 = vst [vmem:[#allocation11_spill] sm:$0xff] %v3324_v60  ;;  %v3332_v62 = vld [vmem:[%s3900_s1 + $0x1f0] sm:$0xff]  ;;  %v177_v63 = vld [vmem:[%s3900_s1 + $0x1f8] sm:$0xff] }
  0x17   :  { %3908 = vst [vmem:[#allocation12_spill] sm:$0xff] %v3332_v62 }
  0x18   :  { %186 = vsyncadd [#allocation5], 8192  ;;  %v3338_v58 = vpack.c.bf16 %v61_v5, %v3063_v1  ;;  %v3341_v56 = vpack.c.bf16 %v59_v4, %v3058_v0  ;;  %v3343_v60 = vpack.c.bf16 %v77_v13, %v69_v9 }
  0x19   :  { %3025 = dma.done.wait [#allocation5], 8192 }
  0x1a   :  { %3026 = vsyncadd [#allocation5], 4294959104  ;;  %2359 = vmatprep.subr.bf16.mxu0 %v3338_v58  ;;  %v3348_v62 = vpack.c.bf16 %v3089_v7, %v3073_v3  ;;  %v3352_v59 = vpack.c.bf16 %v3084_v6, %v3068_v2  ;;  %v3356_v1 = vpack.c.bf16 %v75_v12, %v3094_v8  ;;  %v3359_v0 = vpack.c.bf16 %v81_v15, %v3107_v11 }
  0x1b   :  { %2361 = vmatpush1.bf16.msra.mxu0 %v3341_v56  ;;  %v3362_v4 = vpack.c.bf16 %v93_v21, %v85_v17  ;;  %v3368_v2 = vpack.c.bf16 %v3118_v14, %v3102_v10  ;;  %v3372_v3 = vpack.c.bf16 %v97_v23, %v3139_v19  ;;  %v3027_v5 = vmov 0.0  }
  0x1c   :  { %2363 = vmatprep.subr.bf16.mxu0 %v3343_v60  ;;  %2391 = vmatprep.subr.bf16.mxu1 %v3348_v62  ;;  %v3378_v6 = vpack.c.bf16 %v3144_v20, %v3126_v16  ;;  %v3382_v7 = vpack.c.bf16 %v109_v29, %v3165_v25  ;;  %v3388_v8 = vpack.c.bf16 %v3152_v22, %v3134_v18  ;;  %v3909_v25 = vld [vmem:[#allocation10_spill] sm:$0xff]  ;;  %vm3029_vm0 = vmmov 0  }
  0x1d   :  { %2393 = vmatpush1.bf16.msra.mxu1 %v3352_v59  ;;  %326 = vmatprep.mubr.f32.mxu0 %v3027_v5  ;;  %v3392_v9 = vpack.c.bf16 %v113_v31, %v3175_v27  ;;  %v3397_v10 = vpack.c.bf16 %v3180_v28, %v3160_v24  ;;  %v3401_v11 = vpack.c.bf16 %v125_v37, %v3201_v33  ;;  %v3910_v27 = vld [vmem:[#allocation8_spill] sm:$0xff]  ;;  %v3911_v28 = vld [vmem:[#allocation11_spill] sm:$0xff] }
  0x1e   :  { %2395 = vmatprep.subr.bf16.mxu1 %v3359_v0  ;;  %397 = vmatprep.mubr.f32.mxu1 %v3027_v5  ;;  %v3406_v12 = vpack.c.bf16 %v3188_v30, %v3170_v26  ;;  %v3410_v13 = vpack.c.bf16 %v129_v39, %v3211_v35  ;;  %v3415_v14 = vpack.c.bf16 %v3216_v36, %v3196_v32  ;;  %v3912_v30 = vld [vmem:[#allocation9_spill] sm:$0xff]  ;;  %v3913_v31 = vld [vmem:[#allocation12_spill] sm:$0xff] }
  0x1f   :  { %2365 = vmatpush1.bf16.msra.mxu0 %v3356_v1  ;;  %v3419_v15 = vpack.c.bf16 %v141_v45, %v3237_v41  ;;  %v3424_v16 = vpack.c.bf16 %v3224_v38, %v3206_v34  ;;  %v3428_v17 = vpack.c.bf16 %v145_v47, %v3247_v43  ;;  %v3433_v18 = vpack.c.bf16 %v3252_v44, %v3232_v40  ;;  %v193_v33 = vld [vmem:[%s3899_s0] sm:$0xff]  ;;  %v194_v34 = vld [vmem:[%s3899_s0 + $0x8] sm:$0xff]  ;;  %v196_v43 = vld [vmem:[%s3899_s0 + $0x18] sm:$0xff] }
  0x20   :  { %2367 = vmatprep.subr.bf16.mxu0 %v3362_v4  ;;  %v3437_v19 = vpack.c.bf16 %v157_v53, %v3273_v49  ;;  %v3442_v20 = vpack.c.bf16 %v3260_v46, %v3242_v42  ;;  %v3446_v21 = vpack.c.bf16 %v161_v55, %v3283_v51  ;;  %v3451_v22 = vpack.c.bf16 %v3288_v52, %v3268_v48  ;;  %v195_v45 = vld [vmem:[%s3899_s0 + $0x10] sm:$0xff] }
  0x21   :  { %2397 = vmatpush1.bf16.msra.mxu1 %v3368_v2  ;;  %v3455_v23 = vpack.c.bf16 %v173_v61, %v3309_v57  ;;  %v3460_v24 = vpack.c.bf16 %v3296_v54, %v3278_v50  ;;  %v3464_v26 = vpack.c.bf16 %v177_v63, %v3909_v25  ;;  %v3469_v29 = vpack.c.bf16 %v3911_v28, %v3910_v27 }
  0x22   :  { %2399 = vmatprep.subr.bf16.mxu1 %v3372_v3  ;;  %v3475_v32 = vpack.c.bf16 %v3913_v31, %v3912_v30  ;;  %v2255_v31 = vld [vmem:[%s3899_s0 + $0x20] sm:$0xff] }
  0x23   :  { %2369 = vmatpush1.bf16.msra.mxu0 %v3378_v6 }
  0x24   :  { %2371 = vmatprep.subr.bf16.mxu0 %v3382_v7 }
  0x25   :  { %2401 = vmatpush1.bf16.msra.mxu1 %v3388_v8 }
  0x26   :  { %2403 = vmatprep.subr.bf16.mxu1 %v3392_v9 }
  0x27   :  { %2373 = vmatpush1.bf16.msra.mxu0 %v3397_v10 }
  0x28   :  { %2375 = vmatprep.subr.bf16.mxu0 %v3401_v11 }
  0x29   :  { %2405 = vmatpush1.bf16.msra.mxu1 %v3406_v12 }
  0x2a   :  { %2407 = vmatprep.subr.bf16.mxu1 %v3410_v13 }
  0x2b   :  { %2377 = vmatpush1.bf16.msra.mxu0 %v3415_v14 }
  0x2c   :  { %2379 = vmatprep.subr.bf16.mxu0 %v3419_v15 }
  0x2d   :  { %2409 = vmatpush1.bf16.msra.mxu1 %v3424_v16 }
  0x2e   :  { %2411 = vmatprep.subr.bf16.mxu1 %v3428_v17 }
  0x2f   :  { %2381 = vmatpush1.bf16.msra.mxu0 %v3433_v18 }
  0x30   :  { %2383 = vmatprep.subr.bf16.mxu0 %v3437_v19 }
  0x31   :  { %2413 = vmatpush1.bf16.msra.mxu1 %v3442_v20 }
  0x32   :  { %2415 = vmatprep.subr.bf16.mxu1 %v3446_v21 }
  0x33   :  { %2385 = vmatpush1.bf16.msra.mxu0 %v3451_v22 }
  0x34   :  { %2387 = vmatprep.subr.bf16.mxu0 %v3455_v23 }
  0x35   :  { %2417 = vmatpush1.bf16.msra.mxu1 %v3460_v24 }
  0x36   :  { %2419 = vmatprep.subr.bf16.mxu1 %v3464_v26 }
  0x37   :  { %2389 = vmatpush1.bf16.msra.mxu0 %v3469_v29 }
  0x38   :  { %2423 = vmatprep.subr.bf16.mxu0 %v3338_v58 }
  0x39   :  { %2421 = vmatpush1.bf16.msra.mxu1 %v3475_v32 }
  0x3a   :  { %327 = vmatmul.mubr.f32.vlgmr.msra.gmra.mrb[0].mxu0 %v3027_v5  ;;  %2455 = vmatprep.subr.bf16.mxu1 %v3348_v62 }
  0x3b   :  { %2425 = vmatpush1.bf16.msra.mxu0 %v3341_v56  ;;  %569 = vmatprep.mubr.f32.mxu0 %v3027_v5 }
  0x3c   :  { %398 = vmatmul.mubr.f32.vlgmr.msra.gmra.mrb[0].mxu1 %v3027_v5  ;;  %2427 = vmatprep.subr.bf16.mxu0 %v3343_v60 }
  0x3d   :  { %2457 = vmatpush1.bf16.msra.mxu1 %v3352_v59  ;;  %640 = vmatprep.mubr.f32.mxu1 %v3027_v5 }
  0x3e   :  { %2459 = vmatprep.subr.bf16.mxu1 %v3359_v0 }
  0x3f   :  { %2429 = vmatpush1.bf16.msra.mxu0 %v3356_v1 }
  0x40   :  { %2431 = vmatprep.subr.bf16.mxu0 %v3362_v4 }
  0x41   :  { %2461 = vmatpush1.bf16.msra.mxu1 %v3368_v2 }
  0x42   :  { %2463 = vmatprep.subr.bf16.mxu1 %v3372_v3 }
  0x43   :  { %2433 = vmatpush1.bf16.msra.mxu0 %v3378_v6 }
  0x44   :  { %2435 = vmatprep.subr.bf16.mxu0 %v3382_v7 }
  0x45   :  { %2465 = vmatpush1.bf16.msra.mxu1 %v3388_v8 }
  0x46   :  { %2467 = vmatprep.subr.bf16.mxu1 %v3392_v9 }
  0x47   :  { %2437 = vmatpush1.bf16.msra.mxu0 %v3397_v10 }
  0x48   :  { %2439 = vmatprep.subr.bf16.mxu0 %v3401_v11 }
  0x49   :  { %2469 = vmatpush1.bf16.msra.mxu1 %v3406_v12 }
  0x4a   :  { %2471 = vmatprep.subr.bf16.mxu1 %v3410_v13 }
  0x4b   :  { %2441 = vmatpush1.bf16.msra.mxu0 %v3415_v14 }
  0x4c   :  { %2443 = vmatprep.subr.bf16.mxu0 %v3419_v15 }
  0x4d   :  { %2473 = vmatpush1.bf16.msra.mxu1 %v3424_v16 }
  0x4e   :  { %2475 = vmatprep.subr.bf16.mxu1 %v3428_v17 }
  0x4f   :  { %2445 = vmatpush1.bf16.msra.mxu0 %v3433_v18 }
  0x50   :  { %2447 = vmatprep.subr.bf16.mxu0 %v3437_v19 }
  0x51   :  { %2477 = vmatpush1.bf16.msra.mxu1 %v3442_v20 }
  0x52   :  { %2479 = vmatprep.subr.bf16.mxu1 %v3446_v21 }
  0x53   :  { %2449 = vmatpush1.bf16.msra.mxu0 %v3451_v22 }
  0x54   :  { %2451 = vmatprep.subr.bf16.mxu0 %v3455_v23 }
  0x55   :  { %2481 = vmatpush1.bf16.msra.mxu1 %v3460_v24 }
  0x56   :  { %2483 = vmatprep.subr.bf16.mxu1 %v3464_v26 }
  0x57   :  { %2453 = vmatpush1.bf16.msra.mxu0 %v3469_v29 }
  0x58   :  { %2487 = vmatprep.subr.bf16.mxu0 %v3338_v58 }
  0x59   :  { %2485 = vmatpush1.bf16.msra.mxu1 %v3475_v32 }
  0x5a   :  { %2519 = vmatprep.subr.bf16.mxu1 %v3348_v62 }
 0x10d   :  { %v328_v35 = vpop.f32.mrb[0].mxu0 }
 0x10e   :  { %v404_v36 = vadd.f32 %v328_v35, %v193_v33  ;;  %v330_v37 = vpop.f32.mrb[1].mxu0  ;;  %v2256_v33 = vld [vmem:[%s3899_s0 + $0x28] sm:$0xff] }
 0x10f   :  { %v405_v38 = vadd.f32 %v330_v37, %v194_v34  ;;  %v399_v39 = vpop.f32.mrb[0].mxu1 }
 0x110   :  { %v2252_v40 = vmul.f32 -1.442695, %v404_v36  ;;  %v401_v41 = vpop.f32.mrb[1].mxu1  ;;  %v406_v47 = vadd.f32 %v399_v39, %v195_v45 }
 0x111   :  { %v2253_v42 = vmul.f32 -1.442695, %v405_v38  ;;  %v407_v44 = vadd.f32 %v401_v41, %v196_v43 }
 0x112   :  { %2897 = vpow2.f32 %v2252_v40 }
 0x113   :  { %2899 = vpow2.f32 %v2253_v42  ;;  %v2254_v46 = vmul.f32 -1.442695, %v407_v44  ;;  %v2258_v42 = vld [vmem:[%s3899_s0 + $0x38] sm:$0xff]  ;;  %v2257_v44 = vld [vmem:[%s3899_s0 + $0x30] sm:$0xff] }
 0x115   :  { %2901 = vpow2.f32 %v2254_v46 }
 0x116   :  { %2903 = vtanh.f32 %v406_v47 }
 0x11c   :  { %v2898_v48 = vpop.eup %2897 }
 0x11d   :  { %v2900_v49 = vpop.eup %2899  ;;  %v411_v50 = vadd.f32 1.0, %v2898_v48 }
 0x11e   :  { %v417_v51 = vadd.f32 1.0, %v2900_v49 }
 0x11f   :  { %2905 = vrcp.f32 %v411_v50  ;;  %v2902_v52 = vpop.eup %2901 }
 0x120   :  { %2907 = vrcp.f32 %v417_v51  ;;  %v2904_v53 = vpop.eup %2903  ;;  %v424_v55 = vadd.f32 1.0, %v2902_v52 }
 0x122   :  { %2909 = vrcp.f32 %v424_v55 }
 0x129   :  { %v2906_v54 = vpop.eup %2905 }
 0x12a   :  { %v2908_v57 = vpop.eup %2907  ;;  %v429_v61 = vmul.f32 %v2906_v54, %v2904_v53 }
 0x12b   :  { %v428_v63 = vmul.f32 0.0, %v2908_v57 }
 0x12c   :  { %v2910_v27 = vpop.eup %2909 }
 0x12d   :  { %v3530_v25 = vadd.f32 %v429_v61, %v428_v63 }
 0x12f   :  { %2911 = vtanh.f32 %v3530_v25 }
 0x139   :  { %v2912_v28 = vpop.eup %2911 }
 0x13a   :  { %v432_v30 = vmul.f32 %v2912_v28, %v2910_v27 }
 0x13c   :  { %570 = vmatmul.mubr.f32.vlgmr.msra.gmra.mrb[2].mxu0 %v432_v30  ;;  %641 = vmatmul.mubr.f32.vlgmr.msra.gmra.mrb[2].mxu1 %v432_v30 }
 0x13d   :  { %2489 = vmatpush1.bf16.msra.mxu0 %v3341_v56  ;;  %2521 = vmatpush1.bf16.msra.mxu1 %v3352_v59 }
 0x13e   :  { %2491 = vmatprep.subr.bf16.mxu0 %v3343_v60  ;;  %2523 = vmatprep.subr.bf16.mxu1 %v3359_v0 }
 0x13f   :  { %812 = vmatprep.mubr.f32.mxu0 %v3027_v5  ;;  %883 = vmatprep.mubr.f32.mxu1 %v3027_v5 }
 0x141   :  { %2493 = vmatpush1.bf16.msra.mxu0 %v3356_v1  ;;  %2525 = vmatpush1.bf16.msra.mxu1 %v3368_v2 }
 0x142   :  { %2495 = vmatprep.subr.bf16.mxu0 %v3362_v4  ;;  %2527 = vmatprep.subr.bf16.mxu1 %v3372_v3 }
 0x145   :  { %2497 = vmatpush1.bf16.msra.mxu0 %v3378_v6  ;;  %2529 = vmatpush1.bf16.msra.mxu1 %v3388_v8 }
 0x146   :  { %2499 = vmatprep.subr.bf16.mxu0 %v3382_v7  ;;  %2531 = vmatprep.subr.bf16.mxu1 %v3392_v9 }
 0x149   :  { %2501 = vmatpush1.bf16.msra.mxu0 %v3397_v10  ;;  %2533 = vmatpush1.bf16.msra.mxu1 %v3406_v12 }
 0x14a   :  { %2503 = vmatprep.subr.bf16.mxu0 %v3401_v11  ;;  %2535 = vmatprep.subr.bf16.mxu1 %v3410_v13 }
 0x14d   :  { %2505 = vmatpush1.bf16.msra.mxu0 %v3415_v14  ;;  %2537 = vmatpush1.bf16.msra.mxu1 %v3424_v16 }
 0x14e   :  { %2507 = vmatprep.subr.bf16.mxu0 %v3419_v15  ;;  %2539 = vmatprep.subr.bf16.mxu1 %v3428_v17 }
 0x151   :  { %2509 = vmatpush1.bf16.msra.mxu0 %v3433_v18  ;;  %2541 = vmatpush1.bf16.msra.mxu1 %v3442_v20 }
 0x152   :  { %2511 = vmatprep.subr.bf16.mxu0 %v3437_v19  ;;  %2543 = vmatprep.subr.bf16.mxu1 %v3446_v21 }
 0x155   :  { %2513 = vmatpush1.bf16.msra.mxu0 %v3451_v22  ;;  %2545 = vmatpush1.bf16.msra.mxu1 %v3460_v24 }
 0x156   :  { %2515 = vmatprep.subr.bf16.mxu0 %v3455_v23  ;;  %2547 = vmatprep.subr.bf16.mxu1 %v3464_v26 }
 0x159   :  { %2517 = vmatpush1.bf16.msra.mxu0 %v3469_v29  ;;  %2549 = vmatpush1.bf16.msra.mxu1 %v3475_v32 }
 0x15a   :  { %2551 = vmatprep.subr.bf16.mxu0 %v3338_v58  ;;  %2583 = vmatprep.subr.bf16.mxu1 %v3348_v62 }
 0x20f   :  { %v571_v34 = vpop.f32.mrb[2].mxu0  ;;  %v642_v35 = vpop.f32.mrb[2].mxu1 }
 0x210   :  { %v647_v36 = vadd.f32 %v2255_v31, %v571_v34  ;;  %v573_v37 = vpop.f32.mrb[3].mxu0  ;;  %v644_v38 = vpop.f32.mrb[3].mxu1  ;;  %v649_v46 = vadd.f32 %v2257_v44, %v642_v35  ;;  %v2263_v31 = vld [vmem:[%s3899_s0 + $0x48] sm:$0xff] }
 0x211   :  { %v648_v39 = vadd.f32 %v2256_v33, %v573_v37  ;;  %v650_v43 = vadd.f32 %v2258_v42, %v644_v38 }
 0x212   :  { %v2259_v40 = vmul.f32 -1.442695, %v647_v36 }
 0x213   :  { %v2260_v41 = vmul.f32 -1.442695, %v648_v39  ;;  %v2261_v45 = vmul.f32 -1.442695, %v650_v43  ;;  %v2264_v43 = vld [vmem:[%s3899_s0 + $0x50] sm:$0xff] }
 0x214   :  { %2913 = vpow2.f32 %v2259_v40 }
 0x215   :  { %2915 = vpow2.f32 %v2260_v41  ;;  %v2265_v41 = vld [vmem:[%s3899_s0 + $0x58] sm:$0xff] }
 0x216   :  { %2917 = vpow2.f32 %v2261_v45 }
 0x217   :  { %2919 = vtanh.f32 %v649_v46 }
 0x21e   :  { %v2914_v47 = vpop.eup %2913 }
 0x21f   :  { %v2916_v48 = vpop.eup %2915  ;;  %v654_v49 = vadd.f32 1.0, %v2914_v47 }
 0x220   :  { %v660_v50 = vadd.f32 1.0, %v2916_v48  ;;  %v2918_v51 = vpop.eup %2917 }
 0x221   :  { %2921 = vrcp.f32 %v654_v49  ;;  %v2920_v52 = vpop.eup %2919  ;;  %v667_v57 = vadd.f32 1.0, %v2918_v51 }
 0x222   :  { %2923 = vrcp.f32 %v660_v50 }
 0x223   :  { %2925 = vrcp.f32 %v667_v57 }
 0x22b   :  { %v2922_v53 = vpop.eup %2921 }
 0x22c   :  { %v2924_v54 = vpop.eup %2923  ;;  %v672_v55 = vmul.f32 %v2922_v53, %v2920_v52 }
 0x22d   :  { %v671_v61 = vmul.f32 %v2924_v54, %v3530_v25  ;;  %v2926_v27 = vpop.eup %2925  ;;  %v2262_v25 = vld [vmem:[%s3899_s0 + $0x40] sm:$0xff] }
 0x22f   :  { %v3580_v63 = vadd.f32 %v672_v55, %v671_v61 }
 0x231   :  { %2927 = vtanh.f32 %v3580_v63 }
 0x23b   :  { %v2928_v28 = vpop.eup %2927 }
 0x23c   :  { %v675_v30 = vmul.f32 %v2928_v28, %v2926_v27 }
 0x23e   :  { %813 = vmatmul.mubr.f32.vlgmr.msra.gmra.mrb[4].mxu0 %v675_v30  ;;  %884 = vmatmul.mubr.f32.vlgmr.msra.gmra.mrb[4].mxu1 %v675_v30 }
 0x23f   :  { %2553 = vmatpush1.bf16.msra.mxu0 %v3341_v56  ;;  %2585 = vmatpush1.bf16.msra.mxu1 %v3352_v59 }
 0x240   :  { %2555 = vmatprep.subr.bf16.mxu0 %v3343_v60  ;;  %2587 = vmatprep.subr.bf16.mxu1 %v3359_v0 }
 0x241   :  { %1055 = vmatprep.mubr.f32.mxu0 %v3027_v5  ;;  %1126 = vmatprep.mubr.f32.mxu1 %v3027_v5 }
 0x243   :  { %2557 = vmatpush1.bf16.msra.mxu0 %v3356_v1  ;;  %2589 = vmatpush1.bf16.msra.mxu1 %v3368_v2 }
 0x244   :  { %2559 = vmatprep.subr.bf16.mxu0 %v3362_v4  ;;  %2591 = vmatprep.subr.bf16.mxu1 %v3372_v3 }
 0x247   :  { %2561 = vmatpush1.bf16.msra.mxu0 %v3378_v6  ;;  %2593 = vmatpush1.bf16.msra.mxu1 %v3388_v8 }
 0x248   :  { %2563 = vmatprep.subr.bf16.mxu0 %v3382_v7  ;;  %2595 = vmatprep.subr.bf16.mxu1 %v3392_v9 }
 0x24b   :  { %2565 = vmatpush1.bf16.msra.mxu0 %v3397_v10  ;;  %2597 = vmatpush1.bf16.msra.mxu1 %v3406_v12 }
 0x24c   :  { %2567 = vmatprep.subr.bf16.mxu0 %v3401_v11  ;;  %2599 = vmatprep.subr.bf16.mxu1 %v3410_v13 }
 0x24f   :  { %2569 = vmatpush1.bf16.msra.mxu0 %v3415_v14  ;;  %2601 = vmatpush1.bf16.msra.mxu1 %v3424_v16 }
 0x250   :  { %2571 = vmatprep.subr.bf16.mxu0 %v3419_v15  ;;  %2603 = vmatprep.subr.bf16.mxu1 %v3428_v17 }
 0x253   :  { %2573 = vmatpush1.bf16.msra.mxu0 %v3433_v18  ;;  %2605 = vmatpush1.bf16.msra.mxu1 %v3442_v20 }
 0x254   :  { %2575 = vmatprep.subr.bf16.mxu0 %v3437_v19  ;;  %2607 = vmatprep.subr.bf16.mxu1 %v3446_v21 }
 0x257   :  { %2577 = vmatpush1.bf16.msra.mxu0 %v3451_v22  ;;  %2609 = vmatpush1.bf16.msra.mxu1 %v3460_v24 }
 0x258   :  { %2579 = vmatprep.subr.bf16.mxu0 %v3455_v23  ;;  %2611 = vmatprep.subr.bf16.mxu1 %v3464_v26 }
 0x25b   :  { %2581 = vmatpush1.bf16.msra.mxu0 %v3469_v29  ;;  %2613 = vmatpush1.bf16.msra.mxu1 %v3475_v32 }
 0x25c   :  { %2615 = vmatprep.subr.bf16.mxu0 %v3338_v58  ;;  %2647 = vmatprep.subr.bf16.mxu1 %v3348_v62 }
 0x311   :  { %v814_v33 = vpop.f32.mrb[4].mxu0  ;;  %v885_v34 = vpop.f32.mrb[4].mxu1 }
 0x312   :  { %v890_v35 = vadd.f32 %v2262_v25, %v814_v33  ;;  %v816_v36 = vpop.f32.mrb[5].mxu0  ;;  %v887_v37 = vpop.f32.mrb[5].mxu1  ;;  %v892_v45 = vadd.f32 %v2264_v43, %v885_v34  ;;  %v2270_v25 = vld [vmem:[%s3899_s0 + $0x68] sm:$0xff] }
 0x313   :  { %v891_v38 = vadd.f32 %v2263_v31, %v816_v36  ;;  %v893_v42 = vadd.f32 %v2265_v41, %v887_v37 }
 0x314   :  { %v2266_v39 = vmul.f32 -1.442695, %v890_v35 }
 0x315   :  { %v2267_v40 = vmul.f32 -1.442695, %v891_v38  ;;  %v2268_v44 = vmul.f32 -1.442695, %v893_v42  ;;  %v2271_v42 = vld [vmem:[%s3899_s0 + $0x70] sm:$0xff] }
 0x316   :  { %2929 = vpow2.f32 %v2266_v39 }
 0x317   :  { %2931 = vpow2.f32 %v2267_v40  ;;  %v2272_v40 = vld [vmem:[%s3899_s0 + $0x78] sm:$0xff] }
 0x318   :  { %2933 = vpow2.f32 %v2268_v44 }
 0x319   :  { %2935 = vtanh.f32 %v892_v45 }
 0x320   :  { %v2930_v46 = vpop.eup %2929 }
 0x321   :  { %v2932_v47 = vpop.eup %2931  ;;  %v897_v48 = vadd.f32 1.0, %v2930_v46 }
 0x322   :  { %v903_v49 = vadd.f32 1.0, %v2932_v47  ;;  %v2934_v50 = vpop.eup %2933 }
 0x323   :  { %2937 = vrcp.f32 %v897_v48  ;;  %v2936_v51 = vpop.eup %2935  ;;  %v910_v55 = vadd.f32 1.0, %v2934_v50 }
 0x324   :  { %2939 = vrcp.f32 %v903_v49 }
 0x325   :  { %2941 = vrcp.f32 %v910_v55 }
 0x32d   :  { %v2938_v52 = vpop.eup %2937 }
 0x32e   :  { %v2940_v53 = vpop.eup %2939  ;;  %v915_v54 = vmul.f32 %v2938_v52, %v2936_v51 }
 0x32f   :  { %v914_v57 = vmul.f32 %v2940_v53, %v3580_v63  ;;  %v2942_v27 = vpop.eup %2941  ;;  %v2269_v63 = vld [vmem:[%s3899_s0 + $0x60] sm:$0xff] }
 0x331   :  { %v3630_v61 = vadd.f32 %v915_v54, %v914_v57 }
 0x333   :  { %2943 = vtanh.f32 %v3630_v61 }
 0x33d   :  { %v2944_v28 = vpop.eup %2943 }
 0x33e   :  { %v918_v30 = vmul.f32 %v2944_v28, %v2942_v27 }
 0x340   :  { %1056 = vmatmul.mubr.f32.vlgmr.msra.gmra.mrb[6].mxu0 %v918_v30  ;;  %1127 = vmatmul.mubr.f32.vlgmr.msra.gmra.mrb[6].mxu1 %v918_v30 }
 0x341   :  { %2617 = vmatpush1.bf16.msra.mxu0 %v3341_v56  ;;  %2649 = vmatpush1.bf16.msra.mxu1 %v3352_v59 }
 0x342   :  { %2619 = vmatprep.subr.bf16.mxu0 %v3343_v60  ;;  %2651 = vmatprep.subr.bf16.mxu1 %v3359_v0 }
 0x343   :  { %1298 = vmatprep.mubr.f32.mxu0 %v3027_v5  ;;  %1369 = vmatprep.mubr.f32.mxu1 %v3027_v5 }
 0x345   :  { %2621 = vmatpush1.bf16.msra.mxu0 %v3356_v1  ;;  %2653 = vmatpush1.bf16.msra.mxu1 %v3368_v2 }
 0x346   :  { %2623 = vmatprep.subr.bf16.mxu0 %v3362_v4  ;;  %2655 = vmatprep.subr.bf16.mxu1 %v3372_v3 }
 0x349   :  { %2625 = vmatpush1.bf16.msra.mxu0 %v3378_v6  ;;  %2657 = vmatpush1.bf16.msra.mxu1 %v3388_v8 }
 0x34a   :  { %2627 = vmatprep.subr.bf16.mxu0 %v3382_v7  ;;  %2659 = vmatprep.subr.bf16.mxu1 %v3392_v9 }
 0x34d   :  { %2629 = vmatpush1.bf16.msra.mxu0 %v3397_v10  ;;  %2661 = vmatpush1.bf16.msra.mxu1 %v3406_v12 }
 0x34e   :  { %2631 = vmatprep.subr.bf16.mxu0 %v3401_v11  ;;  %2663 = vmatprep.subr.bf16.mxu1 %v3410_v13 }
 0x351   :  { %2633 = vmatpush1.bf16.msra.mxu0 %v3415_v14  ;;  %2665 = vmatpush1.bf16.msra.mxu1 %v3424_v16 }
 0x352   :  { %2635 = vmatprep.subr.bf16.mxu0 %v3419_v15  ;;  %2667 = vmatprep.subr.bf16.mxu1 %v3428_v17 }
 0x355   :  { %2637 = vmatpush1.bf16.msra.mxu0 %v3433_v18  ;;  %2669 = vmatpush1.bf16.msra.mxu1 %v3442_v20 }
 0x356   :  { %2639 = vmatprep.subr.bf16.mxu0 %v3437_v19  ;;  %2671 = vmatprep.subr.bf16.mxu1 %v3446_v21 }
 0x359   :  { %2641 = vmatpush1.bf16.msra.mxu0 %v3451_v22  ;;  %2673 = vmatpush1.bf16.msra.mxu1 %v3460_v24 }
 0x35a   :  { %2643 = vmatprep.subr.bf16.mxu0 %v3455_v23  ;;  %2675 = vmatprep.subr.bf16.mxu1 %v3464_v26 }
 0x35d   :  { %2645 = vmatpush1.bf16.msra.mxu0 %v3469_v29  ;;  %2677 = vmatpush1.bf16.msra.mxu1 %v3475_v32 }
 0x35e   :  { %2679 = vmatprep.subr.bf16.mxu0 %v3338_v58  ;;  %2711 = vmatprep.subr.bf16.mxu1 %v3348_v62 }
 0x413   :  { %v1057_v31 = vpop.f32.mrb[6].mxu0  ;;  %v1128_v33 = vpop.f32.mrb[6].mxu1 }
 0x414   :  { %v1133_v34 = vadd.f32 %v2269_v63, %v1057_v31  ;;  %v1059_v35 = vpop.f32.mrb[7].mxu0  ;;  %v1130_v36 = vpop.f32.mrb[7].mxu1  ;;  %v1135_v44 = vadd.f32 %v2271_v42, %v1128_v33  ;;  %v2277_v63 = vld [vmem:[%s3899_s0 + $0x88] sm:$0xff] }
 0x415   :  { %v1134_v37 = vadd.f32 %v2270_v25, %v1059_v35  ;;  %v1136_v41 = vadd.f32 %v2272_v40, %v1130_v36 }
 0x416   :  { %v2273_v38 = vmul.f32 -1.442695, %v1133_v34 }
 0x417   :  { %v2274_v39 = vmul.f32 -1.442695, %v1134_v37  ;;  %v2275_v43 = vmul.f32 -1.442695, %v1136_v41  ;;  %v2278_v41 = vld [vmem:[%s3899_s0 + $0x90] sm:$0xff] }
 0x418   :  { %2945 = vpow2.f32 %v2273_v38 }
 0x419   :  { %2947 = vpow2.f32 %v2274_v39  ;;  %v2279_v39 = vld [vmem:[%s3899_s0 + $0x98] sm:$0xff] }
 0x41a   :  { %2949 = vpow2.f32 %v2275_v43 }
 0x41b   :  { %2951 = vtanh.f32 %v1135_v44 }
 0x422   :  { %v2946_v45 = vpop.eup %2945 }
 0x423   :  { %v2948_v46 = vpop.eup %2947  ;;  %v1140_v47 = vadd.f32 1.0, %v2946_v45 }
 0x424   :  { %v1146_v48 = vadd.f32 1.0, %v2948_v46  ;;  %v2950_v49 = vpop.eup %2949 }
 0x425   :  { %2953 = vrcp.f32 %v1140_v47  ;;  %v2952_v50 = vpop.eup %2951  ;;  %v1153_v54 = vadd.f32 1.0, %v2950_v49 }
 0x426   :  { %2955 = vrcp.f32 %v1146_v48 }
 0x427   :  { %2957 = vrcp.f32 %v1153_v54 }
 0x42f   :  { %v2954_v51 = vpop.eup %2953 }
 0x430   :  { %v2956_v52 = vpop.eup %2955  ;;  %v1158_v53 = vmul.f32 %v2954_v51, %v2952_v50 }
 0x431   :  { %v1157_v55 = vmul.f32 %v2956_v52, %v3630_v61  ;;  %v2958_v27 = vpop.eup %2957  ;;  %v2276_v61 = vld [vmem:[%s3899_s0 + $0x80] sm:$0xff] }
 0x433   :  { %v3680_v57 = vadd.f32 %v1158_v53, %v1157_v55 }
 0x435   :  { %2959 = vtanh.f32 %v3680_v57 }
 0x43f   :  { %v2960_v28 = vpop.eup %2959 }
 0x440   :  { %v1161_v30 = vmul.f32 %v2960_v28, %v2958_v27 }
 0x442   :  { %1299 = vmatmul.mubr.f32.vlgmr.msra.gmra.mrb[8].mxu0 %v1161_v30  ;;  %1370 = vmatmul.mubr.f32.vlgmr.msra.gmra.mrb[8].mxu1 %v1161_v30 }
 0x443   :  { %2681 = vmatpush1.bf16.msra.mxu0 %v3341_v56  ;;  %2713 = vmatpush1.bf16.msra.mxu1 %v3352_v59 }
 0x444   :  { %2683 = vmatprep.subr.bf16.mxu0 %v3343_v60  ;;  %2715 = vmatprep.subr.bf16.mxu1 %v3359_v0 }
 0x445   :  { %1541 = vmatprep.mubr.f32.mxu0 %v3027_v5  ;;  %1612 = vmatprep.mubr.f32.mxu1 %v3027_v5 }
 0x447   :  { %2685 = vmatpush1.bf16.msra.mxu0 %v3356_v1  ;;  %2717 = vmatpush1.bf16.msra.mxu1 %v3368_v2 }
 0x448   :  { %2687 = vmatprep.subr.bf16.mxu0 %v3362_v4  ;;  %2719 = vmatprep.subr.bf16.mxu1 %v3372_v3 }
 0x44b   :  { %2689 = vmatpush1.bf16.msra.mxu0 %v3378_v6  ;;  %2721 = vmatpush1.bf16.msra.mxu1 %v3388_v8 }
 0x44c   :  { %2691 = vmatprep.subr.bf16.mxu0 %v3382_v7  ;;  %2723 = vmatprep.subr.bf16.mxu1 %v3392_v9 }
 0x44f   :  { %2693 = vmatpush1.bf16.msra.mxu0 %v3397_v10  ;;  %2725 = vmatpush1.bf16.msra.mxu1 %v3406_v12 }
 0x450   :  { %2695 = vmatprep.subr.bf16.mxu0 %v3401_v11  ;;  %2727 = vmatprep.subr.bf16.mxu1 %v3410_v13 }
 0x453   :  { %2697 = vmatpush1.bf16.msra.mxu0 %v3415_v14  ;;  %2729 = vmatpush1.bf16.msra.mxu1 %v3424_v16 }
 0x454   :  { %2699 = vmatprep.subr.bf16.mxu0 %v3419_v15  ;;  %2731 = vmatprep.subr.bf16.mxu1 %v3428_v17 }
 0x457   :  { %2701 = vmatpush1.bf16.msra.mxu0 %v3433_v18  ;;  %2733 = vmatpush1.bf16.msra.mxu1 %v3442_v20 }
 0x458   :  { %2703 = vmatprep.subr.bf16.mxu0 %v3437_v19  ;;  %2735 = vmatprep.subr.bf16.mxu1 %v3446_v21 }
 0x45b   :  { %2705 = vmatpush1.bf16.msra.mxu0 %v3451_v22  ;;  %2737 = vmatpush1.bf16.msra.mxu1 %v3460_v24 }
 0x45c   :  { %2707 = vmatprep.subr.bf16.mxu0 %v3455_v23  ;;  %2739 = vmatprep.subr.bf16.mxu1 %v3464_v26 }
 0x45f   :  { %2709 = vmatpush1.bf16.msra.mxu0 %v3469_v29  ;;  %2741 = vmatpush1.bf16.msra.mxu1 %v3475_v32 }
 0x460   :  { %2743 = vmatprep.subr.bf16.mxu0 %v3338_v58  ;;  %2775 = vmatprep.subr.bf16.mxu1 %v3348_v62 }
 0x515   :  { %v1300_v25 = vpop.f32.mrb[8].mxu0  ;;  %v1371_v31 = vpop.f32.mrb[8].mxu1 }
 0x516   :  { %v1376_v33 = vadd.f32 %v2276_v61, %v1300_v25  ;;  %v1302_v34 = vpop.f32.mrb[9].mxu0  ;;  %v1373_v35 = vpop.f32.mrb[9].mxu1  ;;  %v1378_v43 = vadd.f32 %v2278_v41, %v1371_v31  ;;  %v2284_v61 = vld [vmem:[%s3899_s0 + $0xa8] sm:$0xff] }
 0x517   :  { %v1377_v36 = vadd.f32 %v2277_v63, %v1302_v34  ;;  %v1379_v40 = vadd.f32 %v2279_v39, %v1373_v35 }
 0x518   :  { %v2280_v37 = vmul.f32 -1.442695, %v1376_v33 }
 0x519   :  { %v2281_v38 = vmul.f32 -1.442695, %v1377_v36  ;;  %v2282_v42 = vmul.f32 -1.442695, %v1379_v40 }
 0x51a   :  { %2961 = vpow2.f32 %v2280_v37 }
 0x51b   :  { %2963 = vpow2.f32 %v2281_v38  ;;  %v2285_v38 = vld [vmem:[%s3899_s0 + $0xb0] sm:$0xff] }
 0x51c   :  { %2965 = vpow2.f32 %v2282_v42 }
 0x51d   :  { %2967 = vtanh.f32 %v1378_v43 }
 0x524   :  { %v2962_v44 = vpop.eup %2961 }
 0x525   :  { %v2964_v45 = vpop.eup %2963  ;;  %v1383_v46 = vadd.f32 1.0, %v2962_v44 }
 0x526   :  { %v1389_v47 = vadd.f32 1.0, %v2964_v45  ;;  %v2966_v48 = vpop.eup %2965 }
 0x527   :  { %2969 = vrcp.f32 %v1383_v46  ;;  %v2968_v49 = vpop.eup %2967  ;;  %v1396_v53 = vadd.f32 1.0, %v2966_v48 }
 0x528   :  { %2971 = vrcp.f32 %v1389_v47 }
 0x529   :  { %2973 = vrcp.f32 %v1396_v53 }
 0x531   :  { %v2970_v50 = vpop.eup %2969 }
 0x532   :  { %v2972_v51 = vpop.eup %2971  ;;  %v1401_v52 = vmul.f32 %v2970_v50, %v2968_v49 }
 0x533   :  { %v1400_v54 = vmul.f32 %v2972_v51, %v3680_v57  ;;  %v2974_v27 = vpop.eup %2973  ;;  %v2283_v57 = vld [vmem:[%s3899_s0 + $0xa0] sm:$0xff] }
 0x535   :  { %v3730_v55 = vadd.f32 %v1401_v52, %v1400_v54 }
 0x537   :  { %2975 = vtanh.f32 %v3730_v55 }
 0x541   :  { %v2976_v28 = vpop.eup %2975 }
 0x542   :  { %v1404_v30 = vmul.f32 %v2976_v28, %v2974_v27  ;;  %v2141_v28 = vld [vmem:[%s3901_s2 + $0x8] sm:$0xff] }
 0x544   :  { %1542 = vmatmul.mubr.f32.vlgmr.msra.gmra.mrb[10].mxu0 %v1404_v30  ;;  %1613 = vmatmul.mubr.f32.vlgmr.msra.gmra.mrb[10].mxu1 %v1404_v30 }
 0x545   :  { %2745 = vmatpush1.bf16.msra.mxu0 %v3341_v56  ;;  %2777 = vmatpush1.bf16.msra.mxu1 %v3352_v59 }
 0x546   :  { %2747 = vmatprep.subr.bf16.mxu0 %v3343_v60  ;;  %2779 = vmatprep.subr.bf16.mxu1 %v3359_v0 }
 0x547   :  { %1784 = vmatprep.mubr.f32.mxu0 %v3027_v5  ;;  %1855 = vmatprep.mubr.f32.mxu1 %v3027_v5 }
 0x549   :  { %2749 = vmatpush1.bf16.msra.mxu0 %v3356_v1  ;;  %2781 = vmatpush1.bf16.msra.mxu1 %v3368_v2 }
 0x54a   :  { %2751 = vmatprep.subr.bf16.mxu0 %v3362_v4  ;;  %2783 = vmatprep.subr.bf16.mxu1 %v3372_v3 }
 0x54d   :  { %2753 = vmatpush1.bf16.msra.mxu0 %v3378_v6  ;;  %2785 = vmatpush1.bf16.msra.mxu1 %v3388_v8 }
 0x54e   :  { %2755 = vmatprep.subr.bf16.mxu0 %v3382_v7  ;;  %2787 = vmatprep.subr.bf16.mxu1 %v3392_v9 }
 0x551   :  { %2757 = vmatpush1.bf16.msra.mxu0 %v3397_v10  ;;  %2789 = vmatpush1.bf16.msra.mxu1 %v3406_v12 }
 0x552   :  { %2759 = vmatprep.subr.bf16.mxu0 %v3401_v11  ;;  %2791 = vmatprep.subr.bf16.mxu1 %v3410_v13 }
 0x555   :  { %2761 = vmatpush1.bf16.msra.mxu0 %v3415_v14  ;;  %2793 = vmatpush1.bf16.msra.mxu1 %v3424_v16 }
 0x556   :  { %2763 = vmatprep.subr.bf16.mxu0 %v3419_v15  ;;  %2795 = vmatprep.subr.bf16.mxu1 %v3428_v17 }
 0x559   :  { %2765 = vmatpush1.bf16.msra.mxu0 %v3433_v18  ;;  %2797 = vmatpush1.bf16.msra.mxu1 %v3442_v20 }
 0x55a   :  { %2767 = vmatprep.subr.bf16.mxu0 %v3437_v19  ;;  %2799 = vmatprep.subr.bf16.mxu1 %v3446_v21 }
 0x55d   :  { %2769 = vmatpush1.bf16.msra.mxu0 %v3451_v22  ;;  %2801 = vmatpush1.bf16.msra.mxu1 %v3460_v24 }
 0x55e   :  { %2771 = vmatprep.subr.bf16.mxu0 %v3455_v23  ;;  %2803 = vmatprep.subr.bf16.mxu1 %v3464_v26 }
 0x561   :  { %2773 = vmatpush1.bf16.msra.mxu0 %v3469_v29  ;;  %2805 = vmatpush1.bf16.msra.mxu1 %v3475_v32 }
 0x562   :  { %2807 = vmatprep.subr.bf16.mxu0 %v3338_v58  ;;  %2839 = vmatprep.subr.bf16.mxu1 %v3348_v62  ;;  %v2286_v58 = vld [vmem:[%s3899_s0 + $0xb8] sm:$0xff] }
 0x617   :  { %v1543_v63 = vpop.f32.mrb[10].mxu0  ;;  %v1614_v25 = vpop.f32.mrb[10].mxu1 }
 0x618   :  { %v1619_v31 = vadd.f32 %v2283_v57, %v1543_v63  ;;  %v1545_v33 = vpop.f32.mrb[11].mxu0  ;;  %v1616_v34 = vpop.f32.mrb[11].mxu1  ;;  %v1621_v40 = vadd.f32 %v2285_v38, %v1614_v25  ;;  %v3028_v57 = vmov 0.0|0.0   ;;  %v2143_v63 = vld [vmem:[%s3901_s2 + $0x18] sm:$0xff] }
 0x619   :  { %v1620_v35 = vadd.f32 %v2284_v61, %v1545_v33  ;;  %v1622_v62 = vadd.f32 %v2286_v58, %v1616_v34  ;;  %v2142_v61 = vld [vmem:[%s3901_s2 + $0x10] sm:$0xff]  ;;  %v2145_v33 = vld [vmem:[%s3901_s2 + $0x28] sm:$0xff]  ;;  %v2148_v58 = vld [vmem:[%s3901_s2 + $0x40] sm:$0xff] }
 0x61a   :  { %v2287_v36 = vmul.f32 -1.442695, %v1619_v31  ;;  %v2874_v25 = vpack.c.bf16 %v2143_v63, %v2142_v61  ;;  %v2144_v31 = vld [vmem:[%s3901_s2 + $0x20] sm:$0xff] }
 0x61b   :  { %v2288_v37 = vmul.f32 -1.442695, %v1620_v35  ;;  %v2289_v39 = vmul.f32 -1.442695, %v1622_v62  ;;  %v2877_v34 = vpack.c.bf16 %v2145_v33, %v2144_v31  ;;  %v2146_v35 = vld [vmem:[%s3901_s2 + $0x30] sm:$0xff]  ;;  %v2149_v62 = vld [vmem:[%s3901_s2 + $0x48] sm:$0xff] }
 0x61c   :  { %2977 = vpow2.f32 %v2287_v36  ;;  %v2147_v36 = vld [vmem:[%s3901_s2 + $0x38] sm:$0xff]  ;;  %v2883_v38 = vpack.c.bf16 %v2149_v62, %v2148_v58 }
 0x61d   :  { %2979 = vpow2.f32 %v2288_v37  ;;  %v2880_v37 = vpack.c.bf16 %v2147_v36, %v2146_v35 }
 0x61e   :  { %2981 = vpow2.f32 %v2289_v39  ;;  %v2150_v39 = vld [vmem:[%s3901_s2 + $0x50] sm:$0xff] }
 0x61f   :  { %2983 = vtanh.f32 %v1621_v40  ;;  %v2151_v40 = vld [vmem:[%s3901_s2 + $0x58] sm:$0xff] }
 0x626   :  { %v2978_v41 = vpop.eup %2977 }
 0x627   :  { %v2980_v42 = vpop.eup %2979  ;;  %v1626_v43 = vadd.f32 1.0, %v2978_v41  ;;  %v2152_v41 = vld [vmem:[%s3901_s2 + $0x60] sm:$0xff] }
 0x628   :  { %v1632_v44 = vadd.f32 1.0, %v2980_v42  ;;  %v2982_v45 = vpop.eup %2981  ;;  %v2886_v42 = vpack.c.bf16 %v2151_v40, %v2150_v39 }
 0x629   :  { %2985 = vrcp.f32 %v1626_v43  ;;  %v2984_v46 = vpop.eup %2983  ;;  %v1639_v50 = vadd.f32 1.0, %v2982_v45  ;;  %v2153_v43 = vld [vmem:[%s3901_s2 + $0x68] sm:$0xff]  ;;  %v2154_v45 = vld [vmem:[%s3901_s2 + $0x70] sm:$0xff] }
 0x62a   :  { %2987 = vrcp.f32 %v1632_v44  ;;  %v2889_v44 = vpack.c.bf16 %v2153_v43, %v2152_v41 }
 0x62b   :  { %2989 = vrcp.f32 %v1639_v50 }
 0x633   :  { %v2986_v47 = vpop.eup %2985 }
 0x634   :  { %v2988_v48 = vpop.eup %2987  ;;  %v1644_v49 = vmul.f32 %v2986_v47, %v2984_v46  ;;  %v2155_v46 = vld [vmem:[%s3901_s2 + $0x78] sm:$0xff] }
 0x635   :  { %v1643_v51 = vmul.f32 %v2988_v48, %v3730_v55  ;;  %v2990_v53 = vpop.eup %2989  ;;  %v2140_v55 = vld [vmem:[%s3901_s2] sm:$0xff]  ;;  %v2892_v47 = vpack.c.bf16 %v2155_v46, %v2154_v45 }
 0x636   :  { %v2871_v30 = vpack.c.bf16 %v2141_v28, %v2140_v55  ;;  %v2297_v48 = vld [vmem:[%s3899_s0 + $0xe0] sm:$0xff] }
 0x637   :  { %v3780_v52 = vadd.f32 %v1644_v49, %v1643_v51 }
 0x639   :  { %2991 = vtanh.f32 %v3780_v52 }
 0x643   :  { %v2992_v54 = vpop.eup %2991 }
 0x644   :  { %v1647_v27 = vmul.f32 %v2992_v54, %v2990_v53 }
 0x646   :  { %1785 = vmatmul.mubr.f32.vlgmr.msra.gmra.mrb[12].mxu0 %v1647_v27  ;;  %1856 = vmatmul.mubr.f32.vlgmr.msra.gmra.mrb[12].mxu1 %v1647_v27 }
 0x647   :  { %2809 = vmatpush1.bf16.msra.mxu0 %v3341_v56  ;;  %2841 = vmatpush1.bf16.msra.mxu1 %v3352_v59  ;;  %v2290_v56 = vld [vmem:[%s3899_s0 + $0xc0] sm:$0xff]  ;;  %v2291_v59 = vld [vmem:[%s3899_s0 + $0xc8] sm:$0xff] }
 0x648   :  { %2811 = vmatprep.subr.bf16.mxu0 %v3343_v60  ;;  %2843 = vmatprep.subr.bf16.mxu1 %v3359_v0 }
 0x649   :  { %2027 = vmatprep.mubr.f32.mxu0 %v3027_v5  ;;  %2098 = vmatprep.mubr.f32.mxu1 %v3027_v5 }
 0x64b   :  { %2813 = vmatpush1.bf16.msra.mxu0 %v3356_v1  ;;  %2845 = vmatpush1.bf16.msra.mxu1 %v3368_v2 }
 0x64c   :  { %2815 = vmatprep.subr.bf16.mxu0 %v3362_v4  ;;  %2847 = vmatprep.subr.bf16.mxu1 %v3372_v3 }
 0x64f   :  { %2817 = vmatpush1.bf16.msra.mxu0 %v3378_v6  ;;  %2849 = vmatpush1.bf16.msra.mxu1 %v3388_v8  ;;  %v2293_v8 = vld [vmem:[%s3899_s0 + $0xd8] sm:$0xff] }
 0x650   :  { %2819 = vmatprep.subr.bf16.mxu0 %v3382_v7  ;;  %2851 = vmatprep.subr.bf16.mxu1 %v3392_v9 }
 0x653   :  { %2821 = vmatpush1.bf16.msra.mxu0 %v3397_v10  ;;  %2853 = vmatpush1.bf16.msra.mxu1 %v3406_v12  ;;  %v2292_v10 = vld [vmem:[%s3899_s0 + $0xd0] sm:$0xff] }
 0x654   :  { %2823 = vmatprep.subr.bf16.mxu0 %v3401_v11  ;;  %2855 = vmatprep.subr.bf16.mxu1 %v3410_v13 }
 0x657   :  { %2825 = vmatpush1.bf16.msra.mxu0 %v3415_v14  ;;  %2857 = vmatpush1.bf16.msra.mxu1 %v3424_v16 }
 0x658   :  { %2827 = vmatprep.subr.bf16.mxu0 %v3419_v15  ;;  %2859 = vmatprep.subr.bf16.mxu1 %v3428_v17 }
 0x65b   :  { %2829 = vmatpush1.bf16.msra.mxu0 %v3433_v18  ;;  %2861 = vmatpush1.bf16.msra.mxu1 %v3442_v20 }
 0x65c   :  { %2831 = vmatprep.subr.bf16.mxu0 %v3437_v19  ;;  %2863 = vmatprep.subr.bf16.mxu1 %v3446_v21 }
 0x65f   :  { %2833 = vmatpush1.bf16.msra.mxu0 %v3451_v22  ;;  %2865 = vmatpush1.bf16.msra.mxu1 %v3460_v24 }
 0x660   :  { %2835 = vmatprep.subr.bf16.mxu0 %v3455_v23  ;;  %2867 = vmatprep.subr.bf16.mxu1 %v3464_v26 }
 0x663   :  { %2837 = vmatpush1.bf16.msra.mxu0 %v3469_v29  ;;  %2869 = vmatpush1.bf16.msra.mxu1 %v3475_v32 }
 0x664   :  { %2870 = vmatprep.subr.bf16.mxu0 %v3028_v57 }
 0x719   :  { %v1786_v60 = vpop.f32.mrb[12].mxu0  ;;  %v1857_v1 = vpop.f32.mrb[12].mxu1 }
 0x71a   :  { %v1862_v0 = vadd.f32 %v2290_v56, %v1786_v60  ;;  %v1788_v4 = vpop.f32.mrb[13].mxu0  ;;  %v1859_v2 = vpop.f32.mrb[13].mxu1  ;;  %v1864_v12 = vadd.f32 %v2292_v10, %v1857_v1  ;;  %v2299_v1 = vld [vmem:[%s3899_s0 + $0xf0] sm:$0xff] }
 0x71b   :  { %v1863_v3 = vadd.f32 %v2291_v59, %v1788_v4  ;;  %v1865_v9 = vadd.f32 %v2293_v8, %v1859_v2  ;;  %v2300_v59 = vld [vmem:[%s3899_s0 + $0xf8] sm:$0xff] }
 0x71c   :  { %v2294_v6 = vmul.f32 -1.442695, %v1862_v0 }
 0x71d   :  { %v2295_v7 = vmul.f32 -1.442695, %v1863_v3  ;;  %v2296_v11 = vmul.f32 -1.442695, %v1865_v9 }
 0x71e   :  { %2993 = vpow2.f32 %v2294_v6 }
 0x71f   :  { %2995 = vpow2.f32 %v2295_v7 }
 0x720   :  { %2997 = vpow2.f32 %v2296_v11 }
 0x721   :  { %2999 = vtanh.f32 %v1864_v12 }
 0x728   :  { %v2994_v13 = vpop.eup %2993 }
 0x729   :  { %v2996_v14 = vpop.eup %2995  ;;  %v1869_v15 = vadd.f32 1.0, %v2994_v13 }
 0x72a   :  { %v1875_v16 = vadd.f32 1.0, %v2996_v14  ;;  %v2998_v17 = vpop.eup %2997 }
 0x72b   :  { %3001 = vrcp.f32 %v1869_v15  ;;  %v3000_v18 = vpop.eup %2999  ;;  %v1882_v22 = vadd.f32 1.0, %v2998_v17 }
 0x72c   :  { %3003 = vrcp.f32 %v1875_v16 }
 0x72d   :  { %3005 = vrcp.f32 %v1882_v22 }
 0x735   :  { %v3002_v19 = vpop.eup %3001 }
 0x736   :  { %v3004_v20 = vpop.eup %3003  ;;  %v1887_v21 = vmul.f32 %v3002_v19, %v3000_v18  ;;  %v2304_v19 = vld [vmem:[%s3902_s3] ss:$0 sm:$0xff] }
 0x737   :  { %v1886_v23 = vmul.f32 %v3004_v20, %v3780_v52  ;;  %v3006_v26 = vpop.eup %3005 }
 0x739   :  { %v3828_v24 = vadd.f32 %v1887_v21, %v1886_v23 }
 0x73b   :  { %3007 = vtanh.f32 %v3828_v24 }
 0x745   :  { %v3008_v29 = vpop.eup %3007 }
 0x746   :  { %v1890_v32 = vmul.f32 %v3008_v29, %v3006_v26 }
 0x748   :  { %2028 = vmatmul.mubr.f32.vlgmr.msra.gmra.mrb[14].mxu0 %v1890_v32  ;;  %2099 = vmatmul.mubr.f32.vlgmr.msra.gmra.mrb[14].mxu1 %v1890_v32 }
 0x749   :  { %2872 = vmatpush3.bf16.msra.mxu0 %v2871_v30  ;;  %2355 = vmatprep.mubr.msk.f32.mxu0 %vm3029_vm0, %v3027_v5  ;;  %v2298_v5 = vld [vmem:[%s3899_s0 + $0xe8] sm:$0xff] }
 0x74a   :  { %2873 = vmatprep.subr.bf16.mxu0 %v3028_v57 }
 0x74d   :  { %2875 = vmatpush3.bf16.msra.mxu0 %v2874_v25 }
 0x74e   :  { %2876 = vmatprep.subr.bf16.mxu0 %v3028_v57 }
 0x751   :  { %2878 = vmatpush3.bf16.msra.mxu0 %v2877_v34 }
 0x752   :  { %2879 = vmatprep.subr.bf16.mxu0 %v3028_v57 }
 0x755   :  { %2881 = vmatpush3.bf16.msra.mxu0 %v2880_v37 }
 0x756   :  { %2882 = vmatprep.subr.bf16.mxu0 %v3028_v57 }
 0x759   :  { %2884 = vmatpush3.bf16.msra.mxu0 %v2883_v38 }
 0x75a   :  { %2885 = vmatprep.subr.bf16.mxu0 %v3028_v57 }
 0x75d   :  { %2887 = vmatpush3.bf16.msra.mxu0 %v2886_v42 }
 0x75e   :  { %2888 = vmatprep.subr.bf16.mxu0 %v3028_v57 }
 0x761   :  { %2890 = vmatpush3.bf16.msra.mxu0 %v2889_v44 }
 0x762   :  { %2891 = vmatprep.subr.bf16.mxu0 %v3028_v57 }
 0x765   :  { %2893 = vmatpush3.bf16.msra.mxu0 %v2892_v47 }
 0x81b   :  { %v2029_v49 = vpop.f32.mrb[14].mxu0  ;;  %v2100_v50 = vpop.f32.mrb[14].mxu1 }
 0x81c   :  { %v2105_v51 = vadd.f32 %v2297_v48, %v2029_v49  ;;  %v2031_v52 = vpop.f32.mrb[15].mxu0  ;;  %v2102_v53 = vpop.f32.mrb[15].mxu1  ;;  %v2107_v4 = vadd.f32 %v2299_v1, %v2100_v50 }
 0x81d   :  { %v2106_v54 = vadd.f32 %v2298_v5, %v2031_v52  ;;  %v2108_v60 = vadd.f32 %v2300_v59, %v2102_v53 }
 0x81e   :  { %v2301_v27 = vmul.f32 -1.442695, %v2105_v51 }
 0x81f   :  { %v2302_v56 = vmul.f32 -1.442695, %v2106_v54  ;;  %v2303_v0 = vmul.f32 -1.442695, %v2108_v60 }
 0x820   :  { %3009 = vpow2.f32 %v2301_v27 }
 0x821   :  { %3011 = vpow2.f32 %v2302_v56 }
 0x822   :  { %3013 = vpow2.f32 %v2303_v0 }
 0x823   :  { %3015 = vtanh.f32 %v2107_v4 }
 0x82a   :  { %v3010_v2 = vpop.eup %3009 }
 0x82b   :  { %v3012_v3 = vpop.eup %3011  ;;  %v2112_v6 = vadd.f32 1.0, %v3010_v2 }
 0x82c   :  { %v2118_v7 = vadd.f32 1.0, %v3012_v3  ;;  %v3014_v8 = vpop.eup %3013 }
 0x82d   :  { %3017 = vrcp.f32 %v2112_v6  ;;  %v3016_v9 = vpop.eup %3015  ;;  %v2125_v13 = vadd.f32 1.0, %v3014_v8 }
 0x82e   :  { %3019 = vrcp.f32 %v2118_v7 }
 0x82f   :  { %3021 = vrcp.f32 %v2125_v13 }
 0x837   :  { %v3018_v10 = vpop.eup %3017 }
 0x838   :  { %v3020_v11 = vpop.eup %3019  ;;  %v2130_v12 = vmul.f32 %v3018_v10, %v3016_v9 }
 0x839   :  { %v2129_v14 = vmul.f32 %v3020_v11, %v3828_v24  ;;  %v3022_v16 = vpop.eup %3021 }
 0x83b   :  { %v2131_v15 = vadd.f32 %v2130_v12, %v2129_v14 }
 0x83d   :  { %3023 = vtanh.f32 %v2131_v15 }
 0x847   :  { %v3024_v17 = vpop.eup %3023 }
 0x848   :  { %v2133_v18 = vmul.f32 %v3024_v17, %v3022_v16 }
 0x84a   :  { %2356 = vmatmul.mubr.f32.vlgmr.msra.gmra.mrb[16].mxu0 %v2133_v18 }
 0x91d   :  { %v2229_v20 = vpop.f32.mrb[16].mxu0 }
 0x91e   :  { %v2230_v21 = vadd.f32 %v2304_v19, %v2229_v20  ;;  %v2357_v22 = vpop.f32.mrb[17].mxu0 }
 0x920   :  { %2233 = vst [vmem:[%s3903_s4] sm:$0xff] %v2230_v21 }
 0x921   :  { %2238 = vsyncmov [#allocation5] }
 0x924   :  { %s2239_s29 = vpop.sfrf %2238 }
 0x925   :  { %p2305_p0 = scmp.ne.s32.totalorder %s2239_s29, 0 }
 0x927   :  { %2243 = shalt.err (%p2305_p0)  }

</bundles_post_ra>
